<compile_context>
chip_gen: v7x
topology: tpu7x:2x2x1
jax: 0.10.0
libtpu: 0.0.40
codegen_flags: <defaults>
</compile_context>

<pallas_src>
import math

import numpy as np
import jax
import jax.numpy as jnp
from jax import lax
from jax.experimental import pallas as pl
from jax.experimental.pallas import tpu as pltpu

# (out_channels, kernel, stride) of the three convs in the module.
_CONV_CFG = ((8, 8, 4), (16, 4, 2), (16, 3, 1))
_N_OUT = 64


def _conv_out(n, k, s):
    return (n - k) // s + 1


def _layer_dims(C, H, W):
    """Static (IC, Hi, Wi, OC, k, s, Ho, Wo) for each conv layer."""
    dims = []
    ic, h, w = C, H, W
    for oc, k, s in _CONV_CFG:
        ho, wo = _conv_out(h, k, s), _conv_out(w, k, s)
        dims.append((ic, h, w, oc, k, s, ho, wo))
        ic, h, w = oc, ho, wo
    return dims


def _col_selector(Wi, k, s):
    """Constant 0/1 matrix S (Wi, k*Wo): S[wo*s+kw, kw*Wo+wo] = 1.

    Right-multiplying a (rows, Wi) activation band by S performs the stride-s
    width subsampling for every kw tap in a single MXU matmul."""
    Wo = _conv_out(Wi, k, s)
    sel = np.zeros((Wi, k * Wo), np.float32)
    for kw in range(k):
        for wo in range(Wo):
            sel[wo * s + kw, kw * Wo + wo] = 1.0
    return jnp.asarray(sel)


# ----------------------------------------------------------------------------
# In-kernel building blocks (operate on VMEM-resident values)
# ----------------------------------------------------------------------------
def _conv_relu(a_in, sel, wc, b, *, IC, OC, k, s, Ho, Wo):
    """One Conv2d+ReLU.

    a_in : (Hi*IC, Wi)  rows ordered (h, ic) h-major, lanes = w
    sel  : (Wi, k*Wo)   constant width-subsampling selector
    wc   : (OC, k*k*IC) weights, columns ordered (kw, kh, ic)
    b    : (OC, 1)
    ->   (Ho*OC, Wo)    rows ordered (ho, oc)
    """
    # p_full[h*IC+ic, kw*Wo+wo] = a_in[h*IC+ic, wo*s+kw]   (one matmul, all taps)
    p_full = jnp.dot(a_in, sel, preferred_element_type=jnp.float32)
    out_rows = []
    for ho in range(Ho):
        band = p_full[ho * s * IC:(ho * s + k) * IC, :]                # (k*IC, k*Wo)
        patch = jnp.concatenate(                                       # rows -> (kw, kh, ic)
            [band[:, kw * Wo:(kw + 1) * Wo] for kw in range(k)], axis=0)  # (k*k*IC, Wo)
        t = jnp.dot(wc, patch, preferred_element_type=jnp.float32) + b    # (OC, Wo)
        out_rows.append(jnp.maximum(t, 0.0))
    return jnp.concatenate(out_rows, axis=0)                           # (Ho*OC, Wo)


def _build_kernel(C, H, W):
    dims = _layer_dims(C, H, W)
    _, _, _, OC3, _, _, H3, W3 = dims[-1]

    def kernel(x_ref, sel1_ref, sel2_ref, sel3_ref,
               w1_ref, b1_ref, w2_ref, b2_ref, w3_ref, b3_ref,
               wl_ref, bl_ref, o_ref):
        sels = (sel1_ref, sel2_ref, sel3_ref)
        ws = (w1_ref, w2_ref, w3_ref)
        bs = (b1_ref, b2_ref, b3_ref)

        a = x_ref[0]                                    # (H*C, W) image, VMEM resident
        for (IC, _, _, OC, k, s, Ho, Wo), sref, wref, bref in zip(dims, sels, ws, bs):
            a = _conv_relu(a, sref[...], wref[...], bref[...],
                           IC=IC, OC=OC, k=k, s=s, Ho=Ho, Wo=Wo)

        # Flatten (torch NCHW order, encoded in the pre-permuted wl) + Linear + ReLU,
        # consuming the (H3*OC3, W3) activation column-by-column (no transpose/reshape).
        acc = bl_ref[...]                               # (64, 1)
        for w in range(W3):
            wlw = wl_ref[w * _N_OUT:(w + 1) * _N_OUT, :]        # (64, H3*OC3)
            acc = acc + jnp.dot(wlw, a[:, w:w + 1],
                                preferred_element_type=jnp.float32)
        o_ref[0] = jnp.maximum(acc, 0.0)                # (64, 1)

    return kernel


# ----------------------------------------------------------------------------
# Parameters (PyTorch layouts) and one-time re-layout for the kernel
# ----------------------------------------------------------------------------
def init_params(key, in_channels, n_flatten):
    """Random params in PyTorch layouts: Conv2d (OC,IC,KH,KW), Linear (out,in)."""
    ks = jax.random.split(key, 8)

    def w_init(k, shape, fan_in):
        return jax.random.normal(k, shape, jnp.float32) / math.sqrt(fan_in)

    return {
        "w1": w_init(ks[0], (8, in_channels, 8, 8), in_channels * 64),
        "b1": 0.01 * jax.random.normal(ks[1], (8,), jnp.float32),
        "w2": w_init(ks[2], (16, 8, 4, 4), 8 * 16),
        "b2": 0.01 * jax.random.normal(ks[3], (16,), jnp.float32),
        "w3": w_init(ks[4], (16, 16, 3, 3), 16 * 9),
        "b3": 0.01 * jax.random.normal(ks[5], (16,), jnp.float32),
        "wl": w_init(ks[6], (_N_OUT, n_flatten), n_flatten),
        "bl": 0.01 * jax.random.normal(ks[7], (_N_OUT,), jnp.float32),
    }


def prepare_params(raw, C, H, W):
    """One-time conversion to kernel layouts (done at init, never in the forward)."""
    dims = _layer_dims(C, H, W)
    _, _, _, OC3, _, _, H3, W3 = dims[-1]

    def conv_w(w):  # (OC,IC,KH,KW) -> (OC, KW*KH*IC), columns ordered (kw, kh, ic)
        OC, IC, KH, KW = w.shape
        return jnp.transpose(w, (0, 3, 2, 1)).reshape(OC, KW * KH * IC).astype(jnp.float32)

    # Linear weight (64, OC3*H3*W3), torch flatten order (c,h,w)
    #   -> (W3*64, H3*OC3): row = w*64 + n, col = h*OC3 + c
    wl = raw["wl"].astype(jnp.float32)
    wl_prep = (wl.reshape(_N_OUT, OC3, H3, W3)
                 .transpose(3, 0, 2, 1)
                 .reshape(W3 * _N_OUT, H3 * OC3))

    return {
        "sel1": _col_selector(dims[0][2], dims[0][4], dims[0][5]),
        "sel2": _col_selector(dims[1][2], dims[1][4], dims[1][5]),
        "sel3": _col_selector(dims[2][2], dims[2][4], dims[2][5]),
        "w1": conv_w(raw["w1"]), "b1": raw["b1"].reshape(-1, 1).astype(jnp.float32),
        "w2": conv_w(raw["w2"]), "b2": raw["b2"].reshape(-1, 1).astype(jnp.float32),
        "w3": conv_w(raw["w3"]), "b3": raw["b3"].reshape(-1, 1).astype(jnp.float32),
        "wl": wl_prep, "bl": raw["bl"].reshape(-1, 1).astype(jnp.float32),
    }


# ----------------------------------------------------------------------------
# Fused forward: one pallas_call, grid over batch
# ----------------------------------------------------------------------------
def extractor_forward(x, params):
    """x: (B, C, H, W) float32 NCHW -> (B, 64) float32 (== PyTorch Extractor.forward)."""
    B, C, H, W = x.shape
    kernel = _build_kernel(C, H, W)

    # Single cheap layout change of the *input* only: rows = (h, c), lanes = w.
    x_hcw = x.astype(jnp.float32).transpose(0, 2, 1, 3).reshape(B, H * C, W)

    def full_spec(a):
        return pl.BlockSpec(a.shape, lambda b: (0,) * a.ndim)  # resident across the grid

    args = (x_hcw, params["sel1"], params["sel2"], params["sel3"],
            params["w1"], params["b1"], params["w2"], params["b2"],
            params["w3"], params["b3"], params["wl"], params["bl"])

    in_specs = [pl.BlockSpec((1, H * C, W), lambda b: (b, 0, 0))]
    in_specs += [full_spec(a) for a in args[1:]]

    out = pl.pallas_call(
        kernel,
        out_shape=jax.ShapeDtypeStruct((B, _N_OUT, 1), jnp.float32),
        grid=(B,),
        in_specs=in_specs,
        out_specs=pl.BlockSpec((1, _N_OUT, 1), lambda b: (b, 0, 0)),
        compiler_params=pltpu.CompilerParams(
            dimension_semantics=("parallel",),
        ),
    )(*args)
    return out.reshape(B, _N_OUT)


# ----------------------------------------------------------------------------
# Pure-JAX reference (exact PyTorch forward semantics) for the self-check
# ----------------------------------------------------------------------------
def extractor_reference(x, raw):
    def conv(h, w, b, s):
        o = lax.conv_general_dilated(h, w, window_strides=(s, s), padding="VALID",
                                     dimension_numbers=("NCHW", "OIHW", "NCHW"))
        return jax.nn.relu(o + b.reshape(1, -1, 1, 1))

    h = conv(x, raw["w1"], raw["b1"], 4)
    h = conv(h, raw["w2"], raw["b2"], 2)
    h = conv(h, raw["w3"], raw["b3"], 1)
    flat = h.reshape(h.shape[0], -1)                  # torch.nn.Flatten (NCHW order)
    return jax.nn.relu(flat @ raw["wl"].T + raw["bl"])


if __name__ == "__main__":
    # PepperReachDepth camera obs: single-channel depth image.
    B, C, H, W = 2, 1, 64, 64          # 64 -> 15 (k8 s4) -> 6 (k4 s2) -> 4 (k3 s1)
    dims = _layer_dims(C, H, W)
    _, _, _, OC3, _, _, H3, W3 = dims[-1]
    n_flatten = OC3 * H3 * W3          # 16*4*4 = 256

    key = jax.random.PRNGKey(0)
    kx, kp = jax.random.split(key)
    x = jax.random.uniform(kx, (B, C, H, W), jnp.float32)
    raw = init_params(kp, C, n_flatten)
    params = prepare_params(raw, C, H, W)   # one-time weight/constant re-layout

    fwd = jax.jit(extractor_forward)
    out = jax.block_until_ready(fwd(x, params))

    assert out.shape == (B, _N_OUT), out.shape
    assert out.dtype == jnp.float32
    assert bool(jnp.all(out >= 0.0))        # final ReLU

    ref = extractor_reference(x, raw)
    err = float(jnp.max(jnp.abs(out - ref)))
    assert err < 5e-2, f"mismatch vs reference: max abs err {err}"

    print("KERNEL_OK")
</pallas_src>

<mosaic_0001>
module attributes {stable_mosaic.version = 11 : i64} {
  func.func @kernel(%arg0: i32, %arg1: memref<1x64x64xf32, #tpu.memory_space<vmem>>, %arg2: memref<64x120xf32, #tpu.memory_space<vmem>>, %arg3: memref<15x24xf32, #tpu.memory_space<vmem>>, %arg4: memref<6x12xf32, #tpu.memory_space<vmem>>, %arg5: memref<8x64xf32, #tpu.memory_space<vmem>>, %arg6: memref<8x1xf32, #tpu.memory_space<vmem>>, %arg7: memref<16x128xf32, #tpu.memory_space<vmem>>, %arg8: memref<16x1xf32, #tpu.memory_space<vmem>>, %arg9: memref<16x144xf32, #tpu.memory_space<vmem>>, %arg10: memref<16x1xf32, #tpu.memory_space<vmem>>, %arg11: memref<256x64xf32, #tpu.memory_space<vmem>>, %arg12: memref<64x1xf32, #tpu.memory_space<vmem>>, %arg13: memref<1x64x1xf32, #tpu.memory_space<vmem>>) attributes {dimension_semantics = [#tpu.dimension_semantics<parallel>], iteration_bounds = array<i64: 2>, scalar_prefetch = 0 : i64, scratch_operands = 0 : i64, tpu.core_type = #tpu.core_type<tc>, window_params = [{transform_indices = @transform_0, window_bounds = array<i64: 1, 64, 64>}, {pipeline_mode = #tpu.pipeline_mode<synchronous>, transform_indices = @transform_1, window_bounds = array<i64: 64, 120>}, {pipeline_mode = #tpu.pipeline_mode<synchronous>, transform_indices = @transform_2, window_bounds = array<i64: 15, 24>}, {pipeline_mode = #tpu.pipeline_mode<synchronous>, transform_indices = @transform_3, window_bounds = array<i64: 6, 12>}, {pipeline_mode = #tpu.pipeline_mode<synchronous>, transform_indices = @transform_4, window_bounds = array<i64: 8, 64>}, {pipeline_mode = #tpu.pipeline_mode<synchronous>, transform_indices = @transform_5, window_bounds = array<i64: 8, 1>}, {pipeline_mode = #tpu.pipeline_mode<synchronous>, transform_indices = @transform_6, window_bounds = array<i64: 16, 128>}, {pipeline_mode = #tpu.pipeline_mode<synchronous>, transform_indices = @transform_7, window_bounds = array<i64: 16, 1>}, {pipeline_mode = #tpu.pipeline_mode<synchronous>, transform_indices = @transform_8, window_bounds = array<i64: 16, 144>}, {pipeline_mode = #tpu.pipeline_mode<synchronous>, transform_indices = @transform_9, window_bounds = array<i64: 16, 1>}, {pipeline_mode = #tpu.pipeline_mode<synchronous>, transform_indices = @transform_10, window_bounds = array<i64: 256, 64>}, {pipeline_mode = #tpu.pipeline_mode<synchronous>, transform_indices = @transform_11, window_bounds = array<i64: 64, 1>}, {transform_indices = @transform_12, window_bounds = array<i64: 1, 64, 1>}]} {
    %c0 = arith.constant 0 : index
    %c0_0 = arith.constant 0 : index
    %c0_1 = arith.constant 0 : index
    %0 = vector.load %arg1[%c0, %c0_0, %c0_1] : memref<1x64x64xf32, #tpu.memory_space<vmem>>, vector<1x64x64xf32>
    %1 = vector.shape_cast %0 : vector<1x64x64xf32> to vector<64x64xf32>
    %c0_2 = arith.constant 0 : index
    %c0_3 = arith.constant 0 : index
    %2 = vector.load %arg2[%c0_2, %c0_3] : memref<64x120xf32, #tpu.memory_space<vmem>>, vector<64x120xf32>
    %c0_4 = arith.constant 0 : index
    %c0_5 = arith.constant 0 : index
    %3 = vector.load %arg5[%c0_4, %c0_5] : memref<8x64xf32, #tpu.memory_space<vmem>>, vector<8x64xf32>
    %c0_6 = arith.constant 0 : index
    %c0_7 = arith.constant 0 : index
    %4 = vector.load %arg6[%c0_6, %c0_7] : memref<8x1xf32, #tpu.memory_space<vmem>>, vector<8x1xf32>
    %cst = arith.constant dense<0.000000e+00> : vector<64x120xf32>
    %5 = tpu.matmul %1, %2, %cst {dimension_numbers = #tpu.dot_dimension_numbers<[1], [0], [0], [1], [0, 0, 1, 1], [], []>} : vector<64x64xf32>, vector<64x120xf32>, vector<64x120xf32> -> vector<64x120xf32>
    %6 = vector.extract_strided_slice %5 {offsets = [0, 0], sizes = [8, 120], strides = [1, 1]} : vector<64x120xf32> to vector<8x120xf32>
    %7 = vector.extract_strided_slice %6 {offsets = [0, 0], sizes = [8, 15], strides = [1, 1]} : vector<8x120xf32> to vector<8x15xf32>
    %8 = vector.extract_strided_slice %6 {offsets = [0, 15], sizes = [8, 15], strides = [1, 1]} : vector<8x120xf32> to vector<8x15xf32>
    %9 = vector.extract_strided_slice %6 {offsets = [0, 30], sizes = [8, 15], strides = [1, 1]} : vector<8x120xf32> to vector<8x15xf32>
    %10 = vector.extract_strided_slice %6 {offsets = [0, 45], sizes = [8, 15], strides = [1, 1]} : vector<8x120xf32> to vector<8x15xf32>
    %11 = vector.extract_strided_slice %6 {offsets = [0, 60], sizes = [8, 15], strides = [1, 1]} : vector<8x120xf32> to vector<8x15xf32>
    %12 = vector.extract_strided_slice %6 {offsets = [0, 75], sizes = [8, 15], strides = [1, 1]} : vector<8x120xf32> to vector<8x15xf32>
    %13 = vector.extract_strided_slice %6 {offsets = [0, 90], sizes = [8, 15], strides = [1, 1]} : vector<8x120xf32> to vector<8x15xf32>
    %14 = vector.extract_strided_slice %6 {offsets = [0, 105], sizes = [8, 15], strides = [1, 1]} : vector<8x120xf32> to vector<8x15xf32>
    %15 = tpu.concatenate %7, %8, %9, %10, %11, %12, %13, %14 in 0 : vector<8x15xf32>, vector<8x15xf32>, vector<8x15xf32>, vector<8x15xf32>, vector<8x15xf32>, vector<8x15xf32>, vector<8x15xf32>, vector<8x15xf32> -> vector<64x15xf32>
    %cst_8 = arith.constant dense<0.000000e+00> : vector<8x15xf32>
    %16 = tpu.matmul %3, %15, %cst_8 {dimension_numbers = #tpu.dot_dimension_numbers<[1], [0], [0], [1], [0, 0, 1, 1], [], []>} : vector<8x64xf32>, vector<64x15xf32>, vector<8x15xf32> -> vector<8x15xf32>
    %17 = vector.broadcast %4 : vector<8x1xf32> to vector<8x15xf32>
    %18 = arith.addf %16, %17 : vector<8x15xf32>
    %cst_9 = arith.constant 0.000000e+00 : f32
    %19 = vector.broadcast %cst_9 : f32 to vector<8x15xf32>
    %20 = arith.maximumf %18, %19 : vector<8x15xf32>
    %21 = vector.extract_strided_slice %5 {offsets = [4, 0], sizes = [8, 120], strides = [1, 1]} : vector<64x120xf32> to vector<8x120xf32>
    %22 = vector.extract_strided_slice %21 {offsets = [0, 0], sizes = [8, 15], strides = [1, 1]} : vector<8x120xf32> to vector<8x15xf32>
    %23 = vector.extract_strided_slice %21 {offsets = [0, 15], sizes = [8, 15], strides = [1, 1]} : vector<8x120xf32> to vector<8x15xf32>
    %24 = vector.extract_strided_slice %21 {offsets = [0, 30], sizes = [8, 15], strides = [1, 1]} : vector<8x120xf32> to vector<8x15xf32>
    %25 = vector.extract_strided_slice %21 {offsets = [0, 45], sizes = [8, 15], strides = [1, 1]} : vector<8x120xf32> to vector<8x15xf32>
    %26 = vector.extract_strided_slice %21 {offsets = [0, 60], sizes = [8, 15], strides = [1, 1]} : vector<8x120xf32> to vector<8x15xf32>
    %27 = vector.extract_strided_slice %21 {offsets = [0, 75], sizes = [8, 15], strides = [1, 1]} : vector<8x120xf32> to vector<8x15xf32>
    %28 = vector.extract_strided_slice %21 {offsets = [0, 90], sizes = [8, 15], strides = [1, 1]} : vector<8x120xf32> to vector<8x15xf32>
    %29 = vector.extract_strided_slice %21 {offsets = [0, 105], sizes = [8, 15], strides = [1, 1]} : vector<8x120xf32> to vector<8x15xf32>
    %30 = tpu.concatenate %22, %23, %24, %25, %26, %27, %28, %29 in 0 : vector<8x15xf32>, vector<8x15xf32>, vector<8x15xf32>, vector<8x15xf32>, vector<8x15xf32>, vector<8x15xf32>, vector<8x15xf32>, vector<8x15xf32> -> vector<64x15xf32>
    %cst_10 = arith.constant dense<0.000000e+00> : vector<8x15xf32>
    %31 = tpu.matmul %3, %30, %cst_10 {dimension_numbers = #tpu.dot_dimension_numbers<[1], [0], [0], [1], [0, 0, 1, 1], [], []>} : vector<8x64xf32>, vector<64x15xf32>, vector<8x15xf32> -> vector<8x15xf32>
    %32 = vector.broadcast %4 : vector<8x1xf32> to vector<8x15xf32>
    %33 = arith.addf %31, %32 : vector<8x15xf32>
    %cst_11 = arith.constant 0.000000e+00 : f32
    %34 = vector.broadcast %cst_11 : f32 to vector<8x15xf32>
    %35 = arith.maximumf %33, %34 : vector<8x15xf32>
    %36 = vector.extract_strided_slice %5 {offsets = [8, 0], sizes = [8, 120], strides = [1, 1]} : vector<64x120xf32> to vector<8x120xf32>
    %37 = vector.extract_strided_slice %36 {offsets = [0, 0], sizes = [8, 15], strides = [1, 1]} : vector<8x120xf32> to vector<8x15xf32>
    %38 = vector.extract_strided_slice %36 {offsets = [0, 15], sizes = [8, 15], strides = [1, 1]} : vector<8x120xf32> to vector<8x15xf32>
    %39 = vector.extract_strided_slice %36 {offsets = [0, 30], sizes = [8, 15], strides = [1, 1]} : vector<8x120xf32> to vector<8x15xf32>
    %40 = vector.extract_strided_slice %36 {offsets = [0, 45], sizes = [8, 15], strides = [1, 1]} : vector<8x120xf32> to vector<8x15xf32>
    %41 = vector.extract_strided_slice %36 {offsets = [0, 60], sizes = [8, 15], strides = [1, 1]} : vector<8x120xf32> to vector<8x15xf32>
    %42 = vector.extract_strided_slice %36 {offsets = [0, 75], sizes = [8, 15], strides = [1, 1]} : vector<8x120xf32> to vector<8x15xf32>
    %43 = vector.extract_strided_slice %36 {offsets = [0, 90], sizes = [8, 15], strides = [1, 1]} : vector<8x120xf32> to vector<8x15xf32>
    %44 = vector.extract_strided_slice %36 {offsets = [0, 105], sizes = [8, 15], strides = [1, 1]} : vector<8x120xf32> to vector<8x15xf32>
    %45 = tpu.concatenate %37, %38, %39, %40, %41, %42, %43, %44 in 0 : vector<8x15xf32>, vector<8x15xf32>, vector<8x15xf32>, vector<8x15xf32>, vector<8x15xf32>, vector<8x15xf32>, vector<8x15xf32>, vector<8x15xf32> -> vector<64x15xf32>
    %cst_12 = arith.constant dense<0.000000e+00> : vector<8x15xf32>
    %46 = tpu.matmul %3, %45, %cst_12 {dimension_numbers = #tpu.dot_dimension_numbers<[1], [0], [0], [1], [0, 0, 1, 1], [], []>} : vector<8x64xf32>, vector<64x15xf32>, vector<8x15xf32> -> vector<8x15xf32>
    %47 = vector.broadcast %4 : vector<8x1xf32> to vector<8x15xf32>
    %48 = arith.addf %46, %47 : vector<8x15xf32>
    %cst_13 = arith.constant 0.000000e+00 : f32
    %49 = vector.broadcast %cst_13 : f32 to vector<8x15xf32>
    %50 = arith.maximumf %48, %49 : vector<8x15xf32>
    %51 = vector.extract_strided_slice %5 {offsets = [12, 0], sizes = [8, 120], strides = [1, 1]} : vector<64x120xf32> to vector<8x120xf32>
    %52 = vector.extract_strided_slice %51 {offsets = [0, 0], sizes = [8, 15], strides = [1, 1]} : vector<8x120xf32> to vector<8x15xf32>
    %53 = vector.extract_strided_slice %51 {offsets = [0, 15], sizes = [8, 15], strides = [1, 1]} : vector<8x120xf32> to vector<8x15xf32>
    %54 = vector.extract_strided_slice %51 {offsets = [0, 30], sizes = [8, 15], strides = [1, 1]} : vector<8x120xf32> to vector<8x15xf32>
    %55 = vector.extract_strided_slice %51 {offsets = [0, 45], sizes = [8, 15], strides = [1, 1]} : vector<8x120xf32> to vector<8x15xf32>
    %56 = vector.extract_strided_slice %51 {offsets = [0, 60], sizes = [8, 15], strides = [1, 1]} : vector<8x120xf32> to vector<8x15xf32>
    %57 = vector.extract_strided_slice %51 {offsets = [0, 75], sizes = [8, 15], strides = [1, 1]} : vector<8x120xf32> to vector<8x15xf32>
    %58 = vector.extract_strided_slice %51 {offsets = [0, 90], sizes = [8, 15], strides = [1, 1]} : vector<8x120xf32> to vector<8x15xf32>
    %59 = vector.extract_strided_slice %51 {offsets = [0, 105], sizes = [8, 15], strides = [1, 1]} : vector<8x120xf32> to vector<8x15xf32>
    %60 = tpu.concatenate %52, %53, %54, %55, %56, %57, %58, %59 in 0 : vector<8x15xf32>, vector<8x15xf32>, vector<8x15xf32>, vector<8x15xf32>, vector<8x15xf32>, vector<8x15xf32>, vector<8x15xf32>, vector<8x15xf32> -> vector<64x15xf32>
    %cst_14 = arith.constant dense<0.000000e+00> : vector<8x15xf32>
    %61 = tpu.matmul %3, %60, %cst_14 {dimension_numbers = #tpu.dot_dimension_numbers<[1], [0], [0], [1], [0, 0, 1, 1], [], []>} : vector<8x64xf32>, vector<64x15xf32>, vector<8x15xf32> -> vector<8x15xf32>
    %62 = vector.broadcast %4 : vector<8x1xf32> to vector<8x15xf32>
    %63 = arith.addf %61, %62 : vector<8x15xf32>
    %cst_15 = arith.constant 0.000000e+00 : f32
    %64 = vector.broadcast %cst_15 : f32 to vector<8x15xf32>
    %65 = arith.maximumf %63, %64 : vector<8x15xf32>
    %66 = vector.extract_strided_slice %5 {offsets = [16, 0], sizes = [8, 120], strides = [1, 1]} : vector<64x120xf32> to vector<8x120xf32>
    %67 = vector.extract_strided_slice %66 {offsets = [0, 0], sizes = [8, 15], strides = [1, 1]} : vector<8x120xf32> to vector<8x15xf32>
    %68 = vector.extract_strided_slice %66 {offsets = [0, 15], sizes = [8, 15], strides = [1, 1]} : vector<8x120xf32> to vector<8x15xf32>
    %69 = vector.extract_strided_slice %66 {offsets = [0, 30], sizes = [8, 15], strides = [1, 1]} : vector<8x120xf32> to vector<8x15xf32>
    %70 = vector.extract_strided_slice %66 {offsets = [0, 45], sizes = [8, 15], strides = [1, 1]} : vector<8x120xf32> to vector<8x15xf32>
    %71 = vector.extract_strided_slice %66 {offsets = [0, 60], sizes = [8, 15], strides = [1, 1]} : vector<8x120xf32> to vector<8x15xf32>
    %72 = vector.extract_strided_slice %66 {offsets = [0, 75], sizes = [8, 15], strides = [1, 1]} : vector<8x120xf32> to vector<8x15xf32>
    %73 = vector.extract_strided_slice %66 {offsets = [0, 90], sizes = [8, 15], strides = [1, 1]} : vector<8x120xf32> to vector<8x15xf32>
    %74 = vector.extract_strided_slice %66 {offsets = [0, 105], sizes = [8, 15], strides = [1, 1]} : vector<8x120xf32> to vector<8x15xf32>
    %75 = tpu.concatenate %67, %68, %69, %70, %71, %72, %73, %74 in 0 : vector<8x15xf32>, vector<8x15xf32>, vector<8x15xf32>, vector<8x15xf32>, vector<8x15xf32>, vector<8x15xf32>, vector<8x15xf32>, vector<8x15xf32> -> vector<64x15xf32>
    %cst_16 = arith.constant dense<0.000000e+00> : vector<8x15xf32>
    %76 = tpu.matmul %3, %75, %cst_16 {dimension_numbers = #tpu.dot_dimension_numbers<[1], [0], [0], [1], [0, 0, 1, 1], [], []>} : vector<8x64xf32>, vector<64x15xf32>, vector<8x15xf32> -> vector<8x15xf32>
    %77 = vector.broadcast %4 : vector<8x1xf32> to vector<8x15xf32>
    %78 = arith.addf %76, %77 : vector<8x15xf32>
    %cst_17 = arith.constant 0.000000e+00 : f32
    %79 = vector.broadcast %cst_17 : f32 to vector<8x15xf32>
    %80 = arith.maximumf %78, %79 : vector<8x15xf32>
    %81 = vector.extract_strided_slice %5 {offsets = [20, 0], sizes = [8, 120], strides = [1, 1]} : vector<64x120xf32> to vector<8x120xf32>
    %82 = vector.extract_strided_slice %81 {offsets = [0, 0], sizes = [8, 15], strides = [1, 1]} : vector<8x120xf32> to vector<8x15xf32>
    %83 = vector.extract_strided_slice %81 {offsets = [0, 15], sizes = [8, 15], strides = [1, 1]} : vector<8x120xf32> to vector<8x15xf32>
    %84 = vector.extract_strided_slice %81 {offsets = [0, 30], sizes = [8, 15], strides = [1, 1]} : vector<8x120xf32> to vector<8x15xf32>
    %85 = vector.extract_strided_slice %81 {offsets = [0, 45], sizes = [8, 15], strides = [1, 1]} : vector<8x120xf32> to vector<8x15xf32>
    %86 = vector.extract_strided_slice %81 {offsets = [0, 60], sizes = [8, 15], strides = [1, 1]} : vector<8x120xf32> to vector<8x15xf32>
    %87 = vector.extract_strided_slice %81 {offsets = [0, 75], sizes = [8, 15], strides = [1, 1]} : vector<8x120xf32> to vector<8x15xf32>
    %88 = vector.extract_strided_slice %81 {offsets = [0, 90], sizes = [8, 15], strides = [1, 1]} : vector<8x120xf32> to vector<8x15xf32>
    %89 = vector.extract_strided_slice %81 {offsets = [0, 105], sizes = [8, 15], strides = [1, 1]} : vector<8x120xf32> to vector<8x15xf32>
    %90 = tpu.concatenate %82, %83, %84, %85, %86, %87, %88, %89 in 0 : vector<8x15xf32>, vector<8x15xf32>, vector<8x15xf32>, vector<8x15xf32>, vector<8x15xf32>, vector<8x15xf32>, vector<8x15xf32>, vector<8x15xf32> -> vector<64x15xf32>
    %cst_18 = arith.constant dense<0.000000e+00> : vector<8x15xf32>
    %91 = tpu.matmul %3, %90, %cst_18 {dimension_numbers = #tpu.dot_dimension_numbers<[1], [0], [0], [1], [0, 0, 1, 1], [], []>} : vector<8x64xf32>, vector<64x15xf32>, vector<8x15xf32> -> vector<8x15xf32>
    %92 = vector.broadcast %4 : vector<8x1xf32> to vector<8x15xf32>
    %93 = arith.addf %91, %92 : vector<8x15xf32>
    %cst_19 = arith.constant 0.000000e+00 : f32
    %94 = vector.broadcast %cst_19 : f32 to vector<8x15xf32>
    %95 = arith.maximumf %93, %94 : vector<8x15xf32>
    %96 = vector.extract_strided_slice %5 {offsets = [24, 0], sizes = [8, 120], strides = [1, 1]} : vector<64x120xf32> to vector<8x120xf32>
    %97 = vector.extract_strided_slice %96 {offsets = [0, 0], sizes = [8, 15], strides = [1, 1]} : vector<8x120xf32> to vector<8x15xf32>
    %98 = vector.extract_strided_slice %96 {offsets = [0, 15], sizes = [8, 15], strides = [1, 1]} : vector<8x120xf32> to vector<8x15xf32>
    %99 = vector.extract_strided_slice %96 {offsets = [0, 30], sizes = [8, 15], strides = [1, 1]} : vector<8x120xf32> to vector<8x15xf32>
    %100 = vector.extract_strided_slice %96 {offsets = [0, 45], sizes = [8, 15], strides = [1, 1]} : vector<8x120xf32> to vector<8x15xf32>
    %101 = vector.extract_strided_slice %96 {offsets = [0, 60], sizes = [8, 15], strides = [1, 1]} : vector<8x120xf32> to vector<8x15xf32>
    %102 = vector.extract_strided_slice %96 {offsets = [0, 75], sizes = [8, 15], strides = [1, 1]} : vector<8x120xf32> to vector<8x15xf32>
    %103 = vector.extract_strided_slice %96 {offsets = [0, 90], sizes = [8, 15], strides = [1, 1]} : vector<8x120xf32> to vector<8x15xf32>
    %104 = vector.extract_strided_slice %96 {offsets = [0, 105], sizes = [8, 15], strides = [1, 1]} : vector<8x120xf32> to vector<8x15xf32>
    %105 = tpu.concatenate %97, %98, %99, %100, %101, %102, %103, %104 in 0 : vector<8x15xf32>, vector<8x15xf32>, vector<8x15xf32>, vector<8x15xf32>, vector<8x15xf32>, vector<8x15xf32>, vector<8x15xf32>, vector<8x15xf32> -> vector<64x15xf32>
    %cst_20 = arith.constant dense<0.000000e+00> : vector<8x15xf32>
    %106 = tpu.matmul %3, %105, %cst_20 {dimension_numbers = #tpu.dot_dimension_numbers<[1], [0], [0], [1], [0, 0, 1, 1], [], []>} : vector<8x64xf32>, vector<64x15xf32>, vector<8x15xf32> -> vector<8x15xf32>
    %107 = vector.broadcast %4 : vector<8x1xf32> to vector<8x15xf32>
    %108 = arith.addf %106, %107 : vector<8x15xf32>
    %cst_21 = arith.constant 0.000000e+00 : f32
    %109 = vector.broadcast %cst_21 : f32 to vector<8x15xf32>
    %110 = arith.maximumf %108, %109 : vector<8x15xf32>
    %111 = vector.extract_strided_slice %5 {offsets = [28, 0], sizes = [8, 120], strides = [1, 1]} : vector<64x120xf32> to vector<8x120xf32>
    %112 = vector.extract_strided_slice %111 {offsets = [0, 0], sizes = [8, 15], strides = [1, 1]} : vector<8x120xf32> to vector<8x15xf32>
    %113 = vector.extract_strided_slice %111 {offsets = [0, 15], sizes = [8, 15], strides = [1, 1]} : vector<8x120xf32> to vector<8x15xf32>
    %114 = vector.extract_strided_slice %111 {offsets = [0, 30], sizes = [8, 15], strides = [1, 1]} : vector<8x120xf32> to vector<8x15xf32>
    %115 = vector.extract_strided_slice %111 {offsets = [0, 45], sizes = [8, 15], strides = [1, 1]} : vector<8x120xf32> to vector<8x15xf32>
    %116 = vector.extract_strided_slice %111 {offsets = [0, 60], sizes = [8, 15], strides = [1, 1]} : vector<8x120xf32> to vector<8x15xf32>
    %117 = vector.extract_strided_slice %111 {offsets = [0, 75], sizes = [8, 15], strides = [1, 1]} : vector<8x120xf32> to vector<8x15xf32>
    %118 = vector.extract_strided_slice %111 {offsets = [0, 90], sizes = [8, 15], strides = [1, 1]} : vector<8x120xf32> to vector<8x15xf32>
    %119 = vector.extract_strided_slice %111 {offsets = [0, 105], sizes = [8, 15], strides = [1, 1]} : vector<8x120xf32> to vector<8x15xf32>
    %120 = tpu.concatenate %112, %113, %114, %115, %116, %117, %118, %119 in 0 : vector<8x15xf32>, vector<8x15xf32>, vector<8x15xf32>, vector<8x15xf32>, vector<8x15xf32>, vector<8x15xf32>, vector<8x15xf32>, vector<8x15xf32> -> vector<64x15xf32>
    %cst_22 = arith.constant dense<0.000000e+00> : vector<8x15xf32>
    %121 = tpu.matmul %3, %120, %cst_22 {dimension_numbers = #tpu.dot_dimension_numbers<[1], [0], [0], [1], [0, 0, 1, 1], [], []>} : vector<8x64xf32>, vector<64x15xf32>, vector<8x15xf32> -> vector<8x15xf32>
    %122 = vector.broadcast %4 : vector<8x1xf32> to vector<8x15xf32>
    %123 = arith.addf %121, %122 : vector<8x15xf32>
    %cst_23 = arith.constant 0.000000e+00 : f32
    %124 = vector.broadcast %cst_23 : f32 to vector<8x15xf32>
    %125 = arith.maximumf %123, %124 : vector<8x15xf32>
    %126 = vector.extract_strided_slice %5 {offsets = [32, 0], sizes = [8, 120], strides = [1, 1]} : vector<64x120xf32> to vector<8x120xf32>
    %127 = vector.extract_strided_slice %126 {offsets = [0, 0], sizes = [8, 15], strides = [1, 1]} : vector<8x120xf32> to vector<8x15xf32>
    %128 = vector.extract_strided_slice %126 {offsets = [0, 15], sizes = [8, 15], strides = [1, 1]} : vector<8x120xf32> to vector<8x15xf32>
    %129 = vector.extract_strided_slice %126 {offsets = [0, 30], sizes = [8, 15], strides = [1, 1]} : vector<8x120xf32> to vector<8x15xf32>
    %130 = vector.extract_strided_slice %126 {offsets = [0, 45], sizes = [8, 15], strides = [1, 1]} : vector<8x120xf32> to vector<8x15xf32>
    %131 = vector.extract_strided_slice %126 {offsets = [0, 60], sizes = [8, 15], strides = [1, 1]} : vector<8x120xf32> to vector<8x15xf32>
    %132 = vector.extract_strided_slice %126 {offsets = [0, 75], sizes = [8, 15], strides = [1, 1]} : vector<8x120xf32> to vector<8x15xf32>
    %133 = vector.extract_strided_slice %126 {offsets = [0, 90], sizes = [8, 15], strides = [1, 1]} : vector<8x120xf32> to vector<8x15xf32>
    %134 = vector.extract_strided_slice %126 {offsets = [0, 105], sizes = [8, 15], strides = [1, 1]} : vector<8x120xf32> to vector<8x15xf32>
    %135 = tpu.concatenate %127, %128, %129, %130, %131, %132, %133, %134 in 0 : vector<8x15xf32>, vector<8x15xf32>, vector<8x15xf32>, vector<8x15xf32>, vector<8x15xf32>, vector<8x15xf32>, vector<8x15xf32>, vector<8x15xf32> -> vector<64x15xf32>
    %cst_24 = arith.constant dense<0.000000e+00> : vector<8x15xf32>
    %136 = tpu.matmul %3, %135, %cst_24 {dimension_numbers = #tpu.dot_dimension_numbers<[1], [0], [0], [1], [0, 0, 1, 1], [], []>} : vector<8x64xf32>, vector<64x15xf32>, vector<8x15xf32> -> vector<8x15xf32>
    %137 = vector.broadcast %4 : vector<8x1xf32> to vector<8x15xf32>
    %138 = arith.addf %136, %137 : vector<8x15xf32>
    %cst_25 = arith.constant 0.000000e+00 : f32
    %139 = vector.broadcast %cst_25 : f32 to vector<8x15xf32>
    %140 = arith.maximumf %138, %139 : vector<8x15xf32>
    %141 = vector.extract_strided_slice %5 {offsets = [36, 0], sizes = [8, 120], strides = [1, 1]} : vector<64x120xf32> to vector<8x120xf32>
    %142 = vector.extract_strided_slice %141 {offsets = [0, 0], sizes = [8, 15], strides = [1, 1]} : vector<8x120xf32> to vector<8x15xf32>
    %143 = vector.extract_strided_slice %141 {offsets = [0, 15], sizes = [8, 15], strides = [1, 1]} : vector<8x120xf32> to vector<8x15xf32>
    %144 = vector.extract_strided_slice %141 {offsets = [0, 30], sizes = [8, 15], strides = [1, 1]} : vector<8x120xf32> to vector<8x15xf32>
    %145 = vector.extract_strided_slice %141 {offsets = [0, 45], sizes = [8, 15], strides = [1, 1]} : vector<8x120xf32> to vector<8x15xf32>
    %146 = vector.extract_strided_slice %141 {offsets = [0, 60], sizes = [8, 15], strides = [1, 1]} : vector<8x120xf32> to vector<8x15xf32>
    %147 = vector.extract_strided_slice %141 {offsets = [0, 75], sizes = [8, 15], strides = [1, 1]} : vector<8x120xf32> to vector<8x15xf32>
    %148 = vector.extract_strided_slice %141 {offsets = [0, 90], sizes = [8, 15], strides = [1, 1]} : vector<8x120xf32> to vector<8x15xf32>
    %149 = vector.extract_strided_slice %141 {offsets = [0, 105], sizes = [8, 15], strides = [1, 1]} : vector<8x120xf32> to vector<8x15xf32>
    %150 = tpu.concatenate %142, %143, %144, %145, %146, %147, %148, %149 in 0 : vector<8x15xf32>, vector<8x15xf32>, vector<8x15xf32>, vector<8x15xf32>, vector<8x15xf32>, vector<8x15xf32>, vector<8x15xf32>, vector<8x15xf32> -> vector<64x15xf32>
    %cst_26 = arith.constant dense<0.000000e+00> : vector<8x15xf32>
    %151 = tpu.matmul %3, %150, %cst_26 {dimension_numbers = #tpu.dot_dimension_numbers<[1], [0], [0], [1], [0, 0, 1, 1], [], []>} : vector<8x64xf32>, vector<64x15xf32>, vector<8x15xf32> -> vector<8x15xf32>
    %152 = vector.broadcast %4 : vector<8x1xf32> to vector<8x15xf32>
    %153 = arith.addf %151, %152 : vector<8x15xf32>
    %cst_27 = arith.constant 0.000000e+00 : f32
    %154 = vector.broadcast %cst_27 : f32 to vector<8x15xf32>
    %155 = arith.maximumf %153, %154 : vector<8x15xf32>
    %156 = vector.extract_strided_slice %5 {offsets = [40, 0], sizes = [8, 120], strides = [1, 1]} : vector<64x120xf32> to vector<8x120xf32>
    %157 = vector.extract_strided_slice %156 {offsets = [0, 0], sizes = [8, 15], strides = [1, 1]} : vector<8x120xf32> to vector<8x15xf32>
    %158 = vector.extract_strided_slice %156 {offsets = [0, 15], sizes = [8, 15], strides = [1, 1]} : vector<8x120xf32> to vector<8x15xf32>
    %159 = vector.extract_strided_slice %156 {offsets = [0, 30], sizes = [8, 15], strides = [1, 1]} : vector<8x120xf32> to vector<8x15xf32>
    %160 = vector.extract_strided_slice %156 {offsets = [0, 45], sizes = [8, 15], strides = [1, 1]} : vector<8x120xf32> to vector<8x15xf32>
    %161 = vector.extract_strided_slice %156 {offsets = [0, 60], sizes = [8, 15], strides = [1, 1]} : vector<8x120xf32> to vector<8x15xf32>
    %162 = vector.extract_strided_slice %156 {offsets = [0, 75], sizes = [8, 15], strides = [1, 1]} : vector<8x120xf32> to vector<8x15xf32>
    %163 = vector.extract_strided_slice %156 {offsets = [0, 90], sizes = [8, 15], strides = [1, 1]} : vector<8x120xf32> to vector<8x15xf32>
    %164 = vector.extract_strided_slice %156 {offsets = [0, 105], sizes = [8, 15], strides = [1, 1]} : vector<8x120xf32> to vector<8x15xf32>
    %165 = tpu.concatenate %157, %158, %159, %160, %161, %162, %163, %164 in 0 : vector<8x15xf32>, vector<8x15xf32>, vector<8x15xf32>, vector<8x15xf32>, vector<8x15xf32>, vector<8x15xf32>, vector<8x15xf32>, vector<8x15xf32> -> vector<64x15xf32>
    %cst_28 = arith.constant dense<0.000000e+00> : vector<8x15xf32>
    %166 = tpu.matmul %3, %165, %cst_28 {dimension_numbers = #tpu.dot_dimension_numbers<[1], [0], [0], [1], [0, 0, 1, 1], [], []>} : vector<8x64xf32>, vector<64x15xf32>, vector<8x15xf32> -> vector<8x15xf32>
    %167 = vector.broadcast %4 : vector<8x1xf32> to vector<8x15xf32>
    %168 = arith.addf %166, %167 : vector<8x15xf32>
    %cst_29 = arith.constant 0.000000e+00 : f32
    %169 = vector.broadcast %cst_29 : f32 to vector<8x15xf32>
    %170 = arith.maximumf %168, %169 : vector<8x15xf32>
    %171 = vector.extract_strided_slice %5 {offsets = [44, 0], sizes = [8, 120], strides = [1, 1]} : vector<64x120xf32> to vector<8x120xf32>
    %172 = vector.extract_strided_slice %171 {offsets = [0, 0], sizes = [8, 15], strides = [1, 1]} : vector<8x120xf32> to vector<8x15xf32>
    %173 = vector.extract_strided_slice %171 {offsets = [0, 15], sizes = [8, 15], strides = [1, 1]} : vector<8x120xf32> to vector<8x15xf32>
    %174 = vector.extract_strided_slice %171 {offsets = [0, 30], sizes = [8, 15], strides = [1, 1]} : vector<8x120xf32> to vector<8x15xf32>
    %175 = vector.extract_strided_slice %171 {offsets = [0, 45], sizes = [8, 15], strides = [1, 1]} : vector<8x120xf32> to vector<8x15xf32>
    %176 = vector.extract_strided_slice %171 {offsets = [0, 60], sizes = [8, 15], strides = [1, 1]} : vector<8x120xf32> to vector<8x15xf32>
    %177 = vector.extract_strided_slice %171 {offsets = [0, 75], sizes = [8, 15], strides = [1, 1]} : vector<8x120xf32> to vector<8x15xf32>
    %178 = vector.extract_strided_slice %171 {offsets = [0, 90], sizes = [8, 15], strides = [1, 1]} : vector<8x120xf32> to vector<8x15xf32>
    %179 = vector.extract_strided_slice %171 {offsets = [0, 105], sizes = [8, 15], strides = [1, 1]} : vector<8x120xf32> to vector<8x15xf32>
    %180 = tpu.concatenate %172, %173, %174, %175, %176, %177, %178, %179 in 0 : vector<8x15xf32>, vector<8x15xf32>, vector<8x15xf32>, vector<8x15xf32>, vector<8x15xf32>, vector<8x15xf32>, vector<8x15xf32>, vector<8x15xf32> -> vector<64x15xf32>
    %cst_30 = arith.constant dense<0.000000e+00> : vector<8x15xf32>
    %181 = tpu.matmul %3, %180, %cst_30 {dimension_numbers = #tpu.dot_dimension_numbers<[1], [0], [0], [1], [0, 0, 1, 1], [], []>} : vector<8x64xf32>, vector<64x15xf32>, vector<8x15xf32> -> vector<8x15xf32>
    %182 = vector.broadcast %4 : vector<8x1xf32> to vector<8x15xf32>
    %183 = arith.addf %181, %182 : vector<8x15xf32>
    %cst_31 = arith.constant 0.000000e+00 : f32
    %184 = vector.broadcast %cst_31 : f32 to vector<8x15xf32>
    %185 = arith.maximumf %183, %184 : vector<8x15xf32>
    %186 = vector.extract_strided_slice %5 {offsets = [48, 0], sizes = [8, 120], strides = [1, 1]} : vector<64x120xf32> to vector<8x120xf32>
    %187 = vector.extract_strided_slice %186 {offsets = [0, 0], sizes = [8, 15], strides = [1, 1]} : vector<8x120xf32> to vector<8x15xf32>
    %188 = vector.extract_strided_slice %186 {offsets = [0, 15], sizes = [8, 15], strides = [1, 1]} : vector<8x120xf32> to vector<8x15xf32>
    %189 = vector.extract_strided_slice %186 {offsets = [0, 30], sizes = [8, 15], strides = [1, 1]} : vector<8x120xf32> to vector<8x15xf32>
    %190 = vector.extract_strided_slice %186 {offsets = [0, 45], sizes = [8, 15], strides = [1, 1]} : vector<8x120xf32> to vector<8x15xf32>
    %191 = vector.extract_strided_slice %186 {offsets = [0, 60], sizes = [8, 15], strides = [1, 1]} : vector<8x120xf32> to vector<8x15xf32>
    %192 = vector.extract_strided_slice %186 {offsets = [0, 75], sizes = [8, 15], strides = [1, 1]} : vector<8x120xf32> to vector<8x15xf32>
    %193 = vector.extract_strided_slice %186 {offsets = [0, 90], sizes = [8, 15], strides = [1, 1]} : vector<8x120xf32> to vector<8x15xf32>
    %194 = vector.extract_strided_slice %186 {offsets = [0, 105], sizes = [8, 15], strides = [1, 1]} : vector<8x120xf32> to vector<8x15xf32>
    %195 = tpu.concatenate %187, %188, %189, %190, %191, %192, %193, %194 in 0 : vector<8x15xf32>, vector<8x15xf32>, vector<8x15xf32>, vector<8x15xf32>, vector<8x15xf32>, vector<8x15xf32>, vector<8x15xf32>, vector<8x15xf32> -> vector<64x15xf32>
    %cst_32 = arith.constant dense<0.000000e+00> : vector<8x15xf32>
    %196 = tpu.matmul %3, %195, %cst_32 {dimension_numbers = #tpu.dot_dimension_numbers<[1], [0], [0], [1], [0, 0, 1, 1], [], []>} : vector<8x64xf32>, vector<64x15xf32>, vector<8x15xf32> -> vector<8x15xf32>
    %197 = vector.broadcast %4 : vector<8x1xf32> to vector<8x15xf32>
    %198 = arith.addf %196, %197 : vector<8x15xf32>
    %cst_33 = arith.constant 0.000000e+00 : f32
    %199 = vector.broadcast %cst_33 : f32 to vector<8x15xf32>
    %200 = arith.maximumf %198, %199 : vector<8x15xf32>
    %201 = vector.extract_strided_slice %5 {offsets = [52, 0], sizes = [8, 120], strides = [1, 1]} : vector<64x120xf32> to vector<8x120xf32>
    %202 = vector.extract_strided_slice %201 {offsets = [0, 0], sizes = [8, 15], strides = [1, 1]} : vector<8x120xf32> to vector<8x15xf32>
    %203 = vector.extract_strided_slice %201 {offsets = [0, 15], sizes = [8, 15], strides = [1, 1]} : vector<8x120xf32> to vector<8x15xf32>
    %204 = vector.extract_strided_slice %201 {offsets = [0, 30], sizes = [8, 15], strides = [1, 1]} : vector<8x120xf32> to vector<8x15xf32>
    %205 = vector.extract_strided_slice %201 {offsets = [0, 45], sizes = [8, 15], strides = [1, 1]} : vector<8x120xf32> to vector<8x15xf32>
    %206 = vector.extract_strided_slice %201 {offsets = [0, 60], sizes = [8, 15], strides = [1, 1]} : vector<8x120xf32> to vector<8x15xf32>
    %207 = vector.extract_strided_slice %201 {offsets = [0, 75], sizes = [8, 15], strides = [1, 1]} : vector<8x120xf32> to vector<8x15xf32>
    %208 = vector.extract_strided_slice %201 {offsets = [0, 90], sizes = [8, 15], strides = [1, 1]} : vector<8x120xf32> to vector<8x15xf32>
    %209 = vector.extract_strided_slice %201 {offsets = [0, 105], sizes = [8, 15], strides = [1, 1]} : vector<8x120xf32> to vector<8x15xf32>
    %210 = tpu.concatenate %202, %203, %204, %205, %206, %207, %208, %209 in 0 : vector<8x15xf32>, vector<8x15xf32>, vector<8x15xf32>, vector<8x15xf32>, vector<8x15xf32>, vector<8x15xf32>, vector<8x15xf32>, vector<8x15xf32> -> vector<64x15xf32>
    %cst_34 = arith.constant dense<0.000000e+00> : vector<8x15xf32>
    %211 = tpu.matmul %3, %210, %cst_34 {dimension_numbers = #tpu.dot_dimension_numbers<[1], [0], [0], [1], [0, 0, 1, 1], [], []>} : vector<8x64xf32>, vector<64x15xf32>, vector<8x15xf32> -> vector<8x15xf32>
    %212 = vector.broadcast %4 : vector<8x1xf32> to vector<8x15xf32>
    %213 = arith.addf %211, %212 : vector<8x15xf32>
    %cst_35 = arith.constant 0.000000e+00 : f32
    %214 = vector.broadcast %cst_35 : f32 to vector<8x15xf32>
    %215 = arith.maximumf %213, %214 : vector<8x15xf32>
    %216 = vector.extract_strided_slice %5 {offsets = [56, 0], sizes = [8, 120], strides = [1, 1]} : vector<64x120xf32> to vector<8x120xf32>
    %217 = vector.extract_strided_slice %216 {offsets = [0, 0], sizes = [8, 15], strides = [1, 1]} : vector<8x120xf32> to vector<8x15xf32>
    %218 = vector.extract_strided_slice %216 {offsets = [0, 15], sizes = [8, 15], strides = [1, 1]} : vector<8x120xf32> to vector<8x15xf32>
    %219 = vector.extract_strided_slice %216 {offsets = [0, 30], sizes = [8, 15], strides = [1, 1]} : vector<8x120xf32> to vector<8x15xf32>
    %220 = vector.extract_strided_slice %216 {offsets = [0, 45], sizes = [8, 15], strides = [1, 1]} : vector<8x120xf32> to vector<8x15xf32>
    %221 = vector.extract_strided_slice %216 {offsets = [0, 60], sizes = [8, 15], strides = [1, 1]} : vector<8x120xf32> to vector<8x15xf32>
    %222 = vector.extract_strided_slice %216 {offsets = [0, 75], sizes = [8, 15], strides = [1, 1]} : vector<8x120xf32> to vector<8x15xf32>
    %223 = vector.extract_strided_slice %216 {offsets = [0, 90], sizes = [8, 15], strides = [1, 1]} : vector<8x120xf32> to vector<8x15xf32>
    %224 = vector.extract_strided_slice %216 {offsets = [0, 105], sizes = [8, 15], strides = [1, 1]} : vector<8x120xf32> to vector<8x15xf32>
    %225 = tpu.concatenate %217, %218, %219, %220, %221, %222, %223, %224 in 0 : vector<8x15xf32>, vector<8x15xf32>, vector<8x15xf32>, vector<8x15xf32>, vector<8x15xf32>, vector<8x15xf32>, vector<8x15xf32>, vector<8x15xf32> -> vector<64x15xf32>
    %cst_36 = arith.constant dense<0.000000e+00> : vector<8x15xf32>
    %226 = tpu.matmul %3, %225, %cst_36 {dimension_numbers = #tpu.dot_dimension_numbers<[1], [0], [0], [1], [0, 0, 1, 1], [], []>} : vector<8x64xf32>, vector<64x15xf32>, vector<8x15xf32> -> vector<8x15xf32>
    %227 = vector.broadcast %4 : vector<8x1xf32> to vector<8x15xf32>
    %228 = arith.addf %226, %227 : vector<8x15xf32>
    %cst_37 = arith.constant 0.000000e+00 : f32
    %229 = vector.broadcast %cst_37 : f32 to vector<8x15xf32>
    %230 = arith.maximumf %228, %229 : vector<8x15xf32>
    %231 = tpu.concatenate %20, %35, %50, %65, %80, %95, %110, %125, %140, %155, %170, %185, %200, %215, %230 in 0 : vector<8x15xf32>, vector<8x15xf32>, vector<8x15xf32>, vector<8x15xf32>, vector<8x15xf32>, vector<8x15xf32>, vector<8x15xf32>, vector<8x15xf32>, vector<8x15xf32>, vector<8x15xf32>, vector<8x15xf32>, vector<8x15xf32>, vector<8x15xf32>, vector<8x15xf32>, vector<8x15xf32> -> vector<120x15xf32>
    %c0_38 = arith.constant 0 : index
    %c0_39 = arith.constant 0 : index
    %232 = vector.load %arg3[%c0_38, %c0_39] : memref<15x24xf32, #tpu.memory_space<vmem>>, vector<15x24xf32>
    %c0_40 = arith.constant 0 : index
    %c0_41 = arith.constant 0 : index
    %233 = vector.load %arg7[%c0_40, %c0_41] : memref<16x128xf32, #tpu.memory_space<vmem>>, vector<16x128xf32>
    %c0_42 = arith.constant 0 : index
    %c0_43 = arith.constant 0 : index
    %234 = vector.load %arg8[%c0_42, %c0_43] : memref<16x1xf32, #tpu.memory_space<vmem>>, vector<16x1xf32>
    %cst_44 = arith.constant dense<0.000000e+00> : vector<120x24xf32>
    %235 = tpu.matmul %231, %232, %cst_44 {dimension_numbers = #tpu.dot_dimension_numbers<[1], [0], [0], [1], [0, 0, 1, 1], [], []>} : vector<120x15xf32>, vector<15x24xf32>, vector<120x24xf32> -> vector<120x24xf32>
    %236 = vector.extract_strided_slice %235 {offsets = [0, 0], sizes = [32, 24], strides = [1, 1]} : vector<120x24xf32> to vector<32x24xf32>
    %237 = vector.extract_strided_slice %236 {offsets = [0, 0], sizes = [32, 6], strides = [1, 1]} : vector<32x24xf32> to vector<32x6xf32>
    %238 = vector.extract_strided_slice %236 {offsets = [0, 6], sizes = [32, 6], strides = [1, 1]} : vector<32x24xf32> to vector<32x6xf32>
    %239 = vector.extract_strided_slice %236 {offsets = [0, 12], sizes = [32, 6], strides = [1, 1]} : vector<32x24xf32> to vector<32x6xf32>
    %240 = vector.extract_strided_slice %236 {offsets = [0, 18], sizes = [32, 6], strides = [1, 1]} : vector<32x24xf32> to vector<32x6xf32>
    %241 = tpu.concatenate %237, %238, %239, %240 in 0 : vector<32x6xf32>, vector<32x6xf32>, vector<32x6xf32>, vector<32x6xf32> -> vector<128x6xf32>
    %cst_45 = arith.constant dense<0.000000e+00> : vector<16x6xf32>
    %242 = tpu.matmul %233, %241, %cst_45 {dimension_numbers = #tpu.dot_dimension_numbers<[1], [0], [0], [1], [0, 0, 1, 1], [], []>} : vector<16x128xf32>, vector<128x6xf32>, vector<16x6xf32> -> vector<16x6xf32>
    %243 = vector.broadcast %234 : vector<16x1xf32> to vector<16x6xf32>
    %244 = arith.addf %242, %243 : vector<16x6xf32>
    %cst_46 = arith.constant 0.000000e+00 : f32
    %245 = vector.broadcast %cst_46 : f32 to vector<16x6xf32>
    %246 = arith.maximumf %244, %245 : vector<16x6xf32>
    %247 = vector.extract_strided_slice %235 {offsets = [16, 0], sizes = [32, 24], strides = [1, 1]} : vector<120x24xf32> to vector<32x24xf32>
    %248 = vector.extract_strided_slice %247 {offsets = [0, 0], sizes = [32, 6], strides = [1, 1]} : vector<32x24xf32> to vector<32x6xf32>
    %249 = vector.extract_strided_slice %247 {offsets = [0, 6], sizes = [32, 6], strides = [1, 1]} : vector<32x24xf32> to vector<32x6xf32>
    %250 = vector.extract_strided_slice %247 {offsets = [0, 12], sizes = [32, 6], strides = [1, 1]} : vector<32x24xf32> to vector<32x6xf32>
    %251 = vector.extract_strided_slice %247 {offsets = [0, 18], sizes = [32, 6], strides = [1, 1]} : vector<32x24xf32> to vector<32x6xf32>
    %252 = tpu.concatenate %248, %249, %250, %251 in 0 : vector<32x6xf32>, vector<32x6xf32>, vector<32x6xf32>, vector<32x6xf32> -> vector<128x6xf32>
    %cst_47 = arith.constant dense<0.000000e+00> : vector<16x6xf32>
    %253 = tpu.matmul %233, %252, %cst_47 {dimension_numbers = #tpu.dot_dimension_numbers<[1], [0], [0], [1], [0, 0, 1, 1], [], []>} : vector<16x128xf32>, vector<128x6xf32>, vector<16x6xf32> -> vector<16x6xf32>
    %254 = vector.broadcast %234 : vector<16x1xf32> to vector<16x6xf32>
    %255 = arith.addf %253, %254 : vector<16x6xf32>
    %cst_48 = arith.constant 0.000000e+00 : f32
    %256 = vector.broadcast %cst_48 : f32 to vector<16x6xf32>
    %257 = arith.maximumf %255, %256 : vector<16x6xf32>
    %258 = vector.extract_strided_slice %235 {offsets = [32, 0], sizes = [32, 24], strides = [1, 1]} : vector<120x24xf32> to vector<32x24xf32>
    %259 = vector.extract_strided_slice %258 {offsets = [0, 0], sizes = [32, 6], strides = [1, 1]} : vector<32x24xf32> to vector<32x6xf32>
    %260 = vector.extract_strided_slice %258 {offsets = [0, 6], sizes = [32, 6], strides = [1, 1]} : vector<32x24xf32> to vector<32x6xf32>
    %261 = vector.extract_strided_slice %258 {offsets = [0, 12], sizes = [32, 6], strides = [1, 1]} : vector<32x24xf32> to vector<32x6xf32>
    %262 = vector.extract_strided_slice %258 {offsets = [0, 18], sizes = [32, 6], strides = [1, 1]} : vector<32x24xf32> to vector<32x6xf32>
    %263 = tpu.concatenate %259, %260, %261, %262 in 0 : vector<32x6xf32>, vector<32x6xf32>, vector<32x6xf32>, vector<32x6xf32> -> vector<128x6xf32>
    %cst_49 = arith.constant dense<0.000000e+00> : vector<16x6xf32>
    %264 = tpu.matmul %233, %263, %cst_49 {dimension_numbers = #tpu.dot_dimension_numbers<[1], [0], [0], [1], [0, 0, 1, 1], [], []>} : vector<16x128xf32>, vector<128x6xf32>, vector<16x6xf32> -> vector<16x6xf32>
    %265 = vector.broadcast %234 : vector<16x1xf32> to vector<16x6xf32>
    %266 = arith.addf %264, %265 : vector<16x6xf32>
    %cst_50 = arith.constant 0.000000e+00 : f32
    %267 = vector.broadcast %cst_50 : f32 to vector<16x6xf32>
    %268 = arith.maximumf %266, %267 : vector<16x6xf32>
    %269 = vector.extract_strided_slice %235 {offsets = [48, 0], sizes = [32, 24], strides = [1, 1]} : vector<120x24xf32> to vector<32x24xf32>
    %270 = vector.extract_strided_slice %269 {offsets = [0, 0], sizes = [32, 6], strides = [1, 1]} : vector<32x24xf32> to vector<32x6xf32>
    %271 = vector.extract_strided_slice %269 {offsets = [0, 6], sizes = [32, 6], strides = [1, 1]} : vector<32x24xf32> to vector<32x6xf32>
    %272 = vector.extract_strided_slice %269 {offsets = [0, 12], sizes = [32, 6], strides = [1, 1]} : vector<32x24xf32> to vector<32x6xf32>
    %273 = vector.extract_strided_slice %269 {offsets = [0, 18], sizes = [32, 6], strides = [1, 1]} : vector<32x24xf32> to vector<32x6xf32>
    %274 = tpu.concatenate %270, %271, %272, %273 in 0 : vector<32x6xf32>, vector<32x6xf32>, vector<32x6xf32>, vector<32x6xf32> -> vector<128x6xf32>
    %cst_51 = arith.constant dense<0.000000e+00> : vector<16x6xf32>
    %275 = tpu.matmul %233, %274, %cst_51 {dimension_numbers = #tpu.dot_dimension_numbers<[1], [0], [0], [1], [0, 0, 1, 1], [], []>} : vector<16x128xf32>, vector<128x6xf32>, vector<16x6xf32> -> vector<16x6xf32>
    %276 = vector.broadcast %234 : vector<16x1xf32> to vector<16x6xf32>
    %277 = arith.addf %275, %276 : vector<16x6xf32>
    %cst_52 = arith.constant 0.000000e+00 : f32
    %278 = vector.broadcast %cst_52 : f32 to vector<16x6xf32>
    %279 = arith.maximumf %277, %278 : vector<16x6xf32>
    %280 = vector.extract_strided_slice %235 {offsets = [64, 0], sizes = [32, 24], strides = [1, 1]} : vector<120x24xf32> to vector<32x24xf32>
    %281 = vector.extract_strided_slice %280 {offsets = [0, 0], sizes = [32, 6], strides = [1, 1]} : vector<32x24xf32> to vector<32x6xf32>
    %282 = vector.extract_strided_slice %280 {offsets = [0, 6], sizes = [32, 6], strides = [1, 1]} : vector<32x24xf32> to vector<32x6xf32>
    %283 = vector.extract_strided_slice %280 {offsets = [0, 12], sizes = [32, 6], strides = [1, 1]} : vector<32x24xf32> to vector<32x6xf32>
    %284 = vector.extract_strided_slice %280 {offsets = [0, 18], sizes = [32, 6], strides = [1, 1]} : vector<32x24xf32> to vector<32x6xf32>
    %285 = tpu.concatenate %281, %282, %283, %284 in 0 : vector<32x6xf32>, vector<32x6xf32>, vector<32x6xf32>, vector<32x6xf32> -> vector<128x6xf32>
    %cst_53 = arith.constant dense<0.000000e+00> : vector<16x6xf32>
    %286 = tpu.matmul %233, %285, %cst_53 {dimension_numbers = #tpu.dot_dimension_numbers<[1], [0], [0], [1], [0, 0, 1, 1], [], []>} : vector<16x128xf32>, vector<128x6xf32>, vector<16x6xf32> -> vector<16x6xf32>
    %287 = vector.broadcast %234 : vector<16x1xf32> to vector<16x6xf32>
    %288 = arith.addf %286, %287 : vector<16x6xf32>
    %cst_54 = arith.constant 0.000000e+00 : f32
    %289 = vector.broadcast %cst_54 : f32 to vector<16x6xf32>
    %290 = arith.maximumf %288, %289 : vector<16x6xf32>
    %291 = vector.extract_strided_slice %235 {offsets = [80, 0], sizes = [32, 24], strides = [1, 1]} : vector<120x24xf32> to vector<32x24xf32>
    %292 = vector.extract_strided_slice %291 {offsets = [0, 0], sizes = [32, 6], strides = [1, 1]} : vector<32x24xf32> to vector<32x6xf32>
    %293 = vector.extract_strided_slice %291 {offsets = [0, 6], sizes = [32, 6], strides = [1, 1]} : vector<32x24xf32> to vector<32x6xf32>
    %294 = vector.extract_strided_slice %291 {offsets = [0, 12], sizes = [32, 6], strides = [1, 1]} : vector<32x24xf32> to vector<32x6xf32>
    %295 = vector.extract_strided_slice %291 {offsets = [0, 18], sizes = [32, 6], strides = [1, 1]} : vector<32x24xf32> to vector<32x6xf32>
    %296 = tpu.concatenate %292, %293, %294, %295 in 0 : vector<32x6xf32>, vector<32x6xf32>, vector<32x6xf32>, vector<32x6xf32> -> vector<128x6xf32>
    %cst_55 = arith.constant dense<0.000000e+00> : vector<16x6xf32>
    %297 = tpu.matmul %233, %296, %cst_55 {dimension_numbers = #tpu.dot_dimension_numbers<[1], [0], [0], [1], [0, 0, 1, 1], [], []>} : vector<16x128xf32>, vector<128x6xf32>, vector<16x6xf32> -> vector<16x6xf32>
    %298 = vector.broadcast %234 : vector<16x1xf32> to vector<16x6xf32>
    %299 = arith.addf %297, %298 : vector<16x6xf32>
    %cst_56 = arith.constant 0.000000e+00 : f32
    %300 = vector.broadcast %cst_56 : f32 to vector<16x6xf32>
    %301 = arith.maximumf %299, %300 : vector<16x6xf32>
    %302 = tpu.concatenate %246, %257, %268, %279, %290, %301 in 0 : vector<16x6xf32>, vector<16x6xf32>, vector<16x6xf32>, vector<16x6xf32>, vector<16x6xf32>, vector<16x6xf32> -> vector<96x6xf32>
    %c0_57 = arith.constant 0 : index
    %c0_58 = arith.constant 0 : index
    %303 = vector.load %arg4[%c0_57, %c0_58] : memref<6x12xf32, #tpu.memory_space<vmem>>, vector<6x12xf32>
    %c0_59 = arith.constant 0 : index
    %c0_60 = arith.constant 0 : index
    %304 = vector.load %arg9[%c0_59, %c0_60] : memref<16x144xf32, #tpu.memory_space<vmem>>, vector<16x144xf32>
    %c0_61 = arith.constant 0 : index
    %c0_62 = arith.constant 0 : index
    %305 = vector.load %arg10[%c0_61, %c0_62] : memref<16x1xf32, #tpu.memory_space<vmem>>, vector<16x1xf32>
    %cst_63 = arith.constant dense<0.000000e+00> : vector<96x12xf32>
    %306 = tpu.matmul %302, %303, %cst_63 {dimension_numbers = #tpu.dot_dimension_numbers<[1], [0], [0], [1], [0, 0, 1, 1], [], []>} : vector<96x6xf32>, vector<6x12xf32>, vector<96x12xf32> -> vector<96x12xf32>
    %307 = vector.extract_strided_slice %306 {offsets = [0, 0], sizes = [48, 12], strides = [1, 1]} : vector<96x12xf32> to vector<48x12xf32>
    %308 = vector.extract_strided_slice %307 {offsets = [0, 0], sizes = [48, 4], strides = [1, 1]} : vector<48x12xf32> to vector<48x4xf32>
    %309 = vector.extract_strided_slice %307 {offsets = [0, 4], sizes = [48, 4], strides = [1, 1]} : vector<48x12xf32> to vector<48x4xf32>
    %310 = vector.extract_strided_slice %307 {offsets = [0, 8], sizes = [48, 4], strides = [1, 1]} : vector<48x12xf32> to vector<48x4xf32>
    %311 = tpu.concatenate %308, %309, %310 in 0 : vector<48x4xf32>, vector<48x4xf32>, vector<48x4xf32> -> vector<144x4xf32>
    %cst_64 = arith.constant dense<0.000000e+00> : vector<16x4xf32>
    %312 = tpu.matmul %304, %311, %cst_64 {dimension_numbers = #tpu.dot_dimension_numbers<[1], [0], [0], [1], [0, 0, 1, 1], [], []>} : vector<16x144xf32>, vector<144x4xf32>, vector<16x4xf32> -> vector<16x4xf32>
    %313 = vector.broadcast %305 : vector<16x1xf32> to vector<16x4xf32>
    %314 = arith.addf %312, %313 : vector<16x4xf32>
    %cst_65 = arith.constant 0.000000e+00 : f32
    %315 = vector.broadcast %cst_65 : f32 to vector<16x4xf32>
    %316 = arith.maximumf %314, %315 : vector<16x4xf32>
    %317 = vector.extract_strided_slice %306 {offsets = [16, 0], sizes = [48, 12], strides = [1, 1]} : vector<96x12xf32> to vector<48x12xf32>
    %318 = vector.extract_strided_slice %317 {offsets = [0, 0], sizes = [48, 4], strides = [1, 1]} : vector<48x12xf32> to vector<48x4xf32>
    %319 = vector.extract_strided_slice %317 {offsets = [0, 4], sizes = [48, 4], strides = [1, 1]} : vector<48x12xf32> to vector<48x4xf32>
    %320 = vector.extract_strided_slice %317 {offsets = [0, 8], sizes = [48, 4], strides = [1, 1]} : vector<48x12xf32> to vector<48x4xf32>
    %321 = tpu.concatenate %318, %319, %320 in 0 : vector<48x4xf32>, vector<48x4xf32>, vector<48x4xf32> -> vector<144x4xf32>
    %cst_66 = arith.constant dense<0.000000e+00> : vector<16x4xf32>
    %322 = tpu.matmul %304, %321, %cst_66 {dimension_numbers = #tpu.dot_dimension_numbers<[1], [0], [0], [1], [0, 0, 1, 1], [], []>} : vector<16x144xf32>, vector<144x4xf32>, vector<16x4xf32> -> vector<16x4xf32>
    %323 = vector.broadcast %305 : vector<16x1xf32> to vector<16x4xf32>
    %324 = arith.addf %322, %323 : vector<16x4xf32>
    %cst_67 = arith.constant 0.000000e+00 : f32
    %325 = vector.broadcast %cst_67 : f32 to vector<16x4xf32>
    %326 = arith.maximumf %324, %325 : vector<16x4xf32>
    %327 = vector.extract_strided_slice %306 {offsets = [32, 0], sizes = [48, 12], strides = [1, 1]} : vector<96x12xf32> to vector<48x12xf32>
    %328 = vector.extract_strided_slice %327 {offsets = [0, 0], sizes = [48, 4], strides = [1, 1]} : vector<48x12xf32> to vector<48x4xf32>
    %329 = vector.extract_strided_slice %327 {offsets = [0, 4], sizes = [48, 4], strides = [1, 1]} : vector<48x12xf32> to vector<48x4xf32>
    %330 = vector.extract_strided_slice %327 {offsets = [0, 8], sizes = [48, 4], strides = [1, 1]} : vector<48x12xf32> to vector<48x4xf32>
    %331 = tpu.concatenate %328, %329, %330 in 0 : vector<48x4xf32>, vector<48x4xf32>, vector<48x4xf32> -> vector<144x4xf32>
    %cst_68 = arith.constant dense<0.000000e+00> : vector<16x4xf32>
    %332 = tpu.matmul %304, %331, %cst_68 {dimension_numbers = #tpu.dot_dimension_numbers<[1], [0], [0], [1], [0, 0, 1, 1], [], []>} : vector<16x144xf32>, vector<144x4xf32>, vector<16x4xf32> -> vector<16x4xf32>
    %333 = vector.broadcast %305 : vector<16x1xf32> to vector<16x4xf32>
    %334 = arith.addf %332, %333 : vector<16x4xf32>
    %cst_69 = arith.constant 0.000000e+00 : f32
    %335 = vector.broadcast %cst_69 : f32 to vector<16x4xf32>
    %336 = arith.maximumf %334, %335 : vector<16x4xf32>
    %337 = vector.extract_strided_slice %306 {offsets = [48, 0], sizes = [48, 12], strides = [1, 1]} : vector<96x12xf32> to vector<48x12xf32>
    %338 = vector.extract_strided_slice %337 {offsets = [0, 0], sizes = [48, 4], strides = [1, 1]} : vector<48x12xf32> to vector<48x4xf32>
    %339 = vector.extract_strided_slice %337 {offsets = [0, 4], sizes = [48, 4], strides = [1, 1]} : vector<48x12xf32> to vector<48x4xf32>
    %340 = vector.extract_strided_slice %337 {offsets = [0, 8], sizes = [48, 4], strides = [1, 1]} : vector<48x12xf32> to vector<48x4xf32>
    %341 = tpu.concatenate %338, %339, %340 in 0 : vector<48x4xf32>, vector<48x4xf32>, vector<48x4xf32> -> vector<144x4xf32>
    %cst_70 = arith.constant dense<0.000000e+00> : vector<16x4xf32>
    %342 = tpu.matmul %304, %341, %cst_70 {dimension_numbers = #tpu.dot_dimension_numbers<[1], [0], [0], [1], [0, 0, 1, 1], [], []>} : vector<16x144xf32>, vector<144x4xf32>, vector<16x4xf32> -> vector<16x4xf32>
    %343 = vector.broadcast %305 : vector<16x1xf32> to vector<16x4xf32>
    %344 = arith.addf %342, %343 : vector<16x4xf32>
    %cst_71 = arith.constant 0.000000e+00 : f32
    %345 = vector.broadcast %cst_71 : f32 to vector<16x4xf32>
    %346 = arith.maximumf %344, %345 : vector<16x4xf32>
    %347 = tpu.concatenate %316, %326, %336, %346 in 0 : vector<16x4xf32>, vector<16x4xf32>, vector<16x4xf32>, vector<16x4xf32> -> vector<64x4xf32>
    %c0_72 = arith.constant 0 : index
    %c0_73 = arith.constant 0 : index
    %348 = vector.load %arg12[%c0_72, %c0_73] : memref<64x1xf32, #tpu.memory_space<vmem>>, vector<64x1xf32>
    %c0_74 = arith.constant 0 : index
    %c0_75 = arith.constant 0 : index
    %349 = vector.load %arg11[%c0_74, %c0_75] : memref<256x64xf32, #tpu.memory_space<vmem>>, vector<64x64xf32>
    %350 = vector.extract_strided_slice %347 {offsets = [0, 0], sizes = [64, 1], strides = [1, 1]} : vector<64x4xf32> to vector<64x1xf32>
    %cst_76 = arith.constant dense<0.000000e+00> : vector<64x1xf32>
    %351 = tpu.matmul %349, %350, %cst_76 {dimension_numbers = #tpu.dot_dimension_numbers<[1], [0], [0], [1], [0, 0, 1, 1], [], []>} : vector<64x64xf32>, vector<64x1xf32>, vector<64x1xf32> -> vector<64x1xf32>
    %352 = arith.addf %348, %351 : vector<64x1xf32>
    %c64 = arith.constant 64 : index
    %c0_77 = arith.constant 0 : index
    %353 = vector.load %arg11[%c64, %c0_77] : memref<256x64xf32, #tpu.memory_space<vmem>>, vector<64x64xf32>
    %354 = vector.extract_strided_slice %347 {offsets = [0, 1], sizes = [64, 1], strides = [1, 1]} : vector<64x4xf32> to vector<64x1xf32>
    %cst_78 = arith.constant dense<0.000000e+00> : vector<64x1xf32>
    %355 = tpu.matmul %353, %354, %cst_78 {dimension_numbers = #tpu.dot_dimension_numbers<[1], [0], [0], [1], [0, 0, 1, 1], [], []>} : vector<64x64xf32>, vector<64x1xf32>, vector<64x1xf32> -> vector<64x1xf32>
    %356 = arith.addf %352, %355 : vector<64x1xf32>
    %c128 = arith.constant 128 : index
    %c0_79 = arith.constant 0 : index
    %357 = vector.load %arg11[%c128, %c0_79] : memref<256x64xf32, #tpu.memory_space<vmem>>, vector<64x64xf32>
    %358 = vector.extract_strided_slice %347 {offsets = [0, 2], sizes = [64, 1], strides = [1, 1]} : vector<64x4xf32> to vector<64x1xf32>
    %cst_80 = arith.constant dense<0.000000e+00> : vector<64x1xf32>
    %359 = tpu.matmul %357, %358, %cst_80 {dimension_numbers = #tpu.dot_dimension_numbers<[1], [0], [0], [1], [0, 0, 1, 1], [], []>} : vector<64x64xf32>, vector<64x1xf32>, vector<64x1xf32> -> vector<64x1xf32>
    %360 = arith.addf %356, %359 : vector<64x1xf32>
    %c192 = arith.constant 192 : index
    %c0_81 = arith.constant 0 : index
    %361 = vector.load %arg11[%c192, %c0_81] : memref<256x64xf32, #tpu.memory_space<vmem>>, vector<64x64xf32>
    %362 = vector.extract_strided_slice %347 {offsets = [0, 3], sizes = [64, 1], strides = [1, 1]} : vector<64x4xf32> to vector<64x1xf32>
    %cst_82 = arith.constant dense<0.000000e+00> : vector<64x1xf32>
    %363 = tpu.matmul %361, %362, %cst_82 {dimension_numbers = #tpu.dot_dimension_numbers<[1], [0], [0], [1], [0, 0, 1, 1], [], []>} : vector<64x64xf32>, vector<64x1xf32>, vector<64x1xf32> -> vector<64x1xf32>
    %364 = arith.addf %360, %363 : vector<64x1xf32>
    %cst_83 = arith.constant 0.000000e+00 : f32
    %365 = vector.broadcast %cst_83 : f32 to vector<64x1xf32>
    %366 = arith.maximumf %364, %365 : vector<64x1xf32>
    %c0_84 = arith.constant 0 : index
    %c0_85 = arith.constant 0 : index
    %c0_86 = arith.constant 0 : index
    %367 = vector.load %arg13[%c0_84, %c0_85, %c0_86] : memref<1x64x1xf32, #tpu.memory_space<vmem>>, vector<1x64x1xf32>
    %368 = vector.shape_cast %367 : vector<1x64x1xf32> to vector<64x1xf32>
    %369 = vector.shape_cast %366 : vector<64x1xf32> to vector<1x64x1xf32>
    tpu.vector_store %arg13[%c0_84, %c0_85, %c0_86], %369 {strides = array<i32>} : memref<1x64x1xf32, #tpu.memory_space<vmem>>, vector<1x64x1xf32>,
    return
  }
  func.func @transform_0(%arg0: i32) -> (i32, i32, i32) {
    %c0_i32 = arith.constant 0 : i32
    %c0_i32_0 = arith.constant 0 : i32
    %c0_i32_1 = arith.constant 0 : i32
    return %arg0, %c0_i32, %c0_i32_0 : i32, i32, i32
  }
  func.func @transform_1(%arg0: i32) -> (i32, i32) {
    %c0_i32 = arith.constant 0 : i32
    %c0_i32_0 = arith.constant 0 : i32
    %c0_i32_1 = arith.constant 0 : i32
    return %c0_i32, %c0_i32_0 : i32, i32
  }
  func.func @transform_2(%arg0: i32) -> (i32, i32) {
    %c0_i32 = arith.constant 0 : i32
    %c0_i32_0 = arith.constant 0 : i32
    %c0_i32_1 = arith.constant 0 : i32
    return %c0_i32, %c0_i32_0 : i32, i32
  }
  func.func @transform_3(%arg0: i32) -> (i32, i32) {
    %c0_i32 = arith.constant 0 : i32
    %c0_i32_0 = arith.constant 0 : i32
    %c0_i32_1 = arith.constant 0 : i32
    return %c0_i32, %c0_i32_0 : i32, i32
  }
  func.func @transform_4(%arg0: i32) -> (i32, i32) {
    %c0_i32 = arith.constant 0 : i32
    %c0_i32_0 = arith.constant 0 : i32
    %c0_i32_1 = arith.constant 0 : i32
    return %c0_i32, %c0_i32_0 : i32, i32
  }
  func.func @transform_5(%arg0: i32) -> (i32, i32) {
    %c0_i32 = arith.constant 0 : i32
    %c0_i32_0 = arith.constant 0 : i32
    %c0_i32_1 = arith.constant 0 : i32
    return %c0_i32, %c0_i32_0 : i32, i32
  }
  func.func @transform_6(%arg0: i32) -> (i32, i32) {
    %c0_i32 = arith.constant 0 : i32
    %c0_i32_0 = arith.constant 0 : i32
    %c0_i32_1 = arith.constant 0 : i32
    return %c0_i32, %c0_i32_0 : i32, i32
  }
  func.func @transform_7(%arg0: i32) -> (i32, i32) {
    %c0_i32 = arith.constant 0 : i32
    %c0_i32_0 = arith.constant 0 : i32
    %c0_i32_1 = arith.constant 0 : i32
    return %c0_i32, %c0_i32_0 : i32, i32
  }
  func.func @transform_8(%arg0: i32) -> (i32, i32) {
    %c0_i32 = arith.constant 0 : i32
    %c0_i32_0 = arith.constant 0 : i32
    %c0_i32_1 = arith.constant 0 : i32
    return %c0_i32, %c0_i32_0 : i32, i32
  }
  func.func @transform_9(%arg0: i32) -> (i32, i32) {
    %c0_i32 = arith.constant 0 : i32
    %c0_i32_0 = arith.constant 0 : i32
    %c0_i32_1 = arith.constant 0 : i32
    return %c0_i32, %c0_i32_0 : i32, i32
  }
  func.func @transform_10(%arg0: i32) -> (i32, i32) {
    %c0_i32 = arith.constant 0 : i32
    %c0_i32_0 = arith.constant 0 : i32
    %c0_i32_1 = arith.constant 0 : i32
    return %c0_i32, %c0_i32_0 : i32, i32
  }
  func.func @transform_11(%arg0: i32) -> (i32, i32) {
    %c0_i32 = arith.constant 0 : i32
    %c0_i32_0 = arith.constant 0 : i32
    %c0_i32_1 = arith.constant 0 : i32
    return %c0_i32, %c0_i32_0 : i32, i32
  }
  func.func @transform_12(%arg0: i32) -> (i32, i32, i32) {
    %c0_i32 = arith.constant 0 : i32
    %c0_i32_0 = arith.constant 0 : i32
    %c0_i32_1 = arith.constant 0 : i32
    return %arg0, %c0_i32, %c0_i32_0 : i32, i32, i32
  }
}

</mosaic_0001>

<bundles_post_ra>
// kernel: extractor_forward.1
= control target key start
LH: loop header
LB: loop body
LE: loop exit
PB: predicated region body
PF: predicated region fallthrough
CT: control target
= control target key end

     0   :  { %s6441_s21 = smov 0   ;;  %s7388_s0 = inlined_call_operand.vmem [shape: f32[2,64,64], index: 0, kind: input, shape index: {}]   ;;  %s7389_s1 = inlined_call_operand.vmem [shape: f32[64,120], index: 1, kind: input, shape index: {}]   ;;  %s7390_s2 = inlined_call_operand.vmem [shape: f32[15,24], index: 2, kind: input, shape index: {}]   ;;  %s7391_s3 = inlined_call_operand.vmem [shape: f32[6,12], index: 3, kind: input, shape index: {}]   ;;  %s7392_s4 = inlined_call_operand.vmem [shape: f32[8,64], index: 4, kind: input, shape index: {}]   ;;  %s7393_s5 = inlined_call_operand.vmem [shape: f32[8,1], index: 5, kind: input, shape index: {}]   ;;  %s7394_s6 = inlined_call_operand.vmem [shape: f32[16,128], index: 6, kind: input, shape index: {}]   ;;  %s7395_s7 = inlined_call_operand.vmem [shape: f32[16,1], index: 7, kind: input, shape index: {}]   ;;  %s7396_s8 = inlined_call_operand.vmem [shape: f32[16,144], index: 8, kind: input, shape index: {}]   ;;  %s7397_s9 = inlined_call_operand.vmem [shape: f32[16,1], index: 9, kind: input, shape index: {}]   ;;  %s7398_s10 = inlined_call_operand.vmem [shape: f32[256,64], index: 10, kind: input, shape index: {}]   ;;  %s7399_s11 = inlined_call_operand.vmem [shape: f32[64,1], index: 11, kind: input, shape index: {}]   ;;  %s7400_s12 = inlined_call_operand.vmem [shape: f32[2,64,1], index: 12, kind: output, shape index: {}]  }
   0x1 LB: > { %s4110_s22 = sadd.s32 4294967295, %s6354_s21   ;;  %p4114_p0 = scmp.ge.s32.totalorder %s6354_s21, 1  ;;  %s6354_s21 = sphi %s6441_s21, %s22_s21  }
   0x2   : > { %p362_p1 = scmp.lt.s32.totalorder %s6354_s21, 3 }
   0x4   : > { %p363_p2 = pnand %p4114_p0, %p362_p1 }
   0x5   : > { %v422_v0 = vld [vmem:[%s7389_s1] sm:$0xff] (!%p363_p2)  ;;  %v423_v1 = vld [vmem:[%s7389_s1 + $0x8] sm:$0xff] (!%p363_p2)  ;;  %v424_v2 = vld [vmem:[%s7389_s1 + $0x10] sm:$0xff] (!%p363_p2)  ;;  %p404_p3 = scmp.lt.s32.totalorder (!%p363_p2), %s4110_s22, 1  ;;  %vm432_vm0 = vcmask (!%p363_p2), 523264   ;;  %v6356_v20 = vmov (!%p363_p2), 0  }
   0x6   : > { %366 = sbr.rel (%p363_p2) target bundleno = 2235 (0x8bb), region = 68  ;;  %v5272_v3 = vpack.c.bf16 (!%p363_p2), %v423_v1, %v422_v0  ;;  %v425_v4 = vld [vmem:[%s7389_s1 + $0x18] sm:$0xff] (!%p363_p2)  ;;  %v426_v6 = vld [vmem:[%s7389_s1 + $0x20] sm:$0xff] (!%p363_p2)  ;;  %v427_v7 = vld [vmem:[%s7389_s1 + $0x28] sm:$0xff] (!%p363_p2)  ;;  %6121 = vset.pattern.permute.xlu1 (!%p363_p2), %v6356_v20  ;;  %6227 = vset.pattern.permute.xlu0 (!%p363_p2), %v6356_v20  ;;  %v6357_v21 = vmov (!%p363_p2), 0.0|0.0   ;;  %vm664_vm1 = vcmask (!%p363_p2), 1043456  }
   0x7   : > { %v5276_v5 = vpack.c.bf16 (!%p363_p2), %v425_v4, %v424_v2  ;;  %v5280_v8 = vpack.c.bf16 (!%p363_p2), %v427_v7, %v426_v6  ;;  %v428_v9 = vld [vmem:[%s7389_s1 + $0x30] sm:$0xff] (!%p363_p2)  ;;  %v429_v10 = vld [vmem:[%s7389_s1 + $0x38] sm:$0xff] (!%p363_p2)  ;;  %5312 = vmatprep.subr.bf16.mxu1 (!%p363_p2), %v6357_v21  ;;  %s6358_s27 = smov (!%p363_p2), 83   ;;  %s6359_s28 = smov (!%p363_p2), 113   ;;  %vm6364_vm2 = vmmov (!%p363_p2), 0   ;;  %v6365_v45 = vmov (!%p363_p2), 0.0  }
   0x8   : > { %5273 = vmatprep.subr.bf16.mxu0 (!%p363_p2), %v5272_v3  ;;  %v5284_v12 = vpack.c.bf16 (!%p363_p2), %v429_v10, %v428_v9  ;;  %s6360_s29 = smov (!%p363_p2), 68   ;;  %s6361_s30 = smov (!%p363_p2), 98   ;;  %4650 = vmatprep.mubr.msk.f32.mxu1 (!%p363_p2), %vm6364_vm2, %v6365_v45  ;;  %v431_v53 = vld [vmem:[%s7393_s5] sm:$0xff] (!%p363_p2)  ;;  %vm2033_vm3 = vcmask (!%p363_p2), 1046528   ;;  %vm6367_vm4 = vmmov (!%p363_p2), 1   ;;  %vm1987_vm6 = vcmask (!%p363_p2), 121856  }
   0x9   : > { %5275 = vmatpush3.bf16.msra.mxu0 (!%p363_p2), %v5272_v3  ;;  %s6362_s13 = smov (!%p363_p2), 38   ;;  %s6363_s14 = smov (!%p363_p2), 53   ;;  %vm5470_vm5 = vmpackc.low (!%p363_p2), %vm2033_vm3, %vm6367_vm4  ;;  %vm2832_vm7 = vcmask (!%p363_p2), 1045504   ;;  %vm2795_vm8 = vcmask (!%p363_p2), 48128   ;;  %vm3013_vm9 = vcmask (!%p363_p2), 130048   ;;  %vm4046_vm10 = vcmask (!%p363_p2), 7168  }
   0xa   : > { %5277 = vmatprep.subr.bf16.mxu0 (!%p363_p2), %v5276_v5  ;;  %s6366_s15 = smov (!%p363_p2), 23   ;;  %s6371_s25 = smov (!%p363_p2), 124  }
   0xb   : > { %s6372_s26 = smov (!%p363_p2), 120  }
   0xd   : > { %s7402_s22 = smov (!%p404_p3, %s4110_s22), 1  ;;  %5279 = vmatpush3.bf16.msra.mxu0 %v5276_v5 }
   0xe   : > { %s4213_s17 = sshll.u32 %s7402_s22, 6  ;;  %5281 = vmatprep.subr.bf16.mxu0 %v5280_v8 }
   0xf   : > { %s408_s20 = scalar_lea.vmem %s7388_s0, %s4213_s17 }
  0x10   : > { %v414_v11 = vld [vmem:[%s408_s20] sm:$0xff]  ;;  %v415_v13 = vld [vmem:[%s408_s20 + $0x8] sm:$0xff]  ;;  %v416_v14 = vld [vmem:[%s408_s20 + $0x10] sm:$0xff] }
  0x11   : > { %4584 = vmatprep.mubr.msk.f32.mxu0 %vm432_vm0, %v414_v11  ;;  %5283 = vmatpush3.bf16.msra.mxu0 %v5280_v8  ;;  %v417_v15 = vld [vmem:[%s408_s20 + $0x18] sm:$0xff]  ;;  %v418_v16 = vld [vmem:[%s408_s20 + $0x20] sm:$0xff]  ;;  %v419_v17 = vld [vmem:[%s408_s20 + $0x28] sm:$0xff] }
  0x12   : > { %5285 = vmatprep.subr.bf16.mxu0 %v5284_v12  ;;  %v420_v18 = vld [vmem:[%s408_s20 + $0x30] sm:$0xff]  ;;  %v421_v19 = vld [vmem:[%s408_s20 + $0x38] sm:$0xff]  ;;  %s7349_s20 = scalar_lea.vmem %s7400_s12, %s4213_s17 }
  0x15   : > { %5287 = vmatpush3.bf16.msra.mxu0 %v5284_v12 }
  0x16   : > { %5288 = vmatprep.subr.bf16.mxu0 %v6357_v21 }
  0x18   : > { %4585 = vmatmul.mubr.msk.f32.vlgmr.msra.gmra.mrb[0].mxu0 %vm432_vm0, %v415_v13 }
  0x19   : > { %4587 = vmatprep.mubr.msk.f32.mxu0 %vm432_vm0, %v416_v14 }
  0x1c   : > { %4588 = vmatmul.mubr.msk.f32.gmra.mrb[2].mxu0 %vm432_vm0, %v417_v15 }
  0x1d   : > { %4590 = vmatprep.mubr.msk.f32.mxu0 %vm432_vm0, %v418_v16  ;;  %v6652_v16 = vld [vmem:[%s7392_s4] sm:$0xff] }
  0x20   : > { %4591 = vmatmul.mubr.msk.f32.gmra.mrb[4].mxu0 %vm432_vm0, %v419_v17 }
  0x21   : > { %4593 = vmatprep.mubr.msk.f32.mxu0 %vm432_vm0, %v420_v18 }
  0x24   : > { %4594 = vmatmul.mubr.msk.f32.gmra.mrb[6].mxu0 %vm432_vm0, %v421_v19 }
  0x25   : > { %4612 = vmatprep.mubr.msk.f32.mxu0 %vm6364_vm2, %v6365_v45 }
  0xeb   : > { %v6491_v22 = vpop.f32.mrb[0].mxu0 }
  0xec   : > { %v6493_v23 = vpop.f32.mrb[1].mxu0  ;;  %v666_v24 = vrot.slane %v6491_v22, 4 }
  0xed   : > { %v665_v25 = vrot.slane %v6493_v23, 4 }
  0xef   : > { %v6497_v26 = vpop.f32.mrb[2].mxu0  ;;  %v6500_v27 = vsel %vm664_vm1, %v665_v25, %v666_v24 }
  0xf0   : > { %v6502_v28 = vpop.f32.mrb[3].mxu0  ;;  %v5906_v29 = vpack.i.bf16 %v6500_v27, %v6493_v23  ;;  %v1042_v31 = vrot.slane %v6497_v26, 4 }
  0xf1   : > { %v854_v30 = vrot.slane %v6502_v28, 4 }
  0xf2   : > { %5907 = vrot.lane.b32.xlu1 %v5906_v29, %s6358_s27  ;;  %5897 = vrot.lane.b32.xlu0 %v5906_v29, %s6359_s28 }
  0xf3   : > { %v6511_v32 = vsel %vm664_vm1, %v666_v24, %v854_v30  ;;  %v6513_v33 = vpop.f32.mrb[4].mxu0  ;;  %v6518_v35 = vsel %vm664_vm1, %v854_v30, %v1042_v31 }
  0xf4   : > { %v6515_v34 = vpop.f32.mrb[5].mxu0  ;;  %v1418_v39 = vrot.slane %v6513_v33, 4  ;;  %v5931_v43 = vpack.i.bf16 %v6511_v32, %v6491_v22  ;;  %v5966_v48 = vpack.i.bf16 %v6518_v35, %v6502_v28 }
  0xf5   : > { %v1230_v36 = vrot.slane %v6515_v34, 4 }
  0xf6   : > { %5912 = vrot.lane.b32.xlu1 %v5906_v29, %s6360_s29  ;;  %5902 = vrot.lane.b32.xlu0 %v5906_v29, %s6361_s30 }
  0xf7   : > { %v6523_v37 = vpop.f32.mrb[6].mxu0  ;;  %v6526_v38 = vsel %vm664_vm1, %v1042_v31, %v1230_v36  ;;  %v6535_v42 = vsel %vm664_vm1, %v1230_v36, %v1418_v39 }
  0xf8   : > { %v6529_v40 = vpop.f32.mrb[7].mxu0  ;;  %v1794_v44 = vrot.slane %v6523_v37, 4  ;;  %v6001_v49 = vpack.i.bf16 %v6526_v38, %v6497_v26  ;;  %v6036_v50 = vpack.i.bf16 %v6535_v42, %v6515_v34 }
  0xf9   : > { %v1606_v41 = vrot.slane %v6529_v40, 4 }
  0xfa   : > { %5922 = vrot.lane.b32.xlu1 %v5906_v29, %s6362_s13  ;;  %5917 = vrot.lane.b32.xlu0 %v5906_v29, %s6363_s14 }
  0xfb   : > { %v6543_v46 = vsel %vm664_vm1, %v1418_v39, %v1606_v41  ;;  %v6550_v47 = vsel %vm664_vm1, %v1606_v41, %v1794_v44 }
  0xfc   : > { %v6071_v51 = vpack.i.bf16 %v6543_v46, %v6513_v33  ;;  %v6106_v52 = vpack.i.bf16 %v6550_v47, %v6529_v40 }
  0xfe   : > { %5927 = vrot.lane.b32.xlu0 %v5906_v29, %s6366_s15  ;;  %5932 = vrot.lane.b32.xlu1 %v5931_v43, %s6359_s28 }
 0x102   : > { %5937 = vrot.lane.b32.xlu0 %v5931_v43, %s6361_s30  ;;  %5942 = vrot.lane.b32.xlu1 %v5931_v43, %s6358_s27 }
 0x106   : > { %5947 = vrot.lane.b32.xlu0 %v5931_v43, %s6360_s29  ;;  %5952 = vrot.lane.b32.xlu1 %v5931_v43, %s6363_s14 }
 0x10a   : > { %5957 = vrot.lane.b32.xlu0 %v5931_v43, %s6362_s13  ;;  %5962 = vrot.lane.b32.xlu1 %v5931_v43, %s6366_s15 }
 0x10e   : > { %5967 = vrot.lane.b32.xlu0 %v5966_v48, %s6359_s28  ;;  %5972 = vrot.lane.b32.xlu1 %v5966_v48, %s6361_s30 }
 0x112   : > { %5977 = vrot.lane.b32.xlu0 %v5966_v48, %s6358_s27  ;;  %5982 = vrot.lane.b32.xlu1 %v5966_v48, %s6360_s29 }
 0x116   : > { %5987 = vrot.lane.b32.xlu0 %v5966_v48, %s6363_s14  ;;  %5992 = vrot.lane.b32.xlu1 %v5966_v48, %s6362_s13 }
 0x11a   : > { %5997 = vrot.lane.b32.xlu0 %v5966_v48, %s6366_s15  ;;  %6002 = vrot.lane.b32.xlu1 %v6001_v49, %s6359_s28 }
 0x11e   : > { %6007 = vrot.lane.b32.xlu0 %v6001_v49, %s6361_s30  ;;  %6012 = vrot.lane.b32.xlu1 %v6001_v49, %s6358_s27 }
 0x122   : > { %6017 = vrot.lane.b32.xlu0 %v6001_v49, %s6360_s29  ;;  %6022 = vrot.lane.b32.xlu1 %v6001_v49, %s6363_s14 }
 0x126   : > { %6027 = vrot.lane.b32.xlu0 %v6001_v49, %s6362_s13  ;;  %6032 = vrot.lane.b32.xlu1 %v6001_v49, %s6366_s15 }
 0x12a   : > { %6037 = vrot.lane.b32.xlu0 %v6036_v50, %s6359_s28  ;;  %6042 = vrot.lane.b32.xlu1 %v6036_v50, %s6361_s30 }
 0x12e   : > { %6047 = vrot.lane.b32.xlu0 %v6036_v50, %s6358_s27  ;;  %6052 = vrot.lane.b32.xlu1 %v6036_v50, %s6360_s29 }
 0x132   : > { %6057 = vrot.lane.b32.xlu0 %v6036_v50, %s6363_s14  ;;  %6062 = vrot.lane.b32.xlu1 %v6036_v50, %s6362_s13 }
 0x136   : > { %6067 = vrot.lane.b32.xlu0 %v6036_v50, %s6366_s15  ;;  %6072 = vrot.lane.b32.xlu1 %v6071_v51, %s6359_s28 }
 0x13a   : > { %6077 = vrot.lane.b32.xlu0 %v6071_v51, %s6361_s30  ;;  %6082 = vrot.lane.b32.xlu1 %v6071_v51, %s6358_s27 }
 0x13e   : > { %6087 = vrot.lane.b32.xlu0 %v6071_v51, %s6360_s29  ;;  %6092 = vrot.lane.b32.xlu1 %v6071_v51, %s6363_s14 }
 0x142   : > { %6097 = vrot.lane.b32.xlu0 %v6071_v51, %s6362_s13  ;;  %6102 = vrot.lane.b32.xlu1 %v6071_v51, %s6366_s15 }
 0x146   : > { %1713 = vrot.lane.b32.xlu0 %v6529_v40, %s6363_s14  ;;  %1710 = vrot.lane.b32.xlu1 %v6529_v40, %s6360_s29 }
 0x14a   : > { %6107 = vrot.lane.b32.xlu0 %v6106_v52, %s6359_s28  ;;  %6112 = vrot.lane.b32.xlu1 %v6106_v52, %s6361_s30 }
 0x14e   : > { %6117 = vrot.lane.b32.xlu0 %v6106_v52, %s6358_s27  ;;  %1716 = vrot.lane.b32.xlu1 %v6529_v40, %s6362_s13 }
 0x152   : > { %1719 = vrot.lane.b32.xlu0 %v6529_v40, %s6366_s15  ;;  %1806 = vrot.lane.b32.xlu1 %v6550_v47, %s6360_s29 }
 0x156   : > { %1809 = vrot.lane.b32.xlu0 %v6550_v47, %s6363_s14  ;;  %1812 = vrot.lane.b32.xlu1 %v6550_v47, %s6362_s13 }
 0x15a   : > { %1815 = vrot.lane.b32.xlu0 %v6550_v47, %s6366_s15  ;;  %586 = vperm.xlu1 %6121, %v431_v53  }
 0x15e   : > { %1889 = vrot.lane.b32.xlu0 %v6523_v37, %s6359_s28  ;;  %1892 = vrot.lane.b32.xlu1 %v6523_v37, %s6361_s30  ;;  %s6369_s28 = smov 116  }
 0x162   : > { %1895 = vrot.lane.b32.xlu0 %v6523_v37, %s6358_s27  ;;  %1898 = vrot.lane.b32.xlu1 %v6523_v37, %s6360_s29  ;;  %s6368_s27 = smov 122  }
 0x164   : > { %v5908_v54 = vpop.permute.xlu1 %5907  ;;  %v5898_v55 = vpop.permute.xlu0 %5897 }
 0x165   : > { %v5899_v56 = vunpack.i.l.bf16 %v5898_v55  ;;  %v5909_v60 = vunpack.i.l.bf16 %v5908_v54  ;;  %v5900_v9 = vunpack.i.h.bf16 %v5898_v55 }
 0x166   : > { %1901 = vrot.lane.b32.xlu0 %v6523_v37, %s6363_s14  ;;  %1904 = vrot.lane.b32.xlu1 %v6523_v37, %s6362_s13  ;;  %s6370_s13 = smov 110   ;;  %s6375_s14 = smov 125  }
 0x167   : > { %v5289_v57 = vpack.c.bf16 %v5899_v56, %v6493_v23  ;;  %v5301_v17 = vpack.c.bf16 %v5900_v9, %v6500_v27  ;;  %v5910_v23 = vunpack.i.h.bf16 %v5908_v54 }
 0x168   : > { %v5913_v58 = vpop.permute.xlu1 %5912  ;;  %v5903_v59 = vpop.permute.xlu0 %5902 }
 0x169   : > { %v5904_v61 = vunpack.i.l.bf16 %v5903_v59  ;;  %5290 = vmatpush3.bf16.msra.mxu0 %v5289_v57  ;;  %v5914_v1 = vunpack.i.l.bf16 %v5913_v58  ;;  %v5905_v18 = vunpack.i.h.bf16 %v5903_v59  ;;  %v5915_v39 = vunpack.i.h.bf16 %v5913_v58 }
 0x16a   : > { %1907 = vrot.lane.b32.xlu0 %v6523_v37, %s6366_s15  ;;  %5291 = vmatprep.subr.bf16.mxu0 %v6357_v21 }
 0x16b   : > { %v5292_v62 = vpack.c.bf16 %v5909_v60, %v5904_v61  ;;  %v5304_v27 = vpack.c.bf16 %v5910_v23, %v5905_v18 }
 0x16c   : > { %v6634_v63 = vpop.permute.xlu1 %5922  ;;  %v5918_v0 = vpop.permute.xlu0 %5917 }
 0x16d   : > { %v5919_v2 = vunpack.i.l.bf16 %v5918_v0  ;;  %5293 = vmatpush3.bf16.msra.mxu0 %v5292_v62  ;;  %v5924_v6 = vunpack.i.l.bf16 %v6634_v63  ;;  %v5920_v29 = vunpack.i.h.bf16 %v5918_v0  ;;  %v5925_v52 = vunpack.i.h.bf16 %v6634_v63 }
 0x16e   : > { %5294 = vmatprep.subr.bf16.mxu0 %v6357_v21 }
 0x16f   : > { %v5295_v3 = vpack.c.bf16 %v5919_v2, %v5914_v1  ;;  %v5307_v44 = vpack.c.bf16 %v5920_v29, %v5915_v39 }
 0x170   : > { %v5928_v4 = vpop.permute.xlu0 %5927  ;;  %v6637_v5 = vpop.permute.xlu1 %5932 }
 0x171   : > { %v5929_v7 = vunpack.i.l.bf16 %v5928_v4  ;;  %5296 = vmatpush3.bf16.msra.mxu0 %v5295_v3  ;;  %v5934_v8 = vunpack.i.l.bf16 %v6637_v5  ;;  %v5930_v48 = vunpack.i.h.bf16 %v5928_v4  ;;  %v5935_v55 = vunpack.i.h.bf16 %v6637_v5 }
 0x172   : > { %5297 = vmatprep.subr.bf16.mxu0 %v6357_v21 }
 0x173   : > { %v5298_v10 = vpack.c.bf16 %v5929_v7, %v5924_v6  ;;  %v5313_v11 = vpack.c.bf16 %v5934_v8, %v6491_v22  ;;  %v5310_v54 = vpack.c.bf16 %v5930_v48, %v5925_v52  ;;  %v5325_v61 = vpack.c.bf16 %v5935_v55, %v6511_v32 }
 0x174   : > { %v6643_v12 = vpop.permute.xlu0 %5937  ;;  %v6645_v13 = vpop.permute.xlu1 %5942 }
 0x175   : > { %v5939_v14 = vunpack.i.l.bf16 %v6643_v12  ;;  %v5944_v15 = vunpack.i.l.bf16 %v6645_v13  ;;  %5299 = vmatpush3.bf16.msra.mxu0 %v5298_v10  ;;  %5314 = vmatpush3.bf16.msra.mxu1 %v5313_v11  ;;  %v5945_v62 = vunpack.i.h.bf16 %v6645_v13 }
 0x176   : > { %5300 = vmatprep.subr.bf16.mxu0 %v6357_v21  ;;  %5315 = vmatprep.subr.bf16.mxu1 %v6357_v21 }
 0x177   : > { %v5316_v19 = vpack.c.bf16 %v5944_v15, %v5939_v14 }
 0x178   : > { %4613 = vmatmul.mubr.msk.f32.vlgmr.msra.gmra.mrb[8].mxu0 %vm432_vm0, %v6652_v16  ;;  %v6659_v20 = vpop.permute.xlu0 %5947  ;;  %v6661_v22 = vpop.permute.xlu1 %5952 }
 0x179   : > { %v5949_v24 = vunpack.i.l.bf16 %v6659_v20  ;;  %v5954_v25 = vunpack.i.l.bf16 %v6661_v22  ;;  %5302 = vmatpush3.bf16.msra.mxu0 %v5301_v17  ;;  %5317 = vmatpush3.bf16.msra.mxu1 %v5316_v19  ;;  %v5950_v4 = vunpack.i.h.bf16 %v6659_v20  ;;  %v5955_v5 = vunpack.i.h.bf16 %v6661_v22 }
 0x17a   : > { %5303 = vmatprep.subr.bf16.mxu0 %v6357_v21  ;;  %5318 = vmatprep.subr.bf16.mxu1 %v6357_v21 }
 0x17b   : > { %v5319_v30 = vpack.c.bf16 %v5954_v25, %v5949_v24  ;;  %4631 = vmatprep.mubr.msk.f32.mxu0 %vm6364_vm2, %v6365_v45  ;;  %v5331_v13 = vpack.c.bf16 %v5955_v5, %v5950_v4 }
 0x17c   : > { %v6669_v31 = vpop.permute.xlu0 %5957  ;;  %v6671_v36 = vpop.permute.xlu1 %5962 }
 0x17d   : > { %v5959_v41 = vunpack.i.l.bf16 %v6669_v31  ;;  %v5964_v43 = vunpack.i.l.bf16 %v6671_v36  ;;  %5305 = vmatpush3.bf16.msra.mxu0 %v5304_v27  ;;  %5320 = vmatpush3.bf16.msra.mxu1 %v5319_v30  ;;  %v5960_v11 = vunpack.i.h.bf16 %v6669_v31 }
 0x17e   : > { %5306 = vmatprep.subr.bf16.mxu0 %v6357_v21  ;;  %5321 = vmatprep.subr.bf16.mxu1 %v6357_v21 }
 0x17f   : > { %v5322_v49 = vpack.c.bf16 %v5964_v43, %v5959_v41 }
 0x180   : > { %v6677_v50 = vpop.permute.xlu0 %5967  ;;  %v6679_v51 = vpop.permute.xlu1 %5972 }
 0x181   : > { %v5969_v53 = vunpack.i.l.bf16 %v6677_v50  ;;  %5308 = vmatpush3.bf16.msra.mxu0 %v5307_v44  ;;  %5323 = vmatpush3.bf16.msra.mxu1 %v5322_v49  ;;  %v5974_v59 = vunpack.i.l.bf16 %v6679_v51  ;;  %v5970_v20 = vunpack.i.h.bf16 %v6677_v50  ;;  %v5975_v39 = vunpack.i.h.bf16 %v6679_v51 }
 0x182   : > { %5309 = vmatprep.subr.bf16.mxu0 %v6357_v21  ;;  %5336 = vmatprep.subr.bf16.mxu1 %v6357_v21 }
 0x183   : > { %v5337_v56 = vpack.c.bf16 %v5969_v53, %v6502_v28  ;;  %v5940_v28 = vunpack.i.h.bf16 %v6643_v12  ;;  %v5965_v12 = vunpack.i.h.bf16 %v6671_v36 }
 0x184   : > { %v6687_v57 = vpop.permute.xlu0 %5977  ;;  %v6689_v58 = vpop.permute.xlu1 %5982  ;;  %4651 = vmatmul.mubr.msk.f32.vlgmr.msra.gmra.mrb[0].mxu1 %vm432_vm0, %v6652_v16 }
 0x185   : > { %v5979_v60 = vunpack.i.l.bf16 %v6687_v57  ;;  %5311 = vmatpush3.bf16.msra.mxu0 %v5310_v54  ;;  %5338 = vmatpush3.bf16.msra.mxu1 %v5337_v56  ;;  %v5984_v2 = vunpack.i.l.bf16 %v6689_v58  ;;  %v5328_v32 = vpack.c.bf16 %v5945_v62, %v5940_v28  ;;  %v5334_v19 = vpack.c.bf16 %v5965_v12, %v5960_v11 }
 0x186   : > { %5324 = vmatprep.subr.bf16.mxu0 %v6357_v21  ;;  %5339 = vmatprep.subr.bf16.mxu1 %v6357_v21  ;;  %v5980_v29 = vunpack.i.h.bf16 %v6687_v57  ;;  %v5985_v53 = vunpack.i.h.bf16 %v6689_v58 }
 0x187   : > { %v5340_v63 = vpack.c.bf16 %v5979_v60, %v5974_v59  ;;  %4688 = vmatprep.mubr.msk.f32.mxu1 %vm6364_vm2, %v6365_v45 }
 0x188   : > { %4632 = vmatmul.mubr.msk.f32.vlgmr.msra.gmra.mrb[10].mxu0 %vm432_vm0, %v6652_v16  ;;  %v6704_v0 = vpop.permute.xlu0 %5987  ;;  %v6706_v1 = vpop.permute.xlu1 %5992 }
 0x189   : > { %v5989_v3 = vunpack.i.l.bf16 %v6704_v0  ;;  %5326 = vmatpush3.bf16.msra.mxu0 %v5325_v61  ;;  %5341 = vmatpush3.bf16.msra.mxu1 %v5340_v63  ;;  %v5994_v9 = vunpack.i.l.bf16 %v6706_v1  ;;  %v5990_v44 = vunpack.i.h.bf16 %v6704_v0  ;;  %v5995_v61 = vunpack.i.h.bf16 %v6706_v1 }
 0x18a   : > { %5327 = vmatprep.subr.bf16.mxu0 %v6357_v21  ;;  %5342 = vmatprep.subr.bf16.mxu1 %v6357_v21 }
 0x18b   : > { %v5343_v6 = vpack.c.bf16 %v5989_v3, %v5984_v2  ;;  %4669 = vmatprep.mubr.msk.f32.mxu0 %vm6364_vm2, %v6365_v45  ;;  %v5355_v54 = vpack.c.bf16 %v5990_v44, %v5985_v53 }
 0x18c   : > { %v6716_v7 = vpop.permute.xlu0 %5997  ;;  %v6718_v8 = vpop.permute.xlu1 %6002 }
 0x18d   : > { %v5999_v10 = vunpack.i.l.bf16 %v6716_v7  ;;  %5329 = vmatpush3.bf16.msra.mxu0 %v5328_v32  ;;  %5344 = vmatpush3.bf16.msra.mxu1 %v5343_v6  ;;  %v6004_v15 = vunpack.i.l.bf16 %v6718_v8  ;;  %v6000_v55 = vunpack.i.h.bf16 %v6716_v7  ;;  %v6005_v28 = vunpack.i.h.bf16 %v6718_v8 }
 0x18e   : > { %5330 = vmatprep.subr.bf16.mxu0 %v6357_v21  ;;  %5345 = vmatprep.subr.bf16.mxu1 %v6357_v21 }
 0x18f   : > { %v5346_v14 = vpack.c.bf16 %v5999_v10, %v5994_v9  ;;  %v5361_v22 = vpack.c.bf16 %v6004_v15, %v6497_v26  ;;  %v5349_v26 = vpack.c.bf16 %v5970_v20, %v6518_v35  ;;  %v5352_v35 = vpack.c.bf16 %v5980_v29, %v5975_v39 }
 0x190   : > { %v6727_v17 = vpop.permute.xlu0 %6007  ;;  %v6729_v18 = vpop.permute.xlu1 %6012  ;;  %v5358_v58 = vpack.c.bf16 %v6000_v55, %v5995_v61 }
 0x191   : > { %5332 = vmatpush3.bf16.msra.mxu0 %v5331_v13  ;;  %5347 = vmatpush3.bf16.msra.mxu1 %v5346_v14  ;;  %v6009_v23 = vunpack.i.l.bf16 %v6727_v17  ;;  %v6014_v24 = vunpack.i.l.bf16 %v6729_v18  ;;  %v6010_v3 = vunpack.i.h.bf16 %v6727_v17  ;;  %v6015_v32 = vunpack.i.h.bf16 %v6729_v18 }
 0x192   : > { %5333 = vmatprep.subr.bf16.mxu0 %v6357_v21  ;;  %5360 = vmatprep.subr.bf16.mxu1 %v6357_v21 }
 0x193   : > { %v5364_v30 = vpack.c.bf16 %v6014_v24, %v6009_v23  ;;  %v5376_v9 = vpack.c.bf16 %v6015_v32, %v6010_v3 }
 0x194   : > { %4689 = vmatmul.mubr.msk.f32.vlgmr.msra.gmra.mrb[2].mxu1 %vm432_vm0, %v6652_v16  ;;  %v6739_v25 = vpop.permute.xlu0 %6017  ;;  %v6741_v27 = vpop.permute.xlu1 %6022 }
 0x195   : > { %5335 = vmatpush3.bf16.msra.mxu0 %v5334_v19  ;;  %5362 = vmatpush3.bf16.msra.mxu1 %v5361_v22  ;;  %v6019_v31 = vunpack.i.l.bf16 %v6739_v25  ;;  %v6024_v36 = vunpack.i.l.bf16 %v6741_v27  ;;  %v6025_v10 = vunpack.i.h.bf16 %v6741_v27 }
 0x196   : > { %5348 = vmatprep.subr.bf16.mxu0 %v6357_v21  ;;  %5363 = vmatprep.subr.bf16.mxu1 %v6357_v21 }
 0x197   : > { %4726 = vmatprep.mubr.msk.f32.mxu1 %vm6364_vm2, %v6365_v45  ;;  %v5367_v48 = vpack.c.bf16 %v6024_v36, %v6019_v31 }
 0x198   : > { %4670 = vmatmul.mubr.msk.f32.vlgmr.msra.gmra.mrb[12].mxu0 %vm432_vm0, %v6652_v16  ;;  %v6754_v41 = vpop.permute.xlu0 %6027  ;;  %v6756_v43 = vpop.permute.xlu1 %6032 }
 0x199   : > { %5350 = vmatpush3.bf16.msra.mxu0 %v5349_v26  ;;  %5365 = vmatpush3.bf16.msra.mxu1 %v5364_v30  ;;  %v6029_v49 = vunpack.i.l.bf16 %v6754_v41  ;;  %v6034_v50 = vunpack.i.l.bf16 %v6756_v43  ;;  %v6030_v17 = vunpack.i.h.bf16 %v6754_v41  ;;  %v6035_v18 = vunpack.i.h.bf16 %v6756_v43 }
 0x19a   : > { %5351 = vmatprep.subr.bf16.mxu0 %v6357_v21  ;;  %5366 = vmatprep.subr.bf16.mxu1 %v6357_v21 }
 0x19b   : > { %4707 = vmatprep.mubr.msk.f32.mxu0 %vm6364_vm2, %v6365_v45  ;;  %v5370_v56 = vpack.c.bf16 %v6034_v50, %v6029_v49 }
 0x19c   : > { %v6765_v51 = vpop.permute.xlu0 %6037  ;;  %v6767_v52 = vpop.permute.xlu1 %6042 }
 0x19d   : > { %5353 = vmatpush3.bf16.msra.mxu0 %v5352_v35  ;;  %5368 = vmatpush3.bf16.msra.mxu1 %v5367_v48  ;;  %v6039_v57 = vunpack.i.l.bf16 %v6765_v51  ;;  %v6044_v1 = vunpack.i.l.bf16 %v6767_v52  ;;  %v6040_v27 = vunpack.i.h.bf16 %v6765_v51  ;;  %v6045_v44 = vunpack.i.h.bf16 %v6767_v52 }
 0x19e   : > { %5354 = vmatprep.subr.bf16.mxu0 %v6357_v21  ;;  %5369 = vmatprep.subr.bf16.mxu1 %v6357_v21 }
 0x19f   : > { %v5385_v62 = vpack.c.bf16 %v6039_v57, %v6515_v34  ;;  %v5373_v34 = vpack.c.bf16 %v6005_v28, %v6526_v38  ;;  %v6020_v38 = vunpack.i.h.bf16 %v6739_v25  ;;  %v5382_v25 = vpack.c.bf16 %v6035_v18, %v6030_v17 }
 0x1a0   : > { %v6774_v59 = vpop.permute.xlu0 %6047  ;;  %v6776_v60 = vpop.permute.xlu1 %6052 }
 0x1a1   : > { %5356 = vmatpush3.bf16.msra.mxu0 %v5355_v54  ;;  %5371 = vmatpush3.bf16.msra.mxu1 %v5370_v56  ;;  %v6049_v63 = vunpack.i.l.bf16 %v6774_v59  ;;  %v6054_v8 = vunpack.i.l.bf16 %v6776_v60  ;;  %v5379_v19 = vpack.c.bf16 %v6025_v10, %v6020_v38  ;;  %v6050_v36 = vunpack.i.h.bf16 %v6774_v59 }
 0x1a2   : > { %5357 = vmatprep.subr.bf16.mxu0 %v6357_v21  ;;  %5384 = vmatprep.subr.bf16.mxu1 %v6357_v21  ;;  %v6055_v55 = vunpack.i.h.bf16 %v6776_v60 }
 0x1a3   : > { %v5388_v4 = vpack.c.bf16 %v6049_v63, %v6044_v1  ;;  %v5400_v49 = vpack.c.bf16 %v6050_v36, %v6045_v44 }
 0x1a4   : > { %v6784_v0 = vpop.permute.xlu0 %6057  ;;  %v6786_v2 = vpop.permute.xlu1 %6062  ;;  %4727 = vmatmul.mubr.msk.f32.vlgmr.msra.gmra.mrb[4].mxu1 %vm432_vm0, %v6652_v16 }
 0x1a5   : > { %5359 = vmatpush3.bf16.msra.mxu0 %v5358_v58  ;;  %5386 = vmatpush3.bf16.msra.mxu1 %v5385_v62  ;;  %v6059_v5 = vunpack.i.l.bf16 %v6784_v0  ;;  %v6064_v15 = vunpack.i.l.bf16 %v6786_v2  ;;  %v6065_v28 = vunpack.i.h.bf16 %v6786_v2 }
 0x1a6   : > { %5372 = vmatprep.subr.bf16.mxu0 %v6357_v21  ;;  %5387 = vmatprep.subr.bf16.mxu1 %v6357_v21 }
 0x1a7   : > { %4764 = vmatprep.mubr.msk.f32.mxu1 %vm6364_vm2, %v6365_v45  ;;  %v5391_v11 = vpack.c.bf16 %v6059_v5, %v6054_v8 }
 0x1a8   : > { %4708 = vmatmul.mubr.msk.f32.vlgmr.msra.gmra.mrb[14].mxu0 %vm432_vm0, %v6652_v16  ;;  %v6801_v6 = vpop.permute.xlu0 %6067  ;;  %v6803_v7 = vpop.permute.xlu1 %6072 }
 0x1a9   : > { %5374 = vmatpush3.bf16.msra.mxu0 %v5373_v34  ;;  %5389 = vmatpush3.bf16.msra.mxu1 %v5388_v4  ;;  %v6069_v12 = vunpack.i.l.bf16 %v6801_v6  ;;  %v6074_v22 = vunpack.i.l.bf16 %v6803_v7  ;;  %v6070_v57 = vunpack.i.h.bf16 %v6801_v6  ;;  %v6075_v60 = vunpack.i.h.bf16 %v6803_v7 }
 0x1aa   : > { %5375 = vmatprep.subr.bf16.mxu0 %v6357_v21  ;;  %5390 = vmatprep.subr.bf16.mxu1 %v6357_v21 }
 0x1ab   : > { %4745 = vmatprep.mubr.msk.f32.mxu0 %vm6364_vm2, %v6365_v45  ;;  %v5394_v20 = vpack.c.bf16 %v6069_v12, %v6064_v15  ;;  %v5409_v29 = vpack.c.bf16 %v6074_v22, %v6513_v33  ;;  %v5397_v33 = vpack.c.bf16 %v6040_v27, %v6535_v42  ;;  %v6060_v42 = vunpack.i.h.bf16 %v6784_v0 }
 0x1ac   : > { %v6813_v13 = vpop.permute.xlu0 %6077  ;;  %v6815_v14 = vpop.permute.xlu1 %6082  ;;  %v5406_v63 = vpack.c.bf16 %v6070_v57, %v6065_v28  ;;  %v5421_v2 = vpack.c.bf16 %v6075_v60, %v6543_v46 }
 0x1ad   : > { %5377 = vmatpush3.bf16.msra.mxu0 %v5376_v9  ;;  %5392 = vmatpush3.bf16.msra.mxu1 %v5391_v11  ;;  %v6079_v26 = vunpack.i.l.bf16 %v6813_v13  ;;  %v6084_v30 = vunpack.i.l.bf16 %v6815_v14  ;;  %v5403_v56 = vpack.c.bf16 %v6060_v42, %v6055_v55  ;;  %v6080_v34 = vunpack.i.h.bf16 %v6813_v13 }
 0x1ae   : > { %5378 = vmatprep.subr.bf16.mxu0 %v6357_v21  ;;  %5393 = vmatprep.subr.bf16.mxu1 %v6357_v21 }
 0x1af   : > { %v5412_v41 = vpack.c.bf16 %v6084_v30, %v6079_v26 }
 0x1b0   : > { %v6823_v23 = vpop.permute.xlu0 %6087  ;;  %v6825_v24 = vpop.permute.xlu1 %6092 }
 0x1b1   : > { %5380 = vmatpush3.bf16.msra.mxu0 %v5379_v19  ;;  %5395 = vmatpush3.bf16.msra.mxu1 %v5394_v20  ;;  %v6089_v43 = vunpack.i.l.bf16 %v6823_v23  ;;  %v6094_v35 = vunpack.i.l.bf16 %v6825_v24  ;;  %v6090_v7 = vunpack.i.h.bf16 %v6823_v23  ;;  %v6095_v8 = vunpack.i.h.bf16 %v6825_v24 }
 0x1b2   : > { %5381 = vmatprep.subr.bf16.mxu0 %v6357_v21  ;;  %5408 = vmatprep.subr.bf16.mxu1 %v6357_v21 }
 0x1b3   : > { %v5415_v50 = vpack.c.bf16 %v6094_v35, %v6089_v43  ;;  %v5427_v10 = vpack.c.bf16 %v6095_v8, %v6090_v7 }
 0x1b4   : > { %4765 = vmatmul.mubr.msk.f32.vlgmr.msra.gmra.mrb[6].mxu1 %vm432_vm0, %v6652_v16  ;;  %v6835_v31 = vpop.permute.xlu0 %6097  ;;  %v6838_v39 = vpop.permute.xlu1 %6102 }
 0x1b5   : > { %5383 = vmatpush3.bf16.msra.mxu0 %v5382_v25  ;;  %5410 = vmatpush3.bf16.msra.mxu1 %v5409_v29  ;;  %v6099_v51 = vunpack.i.l.bf16 %v6835_v31  ;;  %v6104_v53 = vunpack.i.l.bf16 %v6838_v39  ;;  %v6100_v11 = vunpack.i.h.bf16 %v6835_v31  ;;  %v6105_v12 = vunpack.i.h.bf16 %v6838_v39  ;;  %v1981_v39 = vld [vmem:[%s7390_s2] sm:$0xff] }
 0x1b6   : > { %5396 = vmatprep.subr.bf16.mxu0 %v6357_v21  ;;  %5411 = vmatprep.subr.bf16.mxu1 %v6357_v21 }
 0x1b7   : > { %4802 = vmatprep.mubr.msk.f32.mxu1 %vm6364_vm2, %v6365_v45  ;;  %v5418_v59 = vpack.c.bf16 %v6104_v53, %v6099_v51  ;;  %v5430_v17 = vpack.c.bf16 %v6105_v12, %v6100_v11 }
 0x1b8   : > { %4746 = vmatmul.mubr.msk.f32.vlgmr.msra.gmra.mrb[16].mxu0 %vm432_vm0, %v6652_v16  ;;  %v1714_v48 = vpop.permute.xlu0 %1713  ;;  %v1711_v54 = vpop.permute.xlu1 %1710 }
 0x1b9   : > { %5398 = vmatpush3.bf16.msra.mxu0 %v5397_v33  ;;  %5413 = vmatpush3.bf16.msra.mxu1 %v5412_v41  ;;  %v5439_v9 = vpack.c.bf16 %v1714_v48, %v1711_v54  ;;  %v1982_v33 = vld [vmem:[%s7390_s2 + $0x8] sm:$0x7f] }
 0x1ba   : > { %5399 = vmatprep.subr.bf16.mxu0 %v6357_v21  ;;  %5414 = vmatprep.subr.bf16.mxu1 %v6357_v21  ;;  %v5469_v44 = vpack.c.bf16 %v1982_v33, %v1981_v39 }
 0x1bb   : > { %4783 = vmatprep.mubr.msk.f32.mxu0 %vm6364_vm2, %v6365_v45 }
 0x1bc   : > { %v6857_v52 = vpop.permute.xlu0 %6107  ;;  %v6869_v62 = vpop.permute.xlu1 %6112 }
 0x1bd   : > { %5401 = vmatpush3.bf16.msra.mxu0 %v5400_v49  ;;  %5416 = vmatpush3.bf16.msra.mxu1 %v5415_v50  ;;  %v6109_v61 = vunpack.i.l.bf16 %v6857_v52  ;;  %v6114_v3 = vunpack.i.l.bf16 %v6869_v62  ;;  %v6110_v18 = vunpack.i.h.bf16 %v6857_v52  ;;  %v6115_v24 = vunpack.i.h.bf16 %v6869_v62 }
 0x1be   : > { %5402 = vmatprep.subr.bf16.mxu0 %v6357_v21  ;;  %5417 = vmatprep.subr.bf16.mxu1 %v6357_v21 }
 0x1bf   : > { %v5433_v0 = vpack.c.bf16 %v6109_v61, %v6529_v40  ;;  %v6085_v40 = vunpack.i.h.bf16 %v6815_v14  ;;  %v5445_v22 = vpack.c.bf16 %v6110_v18, %v6550_v47 }
 0x1c0   : > { %v6864_v58 = vpop.permute.xlu0 %6117  ;;  %v1717_v6 = vpop.permute.xlu1 %1716 }
 0x1c1   : > { %5404 = vmatpush3.bf16.msra.mxu0 %v5403_v56  ;;  %5419 = vmatpush3.bf16.msra.mxu1 %v5418_v59  ;;  %v6119_v1 = vunpack.i.l.bf16 %v6864_v58  ;;  %v5424_v46 = vpack.c.bf16 %v6085_v40, %v6080_v34  ;;  %v6120_v23 = vunpack.i.h.bf16 %v6864_v58 }
 0x1c2   : > { %5405 = vmatprep.subr.bf16.mxu0 %v6357_v21  ;;  %5432 = vmatprep.subr.bf16.mxu1 %v6357_v21 }
 0x1c3   : > { %v5436_v4 = vpack.c.bf16 %v6119_v1, %v6114_v3  ;;  %v5448_v47 = vpack.c.bf16 %v6120_v23, %v6115_v24 }
 0x1c4   : > { %v1720_v32 = vpop.permute.xlu0 %1719  ;;  %4803 = vmatmul.mubr.msk.f32.vlgmr.msra.gmra.mrb[8].mxu1 %vm432_vm0, %v6652_v16  ;;  %v1807_v14 = vpop.permute.xlu1 %1806 }
 0x1c5   : > { %5407 = vmatpush3.bf16.msra.mxu0 %v5406_v63  ;;  %5434 = vmatpush3.bf16.msra.mxu1 %v5433_v0  ;;  %v5442_v13 = vpack.c.bf16 %v1720_v32, %v1717_v6 }
 0x1c6   : > { %5420 = vmatprep.subr.bf16.mxu0 %v6357_v21  ;;  %5435 = vmatprep.subr.bf16.mxu1 %v6357_v21 }
 0x1c7   : > { %4840 = vmatprep.mubr.msk.f32.mxu1 %vm6364_vm2, %v6365_v45 }
 0x1c8   : > { %4784 = vmatmul.mubr.msk.f32.vlgmr.msra.gmra.mrb[18].mxu0 %vm432_vm0, %v6652_v16  ;;  %v1810_v5 = vpop.permute.xlu0 %1809  ;;  %v1813_v20 = vpop.permute.xlu1 %1812 }
 0x1c9   : > { %5422 = vmatpush3.bf16.msra.mxu0 %v5421_v2  ;;  %5437 = vmatpush3.bf16.msra.mxu1 %v5436_v4  ;;  %v5451_v26 = vpack.c.bf16 %v1810_v5, %v1807_v14 }
 0x1ca   : > { %5423 = vmatprep.subr.bf16.mxu0 %v6357_v21  ;;  %5438 = vmatprep.subr.bf16.mxu1 %v6357_v21 }
 0x1cb   : > { %4821 = vmatprep.mubr.msk.f32.mxu0 %vm6364_vm2, %v6365_v45 }
 0x1cc   : > { %v1816_v38 = vpop.permute.xlu0 %1815 }
 0x1cd   : > { %5425 = vmatpush3.bf16.msra.mxu0 %v5424_v46  ;;  %5440 = vmatpush3.bf16.msra.mxu1 %v5439_v9  ;;  %v5454_v41 = vpack.c.bf16 %v1816_v38, %v1813_v20 }
 0x1ce   : > { %5426 = vmatprep.subr.bf16.mxu0 %v6357_v21  ;;  %5441 = vmatprep.subr.bf16.mxu1 %v6357_v21 }
 0x1d0   : > { %v1890_v15 = vpop.permute.xlu0 %1889 }
 0x1d1   : > { %5428 = vmatpush3.bf16.msra.mxu0 %v5427_v10  ;;  %5443 = vmatpush3.bf16.msra.mxu1 %v5442_v13  ;;  %v5457_v19 = vpack.c.bf16 %v1890_v15, %v6523_v37 }
 0x1d2   : > { %5429 = vmatprep.subr.bf16.mxu0 %v6357_v21  ;;  %5456 = vmatprep.subr.bf16.mxu1 %v6357_v21 }
 0x1d4   : > { %4841 = vmatmul.mubr.msk.f32.vlgmr.msra.gmra.mrb[10].mxu1 %vm432_vm0, %v6652_v16  ;;  %v1896_v37 = vpop.permute.xlu0 %1895 }
 0x1d5   : > { %5431 = vmatpush3.bf16.msra.mxu0 %v5430_v17  ;;  %5458 = vmatpush3.bf16.msra.mxu1 %v5457_v19 }
 0x1d6   : > { %5444 = vmatprep.subr.bf16.mxu0 %v6357_v21  ;;  %5459 = vmatprep.subr.bf16.mxu1 %v6357_v21 }
 0x1d7   : > { %4878 = vmatprep.mubr.msk.f32.mxu1 %vm6364_vm2, %v6365_v45 }
 0x1d8   : > { %4822 = vmatmul.mubr.msk.f32.vlgmr.msra.gmra.mrb[20].mxu0 %vm432_vm0, %v6652_v16  ;;  %v1902_v30 = vpop.permute.xlu0 %1901 }
 0x1d9   : > { %v6911_v25 = vpop.permute.xlu1 %586  ;;  %5446 = vmatpush3.bf16.msra.mxu0 %v5445_v22  ;;  %4859 = vmatprep.mubr.msk.f32.mxu0 %vm6364_vm2, %v6365_v45 }
 0x1da   : > { %5447 = vmatprep.subr.bf16.mxu0 %v6357_v21 }
 0x1dc   : > { %v1908_v43 = vpop.permute.xlu0 %1907 }
 0x1dd   : > { %v1893_v27 = vpop.permute.xlu1 %1892  ;;  %5449 = vmatpush3.bf16.msra.mxu0 %v5448_v47 }
 0x1de   : > { %v5460_v29 = vpack.c.bf16 %v1896_v37, %v1893_v27  ;;  %5450 = vmatprep.subr.bf16.mxu0 %v6357_v21 }
 0x1e0   : > { %5461 = vmatpush3.bf16.msra.mxu1 %v5460_v29 }
 0x1e1   : > { %v1899_v31 = vpop.permute.xlu1 %1898  ;;  %5452 = vmatpush3.bf16.msra.mxu0 %v5451_v26  ;;  %5462 = vmatprep.subr.bf16.mxu1 %v6357_v21 }
 0x1e2   : > { %v5463_v36 = vpack.c.bf16 %v1902_v30, %v1899_v31  ;;  %5453 = vmatprep.subr.bf16.mxu0 %v6357_v21 }
 0x1e4   : > { %5464 = vmatpush3.bf16.msra.mxu1 %v5463_v36 }
 0x1e5   : > { %v1905_v35 = vpop.permute.xlu1 %1904  ;;  %5455 = vmatpush3.bf16.msra.mxu0 %v5454_v41  ;;  %5465 = vmatprep.subr.bf16.mxu1 %v6357_v21 }
 0x1e6   : > { %v5466_v48 = vpack.c.bf16 %v1908_v43, %v1905_v35  ;;  %5468 = vmatprep.subr.bf16.mxu0 %v6357_v21 }
 0x1e8   : > { %4860 = vmatmul.mubr.msk.f32.vlgmr.msra.gmra.mrb[22].mxu0 %vm432_vm0, %v6652_v16  ;;  %5467 = vmatpush3.bf16.msra.mxu1 %v5466_v48 }
 0x1e9   : > { %5471 = vmatpush3.bf16.msk.msra.mxu0 %vm5470_vm5, %v5469_v44  ;;  %4885 = vmatprep.mubr.msk.f32.mxu0 %vm6364_vm2, %v6365_v45 }
 0x1eb   : > { %4879 = vmatmul.mubr.msk.f32.vlgmr.msra.gmra.mrb[12].mxu1 %vm432_vm0, %v6652_v16 }
 0x24b   : > { %v658_v49 = vpop.f32.mrb[8].mxu0 }
 0x24c   : > { %v659_v42 = vadd.f32 %v658_v49, %v6911_v25  ;;  %v4614_v50 = vpop.f32.mrb[9].mxu0 }
 0x24e   : > { %v662_v51 = vmax.f32 %v659_v42, 0.0 }
 0x250   : > { %4886 = vmatmul.mubr.msk.f32.vlgmr.msra.gmra.mrb[24].mxu0 %vm1987_vm6, %v662_v51 }
 0x251   : > { %4888 = vmatprep.mubr.msk.f32.mxu0 %vm6364_vm2, %v6365_v45 }
 0x257   : > { %v848_v53 = vpop.f32.mrb[0].mxu1 }
 0x258   : > { %v4652_v52 = vpop.f32.mrb[1].mxu1  ;;  %v849_v57 = vadd.f32 %v848_v53, %v6911_v25 }
 0x25a   : > { %v852_v59 = vmax.f32 %v849_v57, 0.0 }
 0x25b   : > { %v756_v54 = vpop.f32.mrb[10].mxu0 }
 0x25c   : > { %v757_v55 = vadd.f32 %v756_v54, %v6911_v25  ;;  %v4633_v56 = vpop.f32.mrb[11].mxu0 }
 0x25e   : > { %v760_v16 = vmax.f32 %v757_v55, 0.0 }
 0x260   : > { %4889 = vmatmul.mubr.msk.f32.gmra.mrb[26].mxu0 %vm1987_vm6, %v760_v16 }
 0x261   : > { %4891 = vmatprep.mubr.msk.f32.mxu0 %vm6364_vm2, %v6365_v45 }
 0x264   : > { %4892 = vmatmul.mubr.msk.f32.gmra.mrb[28].mxu0 %vm1987_vm6, %v852_v59 }
 0x265   : > { %4894 = vmatprep.mubr.msk.f32.mxu0 %vm6364_vm2, %v6365_v45 }
 0x267   : > { %v1036_v61 = vpop.f32.mrb[2].mxu1 }
 0x268   : > { %v4690_v58 = vpop.f32.mrb[3].mxu1  ;;  %v1037_v63 = vadd.f32 %v1036_v61, %v6911_v25 }
 0x26a   : > { %v1040_v1 = vmax.f32 %v1037_v63, 0.0 }
 0x26b   : > { %v944_v28 = vpop.f32.mrb[12].mxu0 }
 0x26c   : > { %v945_v60 = vadd.f32 %v944_v28, %v6911_v25  ;;  %v4671_v62 = vpop.f32.mrb[13].mxu0 }
 0x26d   : > { %v7003_v62 = vld [vmem:[%s7394_s6] sm:$0xff] }
 0x26e   : > { %v948_v0 = vmax.f32 %v945_v60, 0.0  ;;  %4962 = vmatprep.mubr.f32.mxu1 %v7003_v62 }
 0x270   : > { %4895 = vmatmul.mubr.msk.f32.gmra.mrb[30].mxu0 %vm1987_vm6, %v948_v0 }
 0x271   : > { %4897 = vmatprep.mubr.msk.f32.mxu0 %vm6364_vm2, %v6365_v45 }
 0x274   : > { %4898 = vmatmul.mubr.msk.f32.gmra.mrb[32].mxu0 %vm1987_vm6, %v1040_v1 }
 0x275   : > { %4900 = vmatprep.mubr.msk.f32.mxu0 %vm6364_vm2, %v6365_v45 }
 0x277   : > { %v1224_v3 = vpop.f32.mrb[4].mxu1 }
 0x278   : > { %v4728_v32 = vpop.f32.mrb[5].mxu1  ;;  %v1225_v4 = vadd.f32 %v1224_v3, %v6911_v25 }
 0x27a   : > { %v1228_v6 = vmax.f32 %v1225_v4, 0.0 }
 0x27b   : > { %v1132_v2 = vpop.f32.mrb[14].mxu0 }
 0x27c   : > { %v1133_v34 = vadd.f32 %v1132_v2, %v6911_v25  ;;  %v4709_v40 = vpop.f32.mrb[15].mxu0 }
 0x27e   : > { %v1136_v5 = vmax.f32 %v1133_v34, 0.0 }
 0x280   : > { %4901 = vmatmul.mubr.msk.f32.gmra.mrb[34].mxu0 %vm1987_vm6, %v1136_v5 }
 0x281   : > { %4903 = vmatprep.mubr.msk.f32.mxu0 %vm6364_vm2, %v6365_v45 }
 0x284   : > { %4904 = vmatmul.mubr.msk.f32.gmra.mrb[36].mxu0 %vm1987_vm6, %v1228_v6 }
 0x285   : > { %4906 = vmatprep.mubr.msk.f32.mxu0 %vm6364_vm2, %v6365_v45 }
 0x287   : > { %v1412_v46 = vpop.f32.mrb[6].mxu1 }
 0x288   : > { %v4766_v7 = vpop.f32.mrb[7].mxu1  ;;  %v1413_v10 = vadd.f32 %v1412_v46, %v6911_v25 }
 0x28a   : > { %v1416_v12 = vmax.f32 %v1413_v10, 0.0 }
 0x28b   : > { %v1320_v8 = vpop.f32.mrb[16].mxu0 }
 0x28c   : > { %v1321_v9 = vadd.f32 %v1320_v8, %v6911_v25  ;;  %v4747_v38 = vpop.f32.mrb[17].mxu0 }
 0x28e   : > { %v1324_v11 = vmax.f32 %v1321_v9, 0.0 }
 0x290   : > { %4907 = vmatmul.mubr.msk.f32.gmra.mrb[38].mxu0 %vm1987_vm6, %v1324_v11 }
 0x291   : > { %4909 = vmatprep.mubr.msk.f32.mxu0 %vm6364_vm2, %v6365_v45 }
 0x294   : > { %4910 = vmatmul.mubr.msk.f32.gmra.mrb[40].mxu0 %vm1987_vm6, %v1416_v12 }
 0x295   : > { %4912 = vmatprep.mubr.msk.f32.mxu0 %vm6364_vm2, %v6365_v45 }
 0x297   : > { %v1600_v13 = vpop.f32.mrb[8].mxu1 }
 0x298   : > { %v4804_v14 = vpop.f32.mrb[9].mxu1  ;;  %v1601_v19 = vadd.f32 %v1600_v13, %v6911_v25 }
 0x29a   : > { %v1604_v22 = vmax.f32 %v1601_v19, 0.0 }
 0x29b   : > { %v1508_v15 = vpop.f32.mrb[18].mxu0 }
 0x29c   : > { %v1509_v17 = vadd.f32 %v1508_v15, %v6911_v25  ;;  %v4785_v18 = vpop.f32.mrb[19].mxu0 }
 0x29e   : > { %v1512_v20 = vmax.f32 %v1509_v17, 0.0 }
 0x2a0   : > { %4913 = vmatmul.mubr.msk.f32.gmra.mrb[42].mxu0 %vm1987_vm6, %v1512_v20  ;;  %v1986_v20 = vld [vmem:[%s7395_s7 + $0x8] sm:$0xff] }
 0x2a1   : > { %4915 = vmatprep.mubr.msk.f32.mxu0 %vm6364_vm2, %v6365_v45 }
 0x2a4   : > { %4916 = vmatmul.mubr.msk.f32.gmra.mrb[44].mxu0 %vm1987_vm6, %v1604_v22  ;;  %v1985_v22 = vld [vmem:[%s7395_s7] sm:$0xff] }
 0x2a5   : > { %4918 = vmatprep.mubr.msk.f32.mxu0 %vm6364_vm2, %v6365_v45 }
 0x2a7   : > { %v1788_v23 = vpop.f32.mrb[10].mxu1 }
 0x2a8   : > { %v4842_v24 = vpop.f32.mrb[11].mxu1  ;;  %v1789_v29 = vadd.f32 %v1788_v23, %v6911_v25 }
 0x2aa   : > { %v1792_v30 = vmax.f32 %v1789_v29, 0.0 }
 0x2ab   : > { %v1696_v37 = vpop.f32.mrb[20].mxu0 }
 0x2ac   : > { %v1697_v47 = vadd.f32 %v1696_v37, %v6911_v25  ;;  %v4823_v27 = vpop.f32.mrb[21].mxu0 }
 0x2ae   : > { %v1700_v26 = vmax.f32 %v1697_v47, 0.0 }
 0x2b0   : > { %4919 = vmatmul.mubr.msk.f32.gmra.mrb[46].mxu0 %vm1987_vm6, %v1700_v26 }
 0x2b1   : > { %4921 = vmatprep.mubr.msk.f32.mxu0 %vm6364_vm2, %v6365_v45 }
 0x2b4   : > { %4922 = vmatmul.mubr.msk.f32.gmra.mrb[48].mxu0 %vm1987_vm6, %v1792_v30 }
 0x2b5   : > { %4924 = vmatprep.mubr.msk.f32.mxu0 %vm6364_vm2, %v6365_v45 }
 0x2bb   : > { %v1884_v31 = vpop.f32.mrb[22].mxu0 }
 0x2bc   : > { %v1885_v36 = vadd.f32 %v1884_v31, %v6911_v25  ;;  %v4861_v39 = vpop.f32.mrb[23].mxu0 }
 0x2be   : > { %v1888_v33 = vmax.f32 %v1885_v36, 0.0  ;;  %v1976_v41 = vpop.f32.mrb[12].mxu1 }
 0x2bf   : > { %v1977_v43 = vadd.f32 %v1976_v41, %v6911_v25  ;;  %v4880_v35 = vpop.f32.mrb[13].mxu1 }
 0x2c0   : > { %4925 = vmatmul.mubr.msk.f32.gmra.mrb[50].mxu0 %vm1987_vm6, %v1888_v33 }
 0x2c1   : > { %v1980_v44 = vmax.f32 %v1977_v43, 0.0  ;;  %4927 = vmatprep.mubr.msk.f32.mxu0 %vm6364_vm2, %v6365_v45 }
 0x2c4   : > { %4928 = vmatmul.mubr.msk.f32.gmra.mrb[52].mxu0 %vm1987_vm6, %v1980_v44 }
 0x2c5   : > { %4997 = vmatprep.mubr.f32.mxu0 %v7003_v62 }
 0x323   : > { %v2103_v48 = vpop.f32.mrb[24].mxu0 }
 0x324   : > { %v4887_v49 = vpop.f32.mrb[25].mxu0 }
 0x333   : > { %v2108_v42 = vpop.f32.mrb[26].mxu0 }
 0x334   : > { %v4890_v50 = vpop.f32.mrb[27].mxu0  ;;  %v6122_v51 = vpack.i.bf16 %v2108_v42, %v2103_v48  ;;  %v5472_v53 = vpack.c.bf16 %v2108_v42, %v2103_v48 }
 0x336   : > { %6123 = vrot.lane.b32.xlu1 %v6122_v51, %s6368_s27  ;;  %5473 = vmatprep.subr.bf16.mxu1 %v5472_v53 }
 0x337   : > { %5475 = vmatpush3.bf16.msra.mxu1 %v5472_v53  ;;  %v2113_v25 = vpop.f32.mrb[28].mxu0 }
 0x338   : > { %v4893_v52 = vpop.f32.mrb[29].mxu0 }
 0x33a   : > { %6128 = vrot.lane.b32.xlu1 %v6122_v51, %s6369_s28 }
 0x343   : > { %v2118_v54 = vpop.f32.mrb[30].mxu0 }
 0x344   : > { %v5476_v45 = vpack.c.bf16 %v2118_v54, %v2113_v25  ;;  %v4896_v55 = vpop.f32.mrb[31].mxu0  ;;  %v6142_v56 = vpack.i.bf16 %v2118_v54, %v2113_v25 }
 0x346   : > { %6143 = vrot.lane.b32.xlu1 %v6142_v56, %s6369_s28  ;;  %6133 = vrot.lane.b32.xlu0 %v6142_v56, %s6368_s27 }
 0x347   : > { %5477 = vmatprep.subr.bf16.mxu1 %v5476_v45  ;;  %5505 = vmatprep.subr.bf16.mxu0 %v5476_v45  ;;  %v2123_v57 = vpop.f32.mrb[32].mxu0 }
 0x348   : > { %5479 = vmatpush3.bf16.msra.mxu1 %v5476_v45  ;;  %5507 = vmatpush3.bf16.msra.mxu0 %v5476_v45  ;;  %v4899_v16 = vpop.f32.mrb[33].mxu0 }
 0x353   : > { %v2128_v59 = vpop.f32.mrb[34].mxu0 }
 0x354   : > { %v6995_v61 = vpack.c.bf16 %v2128_v59, %v2123_v57  ;;  %v4902_v58 = vpop.f32.mrb[35].mxu0  ;;  %v6152_v28 = vpack.i.bf16 %v2128_v59, %v2123_v57 }
 0x356   : > { %6153 = vrot.lane.b32.xlu1 %v6152_v28, %s6369_s28  ;;  %6138 = vrot.lane.b32.xlu0 %v6152_v28, %s6368_s27 }
 0x357   : > { %5509 = vmatprep.subr.bf16.mxu0 %v6995_v61  ;;  %v2133_v60 = vpop.f32.mrb[36].mxu0 }
 0x358   : > { %5511 = vmatpush3.bf16.msra.mxu0 %v6995_v61  ;;  %v4905_v63 = vpop.f32.mrb[37].mxu0 }
 0x35a   : > { %6163 = vrot.lane.b32.xlu1 %v6152_v28, %s6370_s13  ;;  %6148 = vrot.lane.b32.xlu0 %v6122_v51, %s6370_s13 }
 0x35e   : > { %6158 = vrot.lane.b32.xlu0 %v6142_v56, %s6370_s13 }
 0x363   : > { %v2138_v0 = vpop.f32.mrb[38].mxu0 }
 0x364   : > { %v7011_v1 = vpack.c.bf16 %v2138_v0, %v2133_v60  ;;  %v4908_v3 = vpop.f32.mrb[39].mxu0  ;;  %v6167_v32 = vpack.i.bf16 %v2138_v0, %v2133_v60  ;;  %v7040_v0 = vld [vmem:[%s7394_s6 + $0x8] sm:$0xff] }
 0x366   : > { %6168 = vrot.lane.b32.xlu0 %v6167_v32, %s6368_s27 }
 0x367   : > { %v2143_v2 = vpop.f32.mrb[40].mxu0 }
 0x368   : > { %v4911_v34 = vpop.f32.mrb[41].mxu0 }
 0x36a   : > { %6178 = vrot.lane.b32.xlu0 %v6167_v32, %s6369_s28 }
 0x36e   : > { %6188 = vrot.lane.b32.xlu0 %v6167_v32, %s6370_s13 }
 0x373   : > { %v2148_v40 = vpop.f32.mrb[42].mxu0 }
 0x374   : > { %v7016_v4 = vpack.c.bf16 %v2148_v40, %v2143_v2  ;;  %v4914_v5 = vpop.f32.mrb[43].mxu0  ;;  %v6172_v6 = vpack.i.bf16 %v2148_v40, %v2143_v2 }
 0x376   : > { %6173 = vrot.lane.b32.xlu1 %v6172_v6, %s6368_s27 }
 0x377   : > { %v2153_v46 = vpop.f32.mrb[44].mxu0 }
 0x378   : > { %v4917_v7 = vpop.f32.mrb[45].mxu0 }
 0x37a   : > { %6183 = vrot.lane.b32.xlu1 %v6172_v6, %s6369_s28 }
 0x37e   : > { %6193 = vrot.lane.b32.xlu1 %v6172_v6, %s6370_s13 }
 0x383   : > { %v2158_v8 = vpop.f32.mrb[46].mxu0 }
 0x384   : > { %v7021_v9 = vpack.c.bf16 %v2158_v8, %v2153_v46  ;;  %v4920_v38 = vpop.f32.mrb[47].mxu0  ;;  %v6197_v10 = vpack.i.bf16 %v2158_v8, %v2153_v46 }
 0x386   : > { %6198 = vrot.lane.b32.xlu0 %v6197_v10, %s6368_s27 }
 0x387   : > { %v2163_v11 = vpop.f32.mrb[48].mxu0 }
 0x388   : > { %v4923_v12 = vpop.f32.mrb[49].mxu0 }
 0x38a   : > { %6208 = vrot.lane.b32.xlu0 %v6197_v10, %s6369_s28 }
 0x38e   : > { %6218 = vrot.lane.b32.xlu0 %v6197_v10, %s6370_s13 }
 0x392   : > { %2218 = vperm.xlu0 %6227, %v1985_v22  }
 0x393   : > { %v2168_v13 = vpop.f32.mrb[50].mxu0 }
 0x394   : > { %v4926_v14 = vpop.f32.mrb[51].mxu0  ;;  %v6202_v15 = vpack.i.bf16 %v2168_v13, %v2163_v11  ;;  %v7026_v17 = vpack.c.bf16 %v2168_v13, %v2163_v11 }
 0x396   : > { %6203 = vrot.lane.b32.xlu1 %v6202_v15, %s6368_s27  ;;  %s6374_s27 = smov 126  }
 0x397   : > { %v2173_v18 = vpop.f32.mrb[52].mxu0 }
 0x398   : > { %v4929_v19 = vpop.f32.mrb[53].mxu0 }
 0x39a   : > { %6213 = vrot.lane.b32.xlu1 %v6202_v15, %s6369_s28 }
 0x39e   : > { %6223 = vrot.lane.b32.xlu1 %v6202_v15, %s6370_s13 }
 0x3a2   : > { %2223 = vperm.xlu1 %6121, %v1986_v20  }
 0x3a8   : > { %v6124_v23 = vpop.permute.xlu1 %6123 }
 0x3a9   : > { %v6126_v24 = vunpack.i.h.bf16 %v6124_v23  ;;  %v6125_v37 = vunpack.i.l.bf16 %v6124_v23 }
 0x3ab   : > { %v5480_v47 = vpack.c.bf16 %v6126_v24, %v6125_v37 }
 0x3ac   : > { %v6129_v27 = vpop.permute.xlu1 %6128 }
 0x3ad   : > { %5481 = vmatprep.subr.bf16.mxu1 %v5480_v47  ;;  %v6131_v26 = vunpack.i.h.bf16 %v6129_v27  ;;  %v6130_v30 = vunpack.i.l.bf16 %v6129_v27 }
 0x3ae   : > { %5483 = vmatpush3.bf16.msra.mxu1 %v5480_v47 }
 0x3af   : > { %v5488_v41 = vpack.c.bf16 %v6131_v26, %v6130_v30 }
 0x3b8   : > { %v6134_v29 = vpop.permute.xlu0 %6133  ;;  %v6144_v39 = vpop.permute.xlu1 %6143 }
 0x3b9   : > { %v6136_v31 = vunpack.i.h.bf16 %v6134_v29  ;;  %v6135_v36 = vunpack.i.l.bf16 %v6134_v29  ;;  %v6146_v43 = vunpack.i.h.bf16 %v6144_v39  ;;  %v6145_v35 = vunpack.i.l.bf16 %v6144_v39 }
 0x3bb   : > { %v5484_v33 = vpack.c.bf16 %v6136_v31, %v6135_v36  ;;  %v5492_v44 = vpack.c.bf16 %v6146_v43, %v6145_v35 }
 0x3bd   : > { %5485 = vmatprep.subr.bf16.mxu1 %v5484_v33  ;;  %5513 = vmatprep.subr.bf16.mxu0 %v5484_v33 }
 0x3be   : > { %5487 = vmatpush3.bf16.msra.mxu1 %v5484_v33  ;;  %5515 = vmatpush3.bf16.msra.mxu0 %v5484_v33 }
 0x3bf   : > { %5489 = vmatprep.subr.bf16.mxu1 %v5488_v41 }
 0x3c2   : > { %5491 = vmatpush3.bf16.msra.mxu1 %v5488_v41 }
 0x3c3   : > { %5493 = vmatprep.subr.bf16.mxu1 %v5492_v44 }
 0x3c6   : > { %5495 = vmatpush3.bf16.msra.mxu1 %v5492_v44 }
 0x3c8   : > { %v6139_v48 = vpop.permute.xlu0 %6138  ;;  %v6154_v50 = vpop.permute.xlu1 %6153 }
 0x3c9   : > { %v6141_v49 = vunpack.i.h.bf16 %v6139_v48  ;;  %v6140_v42 = vunpack.i.l.bf16 %v6139_v48  ;;  %v6156_v25 = vunpack.i.h.bf16 %v6154_v50  ;;  %v6155_v52 = vunpack.i.l.bf16 %v6154_v50 }
 0x3cb   : > { %v5516_v51 = vpack.c.bf16 %v6141_v49, %v6140_v42  ;;  %v5524_v57 = vpack.c.bf16 %v6156_v25, %v6155_v52  ;;  %v2788_v25 = vld [vmem:[%s7391_s3] sm:$0x3f] }
 0x3cc   : > { %v6149_v53 = vpop.permute.xlu0 %6148  ;;  %v6164_v58 = vpop.permute.xlu1 %6163 }
 0x3cd   : > { %v6151_v54 = vunpack.i.h.bf16 %v6149_v53  ;;  %v6150_v45 = vunpack.i.l.bf16 %v6149_v53  ;;  %5517 = vmatprep.subr.bf16.mxu0 %v5516_v51  ;;  %v6166_v60 = vunpack.i.h.bf16 %v6164_v58  ;;  %v6165_v63 = vunpack.i.l.bf16 %v6164_v58 }
 0x3ce   : > { %5519 = vmatpush3.bf16.msra.mxu0 %v5516_v51 }
 0x3cf   : > { %v5496_v55 = vpack.c.bf16 %v6151_v54, %v6150_v45  ;;  %5521 = vmatprep.subr.bf16.mxu0 %v5492_v44  ;;  %v5532_v3 = vpack.c.bf16 %v6166_v60, %v6165_v63 }
 0x3d0   : > { %v6159_v56 = vpop.permute.xlu0 %6158 }
 0x3d1   : > { %v6161_v16 = vunpack.i.h.bf16 %v6159_v56  ;;  %v6160_v59 = vunpack.i.l.bf16 %v6159_v56  ;;  %5497 = vmatprep.subr.bf16.mxu1 %v5496_v55 }
 0x3d2   : > { %5499 = vmatpush3.bf16.msra.mxu1 %v5496_v55  ;;  %5523 = vmatpush3.bf16.msra.mxu0 %v5492_v44 }
 0x3d3   : > { %v5500_v28 = vpack.c.bf16 %v6161_v16, %v6160_v59  ;;  %5525 = vmatprep.subr.bf16.mxu0 %v5524_v57 }
 0x3d5   : > { %5501 = vmatprep.subr.bf16.mxu1 %v5500_v28 }
 0x3d6   : > { %5503 = vmatpush3.bf16.msra.mxu1 %v5500_v28  ;;  %5527 = vmatpush3.bf16.msra.mxu0 %v5524_v57 }
 0x3d7   : > { %5529 = vmatprep.subr.bf16.mxu0 %v5500_v28  ;;  %5537 = vmatprep.subr.bf16.mxu1 %v6995_v61 }
 0x3d8   : > { %v6169_v32 = vpop.permute.xlu0 %6168 }
 0x3d9   : > { %4963 = vmatmul.mubr.f32.vlgmr.msra.gmra.mrb[14].mxu1 %v7040_v0  ;;  %v6171_v2 = vunpack.i.h.bf16 %v6169_v32  ;;  %v6170_v34 = vunpack.i.l.bf16 %v6169_v32 }
 0x3da   : > { %5531 = vmatpush3.bf16.msra.mxu0 %v5500_v28  ;;  %5539 = vmatpush3.bf16.msra.mxu1 %v6995_v61 }
 0x3db   : > { %5533 = vmatprep.subr.bf16.mxu0 %v5532_v3  ;;  %5541 = vmatprep.subr.bf16.mxu1 %v7011_v1  ;;  %v5548_v40 = vpack.c.bf16 %v6171_v2, %v6170_v34 }
 0x3dc   : > { %5032 = vmatprep.mubr.f32.mxu1 %v7003_v62  ;;  %v6179_v5 = vpop.permute.xlu0 %6178 }
 0x3dd   : > { %v6181_v61 = vunpack.i.h.bf16 %v6179_v5  ;;  %v6180_v6 = vunpack.i.l.bf16 %v6179_v5 }
 0x3de   : > { %5535 = vmatpush3.bf16.msra.mxu0 %v5532_v3  ;;  %5543 = vmatpush3.bf16.msra.mxu1 %v7011_v1 }
 0x3df   : > { %5545 = vmatprep.subr.bf16.mxu1 %v5516_v51  ;;  %5569 = vmatprep.subr.bf16.mxu0 %v7011_v1  ;;  %v5556_v7 = vpack.c.bf16 %v6181_v61, %v6180_v6 }
 0x3e0   : > { %v6189_v10 = vpop.permute.xlu0 %6188 }
 0x3e1   : > { %4998 = vmatmul.mubr.f32.vlgmr.msra.gmra.mrb[54].mxu0 %v7040_v0  ;;  %v6191_v12 = vunpack.i.h.bf16 %v6189_v10  ;;  %v6190_v13 = vunpack.i.l.bf16 %v6189_v10 }
 0x3e2   : > { %5547 = vmatpush3.bf16.msra.mxu1 %v5516_v51  ;;  %5571 = vmatpush3.bf16.msra.mxu0 %v7011_v1 }
 0x3e3   : > { %5549 = vmatprep.subr.bf16.mxu1 %v5548_v40  ;;  %5573 = vmatprep.subr.bf16.mxu0 %v7016_v4  ;;  %v5564_v18 = vpack.c.bf16 %v6191_v12, %v6190_v13 }
 0x3e4   : > { %5067 = vmatprep.mubr.f32.mxu0 %v7003_v62 }
 0x3e6   : > { %5551 = vmatpush3.bf16.msra.mxu1 %v5548_v40  ;;  %5575 = vmatpush3.bf16.msra.mxu0 %v7016_v4 }
 0x3e7   : > { %5553 = vmatprep.subr.bf16.mxu1 %v5524_v57  ;;  %5577 = vmatprep.subr.bf16.mxu0 %v5548_v40 }
 0x3e8   : > { %v6174_v46 = vpop.permute.xlu1 %6173 }
 0x3e9   : > { %v6176_v8 = vunpack.i.h.bf16 %v6174_v46  ;;  %v6175_v38 = vunpack.i.l.bf16 %v6174_v46 }
 0x3ea   : > { %5555 = vmatpush3.bf16.msra.mxu1 %v5524_v57  ;;  %5579 = vmatpush3.bf16.msra.mxu0 %v5548_v40 }
 0x3eb   : > { %v5580_v1 = vpack.c.bf16 %v6176_v8, %v6175_v38  ;;  %5557 = vmatprep.subr.bf16.mxu1 %v5556_v7 }
 0x3ec   : > { %v6184_v11 = vpop.permute.xlu1 %6183 }
 0x3ed   : > { %v6186_v14 = vunpack.i.h.bf16 %v6184_v11  ;;  %v6185_v15 = vunpack.i.l.bf16 %v6184_v11  ;;  %5581 = vmatprep.subr.bf16.mxu0 %v5580_v1 }
 0x3ee   : > { %5559 = vmatpush3.bf16.msra.mxu1 %v5556_v7  ;;  %5583 = vmatpush3.bf16.msra.mxu0 %v5580_v1 }
 0x3ef   : > { %5561 = vmatprep.subr.bf16.mxu1 %v5532_v3  ;;  %5585 = vmatprep.subr.bf16.mxu0 %v5556_v7  ;;  %v5588_v19 = vpack.c.bf16 %v6186_v14, %v6185_v15 }
 0x3f0   : > { %v6194_v20 = vpop.permute.xlu1 %6193 }
 0x3f1   : > { %v6196_v22 = vunpack.i.h.bf16 %v6194_v20  ;;  %v6195_v23 = vunpack.i.l.bf16 %v6194_v20 }
 0x3f2   : > { %5563 = vmatpush3.bf16.msra.mxu1 %v5532_v3  ;;  %5587 = vmatpush3.bf16.msra.mxu0 %v5556_v7 }
 0x3f3   : > { %5565 = vmatprep.subr.bf16.mxu1 %v5564_v18  ;;  %5589 = vmatprep.subr.bf16.mxu0 %v5588_v19  ;;  %v5596_v24 = vpack.c.bf16 %v6196_v22, %v6195_v23 }
 0x3f6   : > { %5567 = vmatpush3.bf16.msra.mxu1 %v5564_v18  ;;  %5591 = vmatpush3.bf16.msra.mxu0 %v5588_v19 }
 0x3f7   : > { %5593 = vmatprep.subr.bf16.mxu0 %v5564_v18  ;;  %5601 = vmatprep.subr.bf16.mxu1 %v7016_v4 }
 0x3f8   : > { %v6199_v37 = vpop.permute.xlu0 %6198 }
 0x3f9   : > { %5033 = vmatmul.mubr.f32.vlgmr.msra.gmra.mrb[16].mxu1 %v7040_v0  ;;  %v6201_v47 = vunpack.i.h.bf16 %v6199_v37  ;;  %v6200_v27 = vunpack.i.l.bf16 %v6199_v37 }
 0x3fa   : > { %5595 = vmatpush3.bf16.msra.mxu0 %v5564_v18  ;;  %5603 = vmatpush3.bf16.msra.mxu1 %v7016_v4 }
 0x3fb   : > { %5597 = vmatprep.subr.bf16.mxu0 %v5596_v24  ;;  %5605 = vmatprep.subr.bf16.mxu1 %v7021_v9  ;;  %v5612_v29 = vpack.c.bf16 %v6201_v47, %v6200_v27 }
 0x3fc   : > { %5102 = vmatprep.mubr.f32.mxu1 %v7003_v62  ;;  %v6209_v26 = vpop.permute.xlu0 %6208 }
 0x3fd   : > { %v6211_v4 = vunpack.i.h.bf16 %v6209_v26  ;;  %v6210_v30 = vunpack.i.l.bf16 %v6209_v26 }
 0x3fe   : > { %5599 = vmatpush3.bf16.msra.mxu0 %v5596_v24  ;;  %5607 = vmatpush3.bf16.msra.mxu1 %v7021_v9 }
 0x3ff   : > { %5609 = vmatprep.subr.bf16.mxu1 %v5580_v1  ;;  %5633 = vmatprep.subr.bf16.mxu0 %v7021_v9  ;;  %v5620_v36 = vpack.c.bf16 %v6211_v4, %v6210_v30 }
 0x400   : > { %v6219_v41 = vpop.permute.xlu0 %6218 }
 0x401   : > { %5068 = vmatmul.mubr.f32.vlgmr.msra.gmra.mrb[56].mxu0 %v7040_v0  ;;  %v6221_v35 = vunpack.i.h.bf16 %v6219_v41  ;;  %v6220_v44 = vunpack.i.l.bf16 %v6219_v41 }
 0x402   : > { %5611 = vmatpush3.bf16.msra.mxu1 %v5580_v1  ;;  %5635 = vmatpush3.bf16.msra.mxu0 %v7021_v9 }
 0x403   : > { %5613 = vmatprep.subr.bf16.mxu1 %v5612_v29  ;;  %5637 = vmatprep.subr.bf16.mxu0 %v7026_v17 }
 0x404   : > { %5137 = vmatprep.mubr.f32.mxu0 %v7003_v62 }
 0x406   : > { %5615 = vmatpush3.bf16.msra.mxu1 %v5612_v29  ;;  %5639 = vmatpush3.bf16.msra.mxu0 %v7026_v17  ;;  %v5628_v17 = vpack.c.bf16 %v6221_v35, %v6220_v44 }
 0x407   : > { %5617 = vmatprep.subr.bf16.mxu1 %v5588_v19  ;;  %5641 = vmatprep.subr.bf16.mxu0 %v5612_v29 }
 0x408   : > { %v6204_v31 = vpop.permute.xlu1 %6203 }
 0x409   : > { %v6206_v39 = vunpack.i.h.bf16 %v6204_v31  ;;  %v6205_v33 = vunpack.i.l.bf16 %v6204_v31 }
 0x40a   : > { %5619 = vmatpush3.bf16.msra.mxu1 %v5588_v19  ;;  %5643 = vmatpush3.bf16.msra.mxu0 %v5612_v29 }
 0x40b   : > { %v5644_v9 = vpack.c.bf16 %v6206_v39, %v6205_v33  ;;  %5621 = vmatprep.subr.bf16.mxu1 %v5620_v36 }
 0x40c   : > { %v6214_v43 = vpop.permute.xlu1 %6213 }
 0x40d   : > { %v6216_v62 = vunpack.i.h.bf16 %v6214_v43  ;;  %v6215_v48 = vunpack.i.l.bf16 %v6214_v43  ;;  %5645 = vmatprep.subr.bf16.mxu0 %v5644_v9 }
 0x40e   : > { %5623 = vmatpush3.bf16.msra.mxu1 %v5620_v36  ;;  %5647 = vmatpush3.bf16.msra.mxu0 %v5644_v9  ;;  %v7102_v9 = vld [vmem:[%s7396_s8 + $0x8] sm:$0xff] }
 0x40f   : > { %5625 = vmatprep.subr.bf16.mxu1 %v5596_v24  ;;  %5649 = vmatprep.subr.bf16.mxu0 %v5620_v36  ;;  %v5652_v49 = vpack.c.bf16 %v6216_v62, %v6215_v48 }
 0x410   : > { %v6224_v42 = vpop.permute.xlu1 %6223 }
 0x411   : > { %v6226_v50 = vunpack.i.h.bf16 %v6224_v42  ;;  %v6225_v51 = vunpack.i.l.bf16 %v6224_v42  ;;  %v2219_v52 = vpop.permute.xlu0 %2218 }
 0x412   : > { %5627 = vmatpush3.bf16.msra.mxu1 %v5596_v24  ;;  %5651 = vmatpush3.bf16.msra.mxu0 %v5620_v36 }
 0x413   : > { %5629 = vmatprep.subr.bf16.mxu1 %v5628_v17  ;;  %5653 = vmatprep.subr.bf16.mxu0 %v5652_v49  ;;  %v5660_v53 = vpack.c.bf16 %v6226_v50, %v6225_v51 }
 0x416   : > { %5631 = vmatpush3.bf16.msra.mxu1 %v5628_v17  ;;  %5655 = vmatpush3.bf16.msra.mxu0 %v5652_v49 }
 0x417   : > { %5657 = vmatprep.subr.bf16.mxu0 %v5628_v17  ;;  %5664 = vmatprep.subr.bf16.mxu1 %v6357_v21 }
 0x419   : > { %5103 = vmatmul.mubr.f32.vlgmr.msra.gmra.mrb[18].mxu1 %v7040_v0 }
 0x41a   : > { %5659 = vmatpush3.bf16.msra.mxu0 %v5628_v17  ;;  %4171 = vmatprep.mubr.msk.f32.mxu1 %vm3013_vm9, %v7102_v9 }
 0x41b   : > { %5661 = vmatprep.subr.bf16.mxu0 %v5660_v53 }
 0x41e   : > { %5663 = vmatpush3.bf16.msra.mxu0 %v5660_v53  ;;  %v2793_v53 = vld [vmem:[%s7397_s9] sm:$0xff] }
 0x41f   : > { %5140 = vmatprep.subr.msk.mxu0 %vm2832_vm7, %v2788_v25 }
 0x421   : > { %5138 = vmatmul.mubr.f32.vlgmr.msra.gmra.mrb[58].mxu0 %v7040_v0  ;;  %v2224_v54 = vpop.permute.xlu1 %2223 }
 0x422   : > { %5141 = vmatpush3.msk.msra.mxu0 %vm2832_vm7, %v2788_v25 }
 0x423   : > { %5691 = vmatprep.subr.bf16.mxu0 %v6357_v21 }
 0x4ac   : > { %v4964_v45 = vpop.f32.mrb[14].mxu1 }
 0x4ad   : > { %v2298_v55 = vadd.f32 %v4964_v45, %v2224_v54  ;;  %v2292_v56 = vpop.f32.mrb[15].mxu1 }
 0x4ae   : > { %v2293_v57 = vadd.f32 %v2292_v56, %v2219_v52 }
 0x4af   : > { %v2302_v59 = vmax.f32 %v2298_v55, 0.0 }
 0x4b0   : > { %v2301_v16 = vmax.f32 %v2293_v57, 0.0 }
 0x4b2   : > { %5142 = vmatprep.mubr.msk.f32.mxu0 %vm2795_vm8, %v2301_v16 }
 0x4b3   : > { %5143 = vmatmul.mubr.msk.f32.vlgmr.msra.gmra.mrb[60].mxu0 %vm2795_vm8, %v2302_v59 }
 0x4b4   : > { %v4999_v58 = vpop.f32.mrb[54].mxu0 }
 0x4b5   : > { %v2395_v28 = vadd.f32 %v4999_v58, %v2224_v54  ;;  %v2389_v60 = vpop.f32.mrb[55].mxu0 }
 0x4b6   : > { %v2390_v63 = vadd.f32 %v2389_v60, %v2219_v52 }
 0x4b7   : > { %v2399_v3 = vmax.f32 %v2395_v28, 0.0 }
 0x4b8   : > { %v2398_v0 = vmax.f32 %v2390_v63, 0.0 }
 0x4ba   : > { %5145 = vmatprep.mubr.msk.f32.mxu0 %vm2795_vm8, %v2398_v0 }
 0x4bb   : > { %5146 = vmatmul.mubr.msk.f32.gmra.mrb[62].mxu0 %vm2795_vm8, %v2399_v3 }
 0x4cc   : > { %v5034_v32 = vpop.f32.mrb[16].mxu1 }
 0x4cd   : > { %v2492_v2 = vadd.f32 %v5034_v32, %v2224_v54  ;;  %v2486_v34 = vpop.f32.mrb[17].mxu1 }
 0x4ce   : > { %v2487_v40 = vadd.f32 %v2486_v34, %v2219_v52 }
 0x4cf   : > { %v2496_v61 = vmax.f32 %v2492_v2, 0.0 }
 0x4d0   : > { %v2495_v5 = vmax.f32 %v2487_v40, 0.0 }
 0x4d2   : > { %5148 = vmatprep.mubr.msk.f32.mxu0 %vm2795_vm8, %v2495_v5 }
 0x4d3   : > { %5149 = vmatmul.mubr.msk.f32.gmra.mrb[64].mxu0 %vm2795_vm8, %v2496_v61 }
 0x4d4   : > { %v5069_v6 = vpop.f32.mrb[56].mxu0 }
 0x4d5   : > { %v2589_v46 = vadd.f32 %v5069_v6, %v2224_v54  ;;  %v2583_v7 = vpop.f32.mrb[57].mxu0 }
 0x4d6   : > { %v2584_v8 = vadd.f32 %v2583_v7, %v2219_v52 }
 0x4d7   : > { %v2593_v10 = vmax.f32 %v2589_v46, 0.0 }
 0x4d8   : > { %v2592_v38 = vmax.f32 %v2584_v8, 0.0 }
 0x4da   : > { %5151 = vmatprep.mubr.msk.f32.mxu0 %vm2795_vm8, %v2592_v38 }
 0x4db   : > { %5152 = vmatmul.mubr.msk.f32.gmra.mrb[66].mxu0 %vm2795_vm8, %v2593_v10 }
 0x4ec   : > { %v5104_v1 = vpop.f32.mrb[18].mxu1 }
 0x4ed   : > { %v2686_v11 = vadd.f32 %v5104_v1, %v2224_v54  ;;  %v2680_v12 = vpop.f32.mrb[19].mxu1 }
 0x4ee   : > { %v2681_v13 = vadd.f32 %v2680_v12, %v2219_v52 }
 0x4ef   : > { %v2690_v15 = vmax.f32 %v2686_v11, 0.0 }
 0x4f0   : > { %v2689_v14 = vmax.f32 %v2681_v13, 0.0 }
 0x4f2   : > { %5154 = vmatprep.mubr.msk.f32.mxu0 %vm2795_vm8, %v2689_v14 }
 0x4f3   : > { %5155 = vmatmul.mubr.msk.f32.gmra.mrb[68].mxu0 %vm2795_vm8, %v2690_v15  ;;  %v7146_v15 = vld [vmem:[%s7396_s8] sm:$0xff] }
 0x4f4   : > { %v5139_v18 = vpop.f32.mrb[58].mxu0 }
 0x4f5   : > { %v2783_v19 = vadd.f32 %v5139_v18, %v2224_v54  ;;  %v2777_v20 = vpop.f32.mrb[59].mxu0  ;;  %v2794_v54 = vld [vmem:[%s7397_s9 + $0x8] sm:$0xff] }
 0x4f6   : > { %v2778_v22 = vadd.f32 %v2777_v20, %v2219_v52  ;;  %v7153_v20 = vld [vmem:[%s7396_s8 + $0x18] sm:$0xff] }
 0x4f7   : > { %v2787_v24 = vmax.f32 %v2783_v19, 0.0 }
 0x4f8   : > { %v2786_v23 = vmax.f32 %v2778_v22, 0.0  ;;  %v7160_v22 = vld [vmem:[%s7396_s8 + $0x10] sm:$0xff] }
 0x4fa   : > { %5157 = vmatprep.mubr.msk.f32.mxu0 %vm2795_vm8, %v2786_v23 }
 0x4fb   : > { %5158 = vmatmul.mubr.msk.f32.gmra.mrb[70].mxu0 %vm2795_vm8, %v2787_v24 }
 0x4fc   : > { %4173 = vmatprep.mubr.msk.f32.mxu0 %vm3013_vm9, %v7102_v9 }
 0x586   : > { %v5144_v37 = vpop.f32.mrb[60].mxu0 }
 0x587   : > { %v2902_v47 = vpop.f32.mrb[61].mxu0 }
 0x588   : > { %v6238_v27 = vpack.i.bf16 %v5144_v37, %v2902_v47  ;;  %v5665_v29 = vpack.c.bf16 %v5144_v37, %v2902_v47 }
 0x58a   : > { %6229 = vrot.lane.b32.xlu1 %v6238_v27, %s6371_s25  ;;  %5666 = vmatpush1.bf16.msra.mxu1 %v5665_v29 }
 0x58b   : > { %5667 = vmatprep.subr.bf16.mxu1 %v6357_v21 }
 0x58e   : > { %v5147_v26 = vpop.f32.mrb[62].mxu0 }
 0x58f   : > { %v2912_v4 = vpop.f32.mrb[63].mxu0 }
 0x590   : > { %v6253_v30 = vpack.i.bf16 %v5147_v26, %v2912_v4  ;;  %v5668_v31 = vpack.c.bf16 %v5147_v26, %v2912_v4 }
 0x592   : > { %6234 = vrot.lane.b32.xlu0 %v6253_v30, %s6371_s25  ;;  %5669 = vmatpush1.bf16.msra.mxu1 %v5668_v31 }
 0x593   : > { %5693 = vmatpush1.bf16.msra.mxu0 %v5668_v31  ;;  %5670 = vmatprep.subr.bf16.mxu1 %v6357_v21 }
 0x594   : > { %5694 = vmatprep.subr.bf16.mxu0 %v6357_v21 }
 0x596   : > { %6239 = vrot.lane.b32.xlu0 %v6238_v27, %s6372_s26 }
 0x59a   : > { %6254 = vrot.lane.b32.xlu0 %v6253_v30, %s6372_s26 }
 0x5a6   : > { %v5150_v36 = vpop.f32.mrb[64].mxu0 }
 0x5a7   : > { %v2922_v39 = vpop.f32.mrb[65].mxu0 }
 0x5a8   : > { %v6258_v33 = vpack.i.bf16 %v5150_v36, %v2922_v39  ;;  %v7092_v41 = vpack.c.bf16 %v5150_v36, %v2922_v39 }
 0x5aa   : > { %6244 = vrot.lane.b32.xlu1 %v6258_v33, %s6371_s25  ;;  %5672 = vmatpush1.bf16.msra.mxu1 %v7092_v41 }
 0x5ab   : > { %5696 = vmatpush1.bf16.msra.mxu0 %v7092_v41  ;;  %5673 = vmatprep.subr.bf16.mxu1 %v6357_v21 }
 0x5ac   : > { %5697 = vmatprep.subr.bf16.mxu0 %v6357_v21 }
 0x5ae   : > { %v5153_v43 = vpop.f32.mrb[66].mxu0 }
 0x5af   : > { %v2932_v35 = vpop.f32.mrb[67].mxu0 }
 0x5b0   : > { %v6263_v44 = vpack.i.bf16 %v5153_v43, %v2932_v35  ;;  %v7108_v62 = vpack.c.bf16 %v5153_v43, %v2932_v35 }
 0x5b2   : > { %6264 = vrot.lane.b32.xlu0 %v6263_v44, %s6372_s26  ;;  %6249 = vrot.lane.b32.xlu1 %v6263_v44, %s6371_s25 }
 0x5b3   : > { %5699 = vmatpush1.bf16.msra.mxu0 %v7108_v62 }
 0x5b4   : > { %5700 = vmatprep.subr.bf16.mxu0 %v6357_v21 }
 0x5b6   : > { %6259 = vrot.lane.b32.xlu1 %v6258_v33, %s6372_s26 }
 0x5c6   : > { %v5156_v48 = vpop.f32.mrb[68].mxu0 }
 0x5c7   : > { %v2942_v17 = vpop.f32.mrb[69].mxu0 }
 0x5c8   : > { %v6278_v49 = vpack.i.bf16 %v5156_v48, %v2942_v17  ;;  %v7115_v42 = vpack.c.bf16 %v5156_v48, %v2942_v17 }
 0x5ca   : > { %6269 = vrot.lane.b32.xlu1 %v6278_v49, %s6371_s25 }
 0x5ce   : > { %6279 = vrot.lane.b32.xlu1 %v6278_v49, %s6372_s26  ;;  %v7119_v50 = vpop.f32.mrb[70].mxu0 }
 0x5cf   : > { %v7121_v51 = vpop.f32.mrb[71].mxu0 }
 0x5d0   : > { %v6283_v25 = vpack.i.bf16 %v7119_v50, %v7121_v51  ;;  %v5752_v52 = vpack.c.bf16 %v7119_v50, %v7121_v51 }
 0x5d2   : > { %3005 = vperm.xlu1 %6121, %v2793_v53   ;;  %6274 = vrot.lane.b32.xlu0 %v6283_v25, %s6371_s25 }
 0x5d6   : > { %6284 = vrot.lane.b32.xlu0 %v6283_v25, %s6372_s26  ;;  %s6373_s26 = smov 127  }
 0x5da   : > { %3010 = vperm.xlu0 %6227, %v2794_v54  }
 0x5fc   : > { %v6230_v45 = vpop.permute.xlu1 %6229 }
 0x5fd   : > { %v6232_v55 = vunpack.i.h.bf16 %v6230_v45  ;;  %v6231_v56 = vunpack.i.l.bf16 %v6230_v45 }
 0x5ff   : > { %v5674_v57 = vpack.c.bf16 %v6232_v55, %v6231_v56 }
 0x601   : > { %5675 = vmatpush1.bf16.msra.mxu1 %v5674_v57 }
 0x602   : > { %5676 = vmatprep.subr.bf16.mxu1 %v6357_v21 }
 0x604   : > { %v6235_v16 = vpop.permute.xlu0 %6234 }
 0x605   : > { %v6237_v59 = vunpack.i.h.bf16 %v6235_v16  ;;  %v6236_v58 = vunpack.i.l.bf16 %v6235_v16 }
 0x607   : > { %v5677_v28 = vpack.c.bf16 %v6237_v59, %v6236_v58 }
 0x608   : > { %v6240_v60 = vpop.permute.xlu0 %6239 }
 0x609   : > { %5678 = vmatpush1.bf16.msra.mxu1 %v5677_v28  ;;  %5702 = vmatpush1.bf16.msra.mxu0 %v5677_v28  ;;  %v6242_v32 = vunpack.i.h.bf16 %v6240_v60  ;;  %v6241_v2 = vunpack.i.l.bf16 %v6240_v60 }
 0x60a   : > { %5679 = vmatprep.subr.bf16.mxu1 %v6357_v21  ;;  %5703 = vmatprep.subr.bf16.mxu0 %v6357_v21 }
 0x60b   : > { %v5683_v5 = vpack.c.bf16 %v6242_v32, %v6241_v2 }
 0x60c   : > { %v6255_v40 = vpop.permute.xlu0 %6254 }
 0x60d   : > { %v6257_v61 = vunpack.i.h.bf16 %v6255_v40  ;;  %v6256_v6 = vunpack.i.l.bf16 %v6255_v40 }
 0x60f   : > { %v5686_v38 = vpack.c.bf16 %v6257_v61, %v6256_v6 }
 0x61c   : > { %v6245_v63 = vpop.permute.xlu1 %6244 }
 0x61d   : > { %v6247_v0 = vunpack.i.h.bf16 %v6245_v63  ;;  %v6246_v3 = vunpack.i.l.bf16 %v6245_v63 }
 0x61f   : > { %v5680_v34 = vpack.c.bf16 %v6247_v0, %v6246_v3 }
 0x621   : > { %5681 = vmatpush1.bf16.msra.mxu1 %v5680_v34  ;;  %5705 = vmatpush1.bf16.msra.mxu0 %v5680_v34 }
 0x622   : > { %5682 = vmatprep.subr.bf16.mxu1 %v6357_v21  ;;  %5706 = vmatprep.subr.bf16.mxu0 %v6357_v21 }
 0x624   : > { %v6250_v46 = vpop.permute.xlu1 %6249  ;;  %v6265_v14 = vpop.permute.xlu0 %6264 }
 0x625   : > { %v6252_v7 = vunpack.i.h.bf16 %v6250_v46  ;;  %v6251_v8 = vunpack.i.l.bf16 %v6250_v46  ;;  %5684 = vmatpush1.bf16.msra.mxu1 %v5683_v5  ;;  %v6267_v18 = vunpack.i.h.bf16 %v6265_v14  ;;  %v6266_v19 = vunpack.i.l.bf16 %v6265_v14 }
 0x626   : > { %5685 = vmatprep.subr.bf16.mxu1 %v6357_v21 }
 0x627   : > { %v5707_v10 = vpack.c.bf16 %v6252_v7, %v6251_v8  ;;  %v5716_v23 = vpack.c.bf16 %v6267_v18, %v6266_v19  ;;  %v3379_v18 = vld [vmem:[%s7398_s10 + $0x8] sm:$0xff]  ;;  %v3380_v19 = vld [vmem:[%s7398_s10 + $0x10] sm:$0xff] }
 0x628   : > { %v6260_v1 = vpop.permute.xlu1 %6259 }
 0x629   : > { %v6262_v11 = vunpack.i.h.bf16 %v6260_v1  ;;  %v6261_v12 = vunpack.i.l.bf16 %v6260_v1  ;;  %5687 = vmatpush1.bf16.msra.mxu1 %v5686_v38  ;;  %5708 = vmatpush1.bf16.msra.mxu0 %v5707_v10 }
 0x62a   : > { %5688 = vmatprep.subr.bf16.mxu1 %v6357_v21  ;;  %5709 = vmatprep.subr.bf16.mxu0 %v6357_v21 }
 0x62b   : > { %v5689_v13 = vpack.c.bf16 %v6262_v11, %v6261_v12 }
 0x62d   : > { %5690 = vmatpush1.bf16.msra.mxu1 %v5689_v13  ;;  %5711 = vmatpush1.bf16.msra.mxu0 %v5686_v38 }
 0x62e   : > { %5712 = vmatprep.subr.bf16.mxu0 %v6357_v21  ;;  %5718 = vmatprep.subr.bf16.mxu1 %v6357_v21 }
 0x630   : > { %3085 = vmatmul.mubr.f32.vlgmr.msra.gmra.mrb[20].mxu1 %v7146_v15 }
 0x631   : > { %5714 = vmatpush1.bf16.msra.mxu0 %v5689_v13  ;;  %5720 = vmatpush1.bf16.msra.mxu1 %v7092_v41 }
 0x632   : > { %4172 = vmatprep.mubr.msk.f32.mxu1 %vm3013_vm9, %v7153_v20  ;;  %5715 = vmatprep.subr.bf16.mxu0 %v6357_v21 }
 0x633   : > { %5721 = vmatprep.subr.bf16.mxu1 %v6357_v21 }
 0x634   : > { %3090 = vmatmul.mubr.f32.gmra.mrb[22].mxu1 %v7160_v22 }
 0x635   : > { %5717 = vmatpush1.bf16.msra.mxu0 %v5716_v23  ;;  %5723 = vmatpush1.bf16.msra.mxu1 %v7108_v62 }
 0x636   : > { %5724 = vmatprep.subr.bf16.mxu1 %v6357_v21  ;;  %5745 = vmatprep.subr.bf16.mxu0 %v6357_v21 }
 0x637   : > { %4175 = vmatprep.mubr.msk.f32.mxu1 %vm3013_vm9, %v7102_v9 }
 0x638   : > { %3176 = vmatmul.mubr.f32.vlgmr.msra.gmra.mrb[72].mxu0 %v7146_v15 }
 0x639   : > { %5726 = vmatpush1.bf16.msra.mxu1 %v7115_v42  ;;  %5747 = vmatpush1.bf16.msra.mxu0 %v7108_v62  ;;  %v3378_v62 = vld [vmem:[%s7398_s10] sm:$0xff] }
 0x63a   : > { %4174 = vmatprep.mubr.msk.f32.mxu0 %vm3013_vm9, %v7153_v20  ;;  %5748 = vmatprep.subr.bf16.mxu0 %v6357_v21 }
 0x63b   : > { %5727 = vmatprep.subr.bf16.mxu1 %v6357_v21 }
 0x63c   : > { %3181 = vmatmul.mubr.f32.gmra.mrb[74].mxu0 %v7160_v22  ;;  %v6270_v24 = vpop.permute.xlu1 %6269 }
 0x63d   : > { %5729 = vmatpush1.bf16.msra.mxu1 %v5680_v34  ;;  %5750 = vmatpush1.bf16.msra.mxu0 %v7115_v42  ;;  %v6272_v37 = vunpack.i.h.bf16 %v6270_v24  ;;  %v6271_v47 = vunpack.i.l.bf16 %v6270_v24  ;;  %v3384_v24 = vld [vmem:[%s7398_s10 + $0x30] sm:$0xff] }
 0x63e   : > { %5730 = vmatprep.subr.bf16.mxu1 %v6357_v21  ;;  %5751 = vmatprep.subr.bf16.mxu0 %v6357_v21 }
 0x63f   : > { %4177 = vmatprep.mubr.msk.f32.mxu0 %vm3013_vm9, %v7102_v9  ;;  %v5734_v27 = vpack.c.bf16 %v6272_v37, %v6271_v47  ;;  %v3385_v37 = vld [vmem:[%s7398_s10 + $0x38] sm:$0xff]  ;;  %v3523_v47 = vld [vmem:[%s7398_s10 + $0x40] sm:$0xff] }
 0x640   : > { %v6280_v30 = vpop.permute.xlu1 %6279 }
 0x641   : > { %5732 = vmatpush1.bf16.msra.mxu1 %v5707_v10  ;;  %5753 = vmatpush1.bf16.msra.mxu0 %v5752_v52  ;;  %v6282_v31 = vunpack.i.h.bf16 %v6280_v30  ;;  %v6281_v36 = vunpack.i.l.bf16 %v6280_v30 }
 0x642   : > { %5733 = vmatprep.subr.bf16.mxu1 %v6357_v21  ;;  %5754 = vmatprep.subr.bf16.mxu0 %v6357_v21 }
 0x643   : > { %v5743_v33 = vpack.c.bf16 %v6282_v31, %v6281_v36 }
 0x644   : > { %v6275_v29 = vpop.permute.xlu0 %6274 }
 0x645   : > { %5735 = vmatpush1.bf16.msra.mxu1 %v5734_v27  ;;  %5756 = vmatpush1.bf16.msra.mxu0 %v5707_v10  ;;  %v6277_v26 = vunpack.i.h.bf16 %v6275_v29  ;;  %v6276_v4 = vunpack.i.l.bf16 %v6275_v29 }
 0x646   : > { %5736 = vmatprep.subr.bf16.mxu1 %v6357_v21  ;;  %5757 = vmatprep.subr.bf16.mxu0 %v6357_v21 }
 0x647   : > { %v5761_v39 = vpack.c.bf16 %v6277_v26, %v6276_v4 }
 0x648   : > { %v6285_v41 = vpop.permute.xlu0 %6284 }
 0x649   : > { %5738 = vmatpush1.bf16.msra.mxu1 %v5689_v13  ;;  %5759 = vmatpush1.bf16.msra.mxu0 %v5734_v27  ;;  %v6287_v9 = vunpack.i.h.bf16 %v6285_v41  ;;  %v6286_v43 = vunpack.i.l.bf16 %v6285_v41 }
 0x64a   : > { %5739 = vmatprep.subr.bf16.mxu1 %v6357_v21  ;;  %5760 = vmatprep.subr.bf16.mxu0 %v6357_v21 }
 0x64b   : > { %v5770_v35 = vpack.c.bf16 %v6287_v9, %v6286_v43 }
 0x64d   : > { %5741 = vmatpush1.bf16.msra.mxu1 %v5716_v23  ;;  %5762 = vmatpush1.bf16.msra.mxu0 %v5761_v39 }
 0x64e   : > { %5742 = vmatprep.subr.bf16.mxu1 %v6357_v21  ;;  %5763 = vmatprep.subr.bf16.mxu0 %v6357_v21 }
 0x651   : > { %5744 = vmatpush1.bf16.msra.mxu1 %v5743_v33  ;;  %5765 = vmatpush1.bf16.msra.mxu0 %v5716_v23  ;;  %v3383_v23 = vld [vmem:[%s7398_s10 + $0x28] sm:$0xff] }
 0x652   : > { %5766 = vmatprep.subr.bf16.mxu0 %v6357_v21 }
 0x654   : > { %3267 = vmatmul.mubr.f32.vlgmr.msra.gmra.mrb[24].mxu1 %v7146_v15 }
 0x655   : > { %5768 = vmatpush1.bf16.msra.mxu0 %v5743_v33  ;;  %4176 = vmatprep.mubr.msk.f32.mxu1 %vm3013_vm9, %v7153_v20 }
 0x656   : > { %5769 = vmatprep.subr.bf16.mxu0 %v6357_v21  ;;  %v3006_v21 = vpop.permute.xlu1 %3005 }
 0x658   : > { %3272 = vmatmul.mubr.f32.gmra.mrb[26].mxu1 %v7160_v22 }
 0x659   : > { %5771 = vmatpush1.bf16.msra.mxu0 %v5770_v35  ;;  %5176 = vmatprep.mubr.msk.f32.mxu1 %vm432_vm0, %v3378_v62  ;;  %v3011_v49 = vpop.permute.xlu0 %3010 }
 0x65c   : > { %3358 = vmatmul.mubr.f32.vlgmr.msra.gmra.mrb[76].mxu0 %v7146_v15 }
 0x65d   : > { %4178 = vmatprep.mubr.msk.f32.mxu0 %vm3013_vm9, %v7153_v20  ;;  %v3381_v20 = vld [vmem:[%s7398_s10 + $0x18] sm:$0xff] }
 0x660   : > { %3363 = vmatmul.mubr.f32.gmra.mrb[78].mxu0 %v7160_v22  ;;  %v3382_v22 = vld [vmem:[%s7398_s10 + $0x20] sm:$0xff] }
 0x703   : > { %v3086_v44 = vpop.f32.mrb[20].mxu1 }
 0x704   : > { %v3088_v48 = vpop.f32.mrb[21].mxu1  ;;  %v3087_v17 = vadd.f32 %v3086_v44, %v3006_v21 }
 0x706   : > { %v3095_v53 = vmax.f32 %v3087_v17, 0.0 }
 0x707   : > { %v3091_v42 = vpop.f32.mrb[22].mxu1 }
 0x708   : > { %v3092_v50 = vadd.f32 %v3091_v42, %v3011_v49  ;;  %v3093_v51 = vpop.f32.mrb[23].mxu1 }
 0x70a   : > { %v3096_v25 = vmax.f32 %v3092_v50, 0.0 }
 0x70b   : > { %v3177_v52 = vpop.f32.mrb[72].mxu0 }
 0x70c   : > { %v6288_v54 = vpack.i.bf16 %v3096_v25, %v3095_v53  ;;  %v3179_v45 = vpop.f32.mrb[73].mxu0  ;;  %v5772_v55 = vpack.c.bf16 %v3096_v25, %v3095_v53  ;;  %v3178_v56 = vadd.f32 %v3177_v52, %v3006_v21  ;;  %v3524_v52 = vld [vmem:[%s7398_s10 + $0x48] sm:$0xff] }
 0x70e   : > { %6289 = vrot.lane.b32.xlu1 %v6288_v54, %s6373_s26  ;;  %5773 = vmatprep.subr.bf16.mxu1 %v5772_v55  ;;  %v3186_v58 = vmax.f32 %v3178_v56, 0.0 }
 0x70f   : > { %v3182_v57 = vpop.f32.mrb[74].mxu0  ;;  %5775 = vmatpush3.bf16.msra.mxu1 %v5772_v55 }
 0x710   : > { %v3183_v16 = vadd.f32 %v3182_v57, %v3011_v49  ;;  %v3184_v59 = vpop.f32.mrb[75].mxu0 }
 0x711   : > { %v3527_v59 = vld [vmem:[%s7398_s10 + $0x60] sm:$0xff] }
 0x712   : > { %v3187_v28 = vmax.f32 %v3183_v16, 0.0  ;;  %v3526_v16 = vld [vmem:[%s7398_s10 + $0x58] sm:$0xff] }
 0x714   : > { %v6293_v60 = vpack.i.bf16 %v3187_v28, %v3186_v58  ;;  %v5776_v63 = vpack.c.bf16 %v3187_v28, %v3186_v58 }
 0x716   : > { %6294 = vrot.lane.b32.xlu0 %v6293_v60, %s6373_s26  ;;  %5777 = vmatprep.subr.bf16.mxu1 %v5776_v63 }
 0x717   : > { %5779 = vmatpush3.bf16.msra.mxu1 %v5776_v63 }
 0x727   : > { %v3268_v0 = vpop.f32.mrb[24].mxu1 }
 0x728   : > { %v3270_v3 = vpop.f32.mrb[25].mxu1  ;;  %v3269_v32 = vadd.f32 %v3268_v0, %v3006_v21  ;;  %v3528_v0 = vld [vmem:[%s7398_s10 + $0x68] sm:$0xff] }
 0x729   : > { %v3529_v3 = vld [vmem:[%s7398_s10 + $0x70] sm:$0xff] }
 0x72a   : > { %v3277_v5 = vmax.f32 %v3269_v32, 0.0 }
 0x72b   : > { %v3273_v2 = vpop.f32.mrb[26].mxu1 }
 0x72c   : > { %v3274_v34 = vadd.f32 %v3273_v2, %v3011_v49  ;;  %v3275_v40 = vpop.f32.mrb[27].mxu1 }
 0x72e   : > { %v3278_v61 = vmax.f32 %v3274_v34, 0.0 }
 0x72f   : > { %v3359_v6 = vpop.f32.mrb[76].mxu0 }
 0x730   : > { %v6298_v46 = vpack.i.bf16 %v3278_v61, %v3277_v5  ;;  %v3361_v7 = vpop.f32.mrb[77].mxu0  ;;  %v5780_v8 = vpack.c.bf16 %v3278_v61, %v3277_v5  ;;  %v3360_v38 = vadd.f32 %v3359_v6, %v3006_v21  ;;  %v3530_v5 = vld [vmem:[%s7398_s10 + $0x78] sm:$0xff]  ;;  %v3700_v61 = vld [vmem:[%s7398_s10 + $0x80] sm:$0xff] }
 0x732   : > { %6299 = vrot.lane.b32.xlu1 %v6298_v46, %s6373_s26  ;;  %5781 = vmatprep.subr.bf16.mxu1 %v5780_v8  ;;  %v3368_v12 = vmax.f32 %v3360_v38, 0.0  ;;  %v3701_v38 = vld [vmem:[%s7398_s10 + $0x88] sm:$0xff] }
 0x733   : > { %v3364_v10 = vpop.f32.mrb[78].mxu0  ;;  %5783 = vmatpush3.bf16.msra.mxu1 %v5780_v8 }
 0x734   : > { %v3365_v1 = vadd.f32 %v3364_v10, %v3011_v49  ;;  %v3366_v11 = vpop.f32.mrb[79].mxu0  ;;  %v3702_v10 = vld [vmem:[%s7398_s10 + $0x90] sm:$0xff] }
 0x736   : > { %v3369_v13 = vmax.f32 %v3365_v1, 0.0  ;;  %6309 = vrot.lane.b32.xlu1 %v6288_v54, %s6374_s27 }
 0x738   : > { %v6303_v14 = vpack.i.bf16 %v3369_v13, %v3368_v12  ;;  %v5784_v15 = vpack.c.bf16 %v3369_v13, %v3368_v12 }
 0x73a   : > { %6319 = vrot.lane.b32.xlu1 %v6298_v46, %s6374_s27  ;;  %6304 = vrot.lane.b32.xlu0 %v6303_v14, %s6373_s26 }
 0x73b   : > { %5785 = vmatprep.subr.bf16.mxu1 %v5784_v15 }
 0x73c   : > { %5787 = vmatpush3.bf16.msra.mxu1 %v5784_v15  ;;  %v3704_v15 = vld [vmem:[%s7398_s10 + $0xa0] sm:$0xff] }
 0x73e   : > { %6329 = vrot.lane.b32.xlu1 %v6288_v54, %s6375_s14  ;;  %6314 = vrot.lane.b32.xlu0 %v6293_v60, %s6374_s27  ;;  %v3525_v54 = vld [vmem:[%s7398_s10 + $0x50] sm:$0xff] }
 0x73f   : > { %5177 = vmatmul.mubr.msk.f32.vlgmr.msra.gmra.mrb[28].mxu1 %vm432_vm0, %v3379_v18 }
 0x740   : > { %5179 = vmatprep.mubr.msk.f32.mxu1 %vm432_vm0, %v3380_v19 }
 0x742   : > { %6339 = vrot.lane.b32.xlu1 %v6298_v46, %s6375_s14  ;;  %6324 = vrot.lane.b32.xlu0 %v6303_v14, %s6374_s27 }
 0x743   : > { %5180 = vmatmul.mubr.msk.f32.gmra.mrb[30].mxu1 %vm432_vm0, %v3381_v20 }
 0x744   : > { %5182 = vmatprep.mubr.msk.f32.mxu1 %vm432_vm0, %v3382_v22  ;;  %v3705_v22 = vld [vmem:[%s7398_s10 + $0xa8] sm:$0xff] }
 0x746   : > { %6334 = vrot.lane.b32.xlu0 %v6293_v60, %s6375_s14 }
 0x747   : > { %5183 = vmatmul.mubr.msk.f32.gmra.mrb[32].mxu1 %vm432_vm0, %v3383_v23  ;;  %v3706_v23 = vld [vmem:[%s7398_s10 + $0xb0] sm:$0xff] }
 0x748   : > { %5185 = vmatprep.mubr.msk.f32.mxu1 %vm432_vm0, %v3384_v24 }
 0x74a   : > { %6344 = vrot.lane.b32.xlu0 %v6303_v14, %s6375_s14  ;;  %v3703_v14 = vld [vmem:[%s7398_s10 + $0x98] sm:$0xff] }
 0x74b   : > { %5186 = vmatmul.mubr.msk.f32.gmra.mrb[34].mxu1 %vm432_vm0, %v3385_v37  ;;  %v3707_v37 = vld [vmem:[%s7398_s10 + $0xb8] sm:$0xff] }
 0x74c   : > { %5204 = vmatprep.mubr.msk.f32.mxu1 %vm432_vm0, %v3523_v47  ;;  %v3869_v47 = vld [vmem:[%s7398_s10 + $0xc0] sm:$0xff] }
 0x780   : > { %v6290_v27 = vpop.permute.xlu1 %6289 }
 0x781   : > { %v6292_v29 = vunpack.i.h.bf16 %v6290_v27  ;;  %v6291_v26 = vunpack.i.l.bf16 %v6290_v27  ;;  %v3870_v27 = vld [vmem:[%s7398_s10 + $0xc8] sm:$0xff] }
 0x783   : > { %v5788_v4 = vpack.c.bf16 %v6292_v29, %v6291_v26  ;;  %v3871_v29 = vld [vmem:[%s7398_s10 + $0xd0] sm:$0xff]  ;;  %v3872_v26 = vld [vmem:[%s7398_s10 + $0xd8] sm:$0xff] }
 0x785   : > { %5789 = vmatprep.subr.bf16.mxu1 %v5788_v4 }
 0x786   : > { %5791 = vmatpush3.bf16.msra.mxu1 %v5788_v4  ;;  %v3873_v4 = vld [vmem:[%s7398_s10 + $0xe0] sm:$0xff] }
 0x788   : > { %v6295_v30 = vpop.permute.xlu0 %6294 }
 0x789   : > { %v6297_v31 = vunpack.i.h.bf16 %v6295_v30  ;;  %v6296_v36 = vunpack.i.l.bf16 %v6295_v30  ;;  %v3874_v30 = vld [vmem:[%s7398_s10 + $0xe8] sm:$0xff] }
 0x78b   : > { %v5792_v39 = vpack.c.bf16 %v6297_v31, %v6296_v36  ;;  %v3875_v31 = vld [vmem:[%s7398_s10 + $0xf0] sm:$0xff]  ;;  %v3876_v36 = vld [vmem:[%s7398_s10 + $0xf8] sm:$0xff] }
 0x78d   : > { %5793 = vmatprep.subr.bf16.mxu1 %v5792_v39 }
 0x78e   : > { %5795 = vmatpush3.bf16.msra.mxu1 %v5792_v39  ;;  %v3371_v39 = vld [vmem:[%s7399_s11 + $0x8] sm:$0xff] }
 0x7a4   : > { %v6300_v33 = vpop.permute.xlu1 %6299 }
 0x7a5   : > { %v6302_v41 = vunpack.i.h.bf16 %v6300_v33  ;;  %v6301_v9 = vunpack.i.l.bf16 %v6300_v33  ;;  %v3370_v33 = vld [vmem:[%s7399_s11] sm:$0xff] }
 0x7a7   : > { %v5796_v43 = vpack.c.bf16 %v6302_v41, %v6301_v9 }
 0x7a8   : > { %v6310_v35 = vpop.permute.xlu1 %6309 }
 0x7a9   : > { %5797 = vmatprep.subr.bf16.mxu1 %v5796_v43  ;;  %v6312_v62 = vunpack.i.h.bf16 %v6310_v35  ;;  %v6311_v48 = vunpack.i.l.bf16 %v6310_v35 }
 0x7aa   : > { %5799 = vmatpush3.bf16.msra.mxu1 %v5796_v43 }
 0x7ab   : > { %v5804_v50 = vpack.c.bf16 %v6312_v62, %v6311_v48  ;;  %v3372_v48 = vld [vmem:[%s7399_s11 + $0x10] sm:$0xff] }
 0x7ac   : > { %v6305_v44 = vpop.permute.xlu0 %6304  ;;  %v6320_v25 = vpop.permute.xlu1 %6319 }
 0x7ad   : > { %v6307_v21 = vunpack.i.h.bf16 %v6305_v44  ;;  %v6306_v17 = vunpack.i.l.bf16 %v6305_v44  ;;  %v6322_v45 = vunpack.i.h.bf16 %v6320_v25  ;;  %v6321_v55 = vunpack.i.l.bf16 %v6320_v25  ;;  %v3373_v44 = vld [vmem:[%s7399_s11 + $0x18] sm:$0xff]  ;;  %v3374_v25 = vld [vmem:[%s7399_s11 + $0x20] sm:$0xff] }
 0x7af   : > { %v5800_v49 = vpack.c.bf16 %v6307_v21, %v6306_v17  ;;  %v5812_v58 = vpack.c.bf16 %v6322_v45, %v6321_v55 }
 0x7b0   : > { %v6315_v42 = vpop.permute.xlu0 %6314  ;;  %v6330_v63 = vpop.permute.xlu1 %6329 }
 0x7b1   : > { %v6317_v51 = vunpack.i.h.bf16 %v6315_v42  ;;  %v6316_v53 = vunpack.i.l.bf16 %v6315_v42  ;;  %5801 = vmatprep.subr.bf16.mxu1 %v5800_v49  ;;  %v6332_v32 = vunpack.i.h.bf16 %v6330_v63  ;;  %v6331_v2 = vunpack.i.l.bf16 %v6330_v63 }
 0x7b2   : > { %5803 = vmatpush3.bf16.msra.mxu1 %v5800_v49 }
 0x7b3   : > { %5805 = vmatprep.subr.bf16.mxu1 %v5804_v50  ;;  %v5808_v56 = vpack.c.bf16 %v6317_v51, %v6316_v53  ;;  %v5820_v6 = vpack.c.bf16 %v6332_v32, %v6331_v2  ;;  %v3375_v51 = vld [vmem:[%s7399_s11 + $0x28] sm:$0xff] }
 0x7b4   : > { %v6325_v57 = vpop.permute.xlu0 %6324  ;;  %v6340_v8 = vpop.permute.xlu1 %6339 }
 0x7b5   : > { %5205 = vmatmul.mubr.msk.f32.vlgmr.msra.gmra.mrb[28].mxu1 %vm432_vm0, %v3524_v52  ;;  %v6327_v28 = vunpack.i.h.bf16 %v6325_v57  ;;  %v6326_v60 = vunpack.i.l.bf16 %v6325_v57  ;;  %v6342_v1 = vunpack.i.h.bf16 %v6340_v8  ;;  %v6341_v11 = vunpack.i.l.bf16 %v6340_v8  ;;  %v3377_v57 = vld [vmem:[%s7399_s11 + $0x38] sm:$0xff] }
 0x7b6   : > { %5807 = vmatpush3.bf16.msra.mxu1 %v5804_v50  ;;  %5207 = vmatprep.mubr.msk.f32.mxu1 %vm432_vm0, %v3525_v54 }
 0x7b7   : > { %5809 = vmatprep.subr.bf16.mxu1 %v5808_v56  ;;  %v5816_v34 = vpack.c.bf16 %v6327_v28, %v6326_v60  ;;  %v5828_v18 = vpack.c.bf16 %v6342_v1, %v6341_v11 }
 0x7b8   : > { %v6335_v40 = vpop.permute.xlu0 %6334 }
 0x7b9   : > { %5208 = vmatmul.mubr.msk.f32.gmra.mrb[30].mxu1 %vm432_vm0, %v3526_v16  ;;  %v6337_v46 = vunpack.i.h.bf16 %v6335_v40  ;;  %v6336_v7 = vunpack.i.l.bf16 %v6335_v40 }
 0x7ba   : > { %5811 = vmatpush3.bf16.msra.mxu1 %v5808_v56  ;;  %5210 = vmatprep.mubr.msk.f32.mxu1 %vm432_vm0, %v3527_v59  ;;  %v3376_v59 = vld [vmem:[%s7399_s11 + $0x30] sm:$0xff] }
 0x7bb   : > { %5813 = vmatprep.subr.bf16.mxu1 %v5812_v58  ;;  %v5824_v12 = vpack.c.bf16 %v6337_v46, %v6336_v7 }
 0x7bc   : > { %v6345_v13 = vpop.permute.xlu0 %6344 }
 0x7bd   : > { %5211 = vmatmul.mubr.msk.f32.gmra.mrb[32].mxu1 %vm432_vm0, %v3528_v0  ;;  %v6347_v19 = vunpack.i.h.bf16 %v6345_v13  ;;  %v6346_v20 = vunpack.i.l.bf16 %v6345_v13 }
 0x7be   : > { %5815 = vmatpush3.bf16.msra.mxu1 %v5812_v58  ;;  %5213 = vmatprep.mubr.msk.f32.mxu1 %vm432_vm0, %v3529_v3 }
 0x7bf   : > { %5817 = vmatprep.subr.bf16.mxu1 %v5816_v34  ;;  %v5832_v24 = vpack.c.bf16 %v6347_v19, %v6346_v20 }
 0x7c1   : > { %5214 = vmatmul.mubr.msk.f32.gmra.mrb[34].mxu1 %vm432_vm0, %v3530_v5 }
 0x7c2   : > { %5819 = vmatpush3.bf16.msra.mxu1 %v5816_v34  ;;  %5232 = vmatprep.mubr.msk.f32.mxu1 %vm432_vm0, %v3700_v61 }
 0x7c3   : > { %5821 = vmatprep.subr.bf16.mxu1 %v5820_v6 }
 0x7c5   : > { %5233 = vmatmul.mubr.msk.f32.vlgmr.msra.gmra.mrb[28].mxu1 %vm432_vm0, %v3701_v38 }
 0x7c6   : > { %5823 = vmatpush3.bf16.msra.mxu1 %v5820_v6  ;;  %5235 = vmatprep.mubr.msk.f32.mxu1 %vm432_vm0, %v3702_v10 }
 0x7c7   : > { %5825 = vmatprep.subr.bf16.mxu1 %v5824_v12 }
 0x7c9   : > { %5236 = vmatmul.mubr.msk.f32.gmra.mrb[30].mxu1 %vm432_vm0, %v3703_v14 }
 0x7ca   : > { %5827 = vmatpush3.bf16.msra.mxu1 %v5824_v12  ;;  %5238 = vmatprep.mubr.msk.f32.mxu1 %vm432_vm0, %v3704_v15 }
 0x7cb   : > { %5829 = vmatprep.subr.bf16.mxu1 %v5828_v18 }
 0x7cd   : > { %5239 = vmatmul.mubr.msk.f32.gmra.mrb[32].mxu1 %vm432_vm0, %v3705_v22 }
 0x7ce   : > { %5831 = vmatpush3.bf16.msra.mxu1 %v5828_v18  ;;  %5241 = vmatprep.mubr.msk.f32.mxu1 %vm432_vm0, %v3706_v23 }
 0x7cf   : > { %5833 = vmatprep.subr.bf16.mxu1 %v5832_v24 }
 0x7d1   : > { %5242 = vmatmul.mubr.msk.f32.gmra.mrb[34].mxu1 %vm432_vm0, %v3707_v37 }
 0x7d2   : > { %5835 = vmatpush3.bf16.msra.mxu1 %v5832_v24  ;;  %5260 = vmatprep.mubr.msk.f32.mxu1 %vm432_vm0, %v3869_v47 }
 0x7d5   : > { %5261 = vmatmul.mubr.msk.f32.vlgmr.msra.gmra.mrb[28].mxu1 %vm432_vm0, %v3870_v27 }
 0x7d6   : > { %5263 = vmatprep.mubr.msk.f32.mxu1 %vm432_vm0, %v3871_v29 }
 0x7d9   : > { %5264 = vmatmul.mubr.msk.f32.gmra.mrb[30].mxu1 %vm432_vm0, %v3872_v26 }
 0x7da   : > { %5266 = vmatprep.mubr.msk.f32.mxu1 %vm432_vm0, %v3873_v4 }
 0x7dd   : > { %5267 = vmatmul.mubr.msk.f32.gmra.mrb[32].mxu1 %vm432_vm0, %v3874_v30 }
 0x7de   : > { %5269 = vmatprep.mubr.msk.f32.mxu1 %vm432_vm0, %v3875_v31 }
 0x7e1   : > { %5270 = vmatmul.mubr.msk.f32.gmra.mrb[34].mxu1 %vm432_vm0, %v3876_v36 }
 0x8a8   : > { %v5262_v41 = vpop.f32.mrb[28].mxu1 }
 0x8a9   : > { %v5836_v9 = vadd.f32 %v5262_v41, %v3371_v39  ;;  %v3991_v43 = vpop.f32.mrb[29].mxu1 }
 0x8aa   : > { %v5837_v35 = vadd.f32 %v3991_v43, %v3370_v33 }
 0x8ab   : > { %v4039_v62 = vmax.f32 %v5836_v9, 0.0 }
 0x8ac   : > { %v4038_v21 = vmax.f32 %v5837_v35, 0.0  ;;  %v5265_v17 = vpop.f32.mrb[30].mxu1 }
 0x8ad   : > { %4048 = vst.msk [vmem:[%s7349_s20 + $0x8] sm:$0xff] %vm4046_vm10, %v4039_v62  ;;  %v5838_v49 = vadd.f32 %v5265_v17, %v3373_v44  ;;  %v4001_v42 = vpop.f32.mrb[31].mxu1 }
 0x8ae   : > { %4047 = vst.msk [vmem:[%s7349_s20] sm:$0xff] %vm4046_vm10, %v4038_v21  ;;  %v5839_v50 = vadd.f32 %v4001_v42, %v3372_v48 }
 0x8af   : > { %v4041_v53 = vmax.f32 %v5838_v49, 0.0 }
 0x8b0   : > { %v4040_v52 = vmax.f32 %v5839_v50, 0.0  ;;  %v5268_v54 = vpop.f32.mrb[32].mxu1 }
 0x8b1   : > { %4050 = vst.msk [vmem:[%s7349_s20 + $0x18] sm:$0xff] %vm4046_vm10, %v4041_v53  ;;  %v5840_v45 = vadd.f32 %v5268_v54, %v3375_v51  ;;  %v4011_v55 = vpop.f32.mrb[33].mxu1 }
 0x8b2   : > { %4049 = vst.msk [vmem:[%s7349_s20 + $0x10] sm:$0xff] %vm4046_vm10, %v4040_v52  ;;  %v5841_v56 = vadd.f32 %v4011_v55, %v3374_v25 }
 0x8b3   : > { %v4043_v16 = vmax.f32 %v5840_v45, 0.0 }
 0x8b4   : > { %v4042_v58 = vmax.f32 %v5841_v56, 0.0  ;;  %v5271_v28 = vpop.f32.mrb[34].mxu1 }
 0x8b5   : > { %4052 = vst.msk [vmem:[%s7349_s20 + $0x28] sm:$0xff] %vm4046_vm10, %v4043_v16  ;;  %v5842_v60 = vadd.f32 %v5271_v28, %v3377_v57  ;;  %v4021_v63 = vpop.f32.mrb[35].mxu1 }
 0x8b6   : > { %4051 = vst.msk [vmem:[%s7349_s20 + $0x20] sm:$0xff] %vm4046_vm10, %v4042_v58  ;;  %v5843_v0 = vadd.f32 %v4021_v63, %v3376_v59 }
 0x8b7   : > { %v4045_v3 = vmax.f32 %v5842_v60, 0.0 }
 0x8b8   : > { %v4044_v32 = vmax.f32 %v5843_v0, 0.0 }
 0x8b9   : > { %4054 = vst.msk [vmem:[%s7349_s20 + $0x38] sm:$0xff] %vm4046_vm10, %v4045_v3 }
 0x8ba   : > { %4053 = vst.msk [vmem:[%s7349_s20 + $0x30] sm:$0xff] %vm4046_vm10, %v4044_v32 }
 0x8bb PF: > { %s22_s21 = sadd.s32 1, %s6354_s21  }
 0x8bc   : > { %p19_p4 = scmp.ge.s32.totalorder %s22_s21, 4  }
 0x8be   :  { %21 = sbr.rel (!%p19_p4) target bundleno = 1 (0x1), region = 98 }

</bundles_post_ra>
